<compile_context>
chip_gen: v5e
topology: v5e:2x2
jax: 0.10.0
libtpu: 0.0.40
codegen_flags: <defaults>
</compile_context>

<pallas_src>
import jax
import jax.numpy as jnp
from jax.experimental import pallas as pl
from jax.experimental.pallas import tpu as pltpu

_BN_EPS = 1e-5
_LANE = 128


def _round_up(x, m):
    return (x + m - 1) // m * m


def _nbytes(shape, dtype):
    n = 1
    for d in shape:
        n *= int(d)
    return n * jnp.dtype(dtype).itemsize


# ----------------------------- Pallas kernels ------------------------------

def _make_conv_kernel(*, stride, mode, Ho, Wo, Ci, co_blk):
    """Fused 3x3 conv + folded BN (+residual/projection) (+ReLU) kernel.

    mode: "relu"     -> relu(bn(conv(x)))                        (conv1)
          "add_res"  -> relu(bn(conv(x)) + residual)             (identity shortcut)
          "add_proj" -> relu(bn(conv(x)) + bn_sc(x_sub @ w_sc))  (projection shortcut)

    The conv is ONE MXU contraction with K = 9*Ci against an in-VMEM im2col
    scratch that is built once per batch element (co-block 0 only).
    """
    assert stride in (1, 2)
    assert mode in ("relu", "add_res", "add_proj")
    taps = [(dy, dx) for dy in range(3) for dx in range(3)]
    HW = Ho * Wo

    def kernel(*refs):
        if stride == 1:
            x_ref = refs[0]
            pos = 1
        else:
            phase_refs = refs[:4]
            pos = 4
        w_ref, s_ref, b_ref = refs[pos:pos + 3]
        pos += 3
        if mode == "add_res":
            res_ref = refs[pos]
            pos += 1
        elif mode == "add_proj":
            xsc_ref, wsc_ref, ssc_ref, bsc_ref = refs[pos:pos + 4]
            pos += 4
        out_ref = refs[pos]
        if stride == 1:
            xp_ref, col_ref = refs[pos + 1:]
        else:
            (col_ref,) = refs[pos + 1:]

        # Build the shared (Ho*Wo, 9*Ci) im2col scratch once per batch element.
        # Grid axis 1 (Co blocks) is "arbitrary", so every co-block of a batch
        # element runs sequentially on the same core and sees this scratch.
        @pl.when(pl.program_id(1) == 0)
        def _build_im2col():
            if stride == 1:
                # Zero the 1-px halo, place the activation interior, then slice
                # the 9 statically shifted windows into the im2col scratch.
                zr = jnp.zeros((1, Wo + 2, Ci), xp_ref.dtype)
                zc = jnp.zeros((Ho + 2, 1, Ci), xp_ref.dtype)
                xp_ref[0:1, :, :] = zr
                xp_ref[Ho + 1:Ho + 2, :, :] = zr
                xp_ref[:, 0:1, :] = zc
                xp_ref[:, Wo + 1:Wo + 2, :] = zc
                xp_ref[1:Ho + 1, 1:Wo + 1, :] = x_ref[...]
                for t, (dy, dx) in enumerate(taps):
                    win = xp_ref[dy:dy + Ho, dx:dx + Wo, :]
                    col_ref[:, t * Ci:(t + 1) * Ci] = win.reshape(HW, Ci)
            else:
                # Pre-padded, phase-decomposed input: tap (dy,dx) is a static
                # contiguous window of phase (dy%2, dx%2).
                for t, (dy, dx) in enumerate(taps):
                    ph = phase_refs[(dy % 2) * 2 + (dx % 2)]
                    oy, ox = dy // 2, dx // 2
                    win = ph[oy:oy + Ho, ox:ox + Wo, :]
                    col_ref[:, t * Ci:(t + 1) * Ci] = win.reshape(HW, Ci)

        # Single big-K contraction (accumulation stays in the MXU).
        y = jnp.dot(col_ref[...], w_ref[...], preferred_element_type=jnp.float32)
        # Folded BatchNorm affine (f32 epilogue).
        y = y * s_ref[...] + b_ref[...]

        if mode == "add_res":
            y = y + res_ref[...].reshape(HW, co_blk).astype(jnp.float32)
        elif mode == "add_proj":
            ci_sc = xsc_ref.shape[-1]
            r = jnp.dot(xsc_ref[...].reshape(HW, ci_sc), wsc_ref[...],
                        preferred_element_type=jnp.float32)
            r = r * ssc_ref[...] + bsc_ref[...]
            y = y + r

        y = jnp.maximum(y, 0.0)
        out_ref[...] = y.reshape(Ho, Wo, co_blk).astype(out_ref.dtype)

    return kernel


def _conv3x3_bn_act(acts, w, scale, bias, *, stride, mode, Ho, Wo,
                    extra_inputs=(), extra_specs=(), out_dtype=jnp.bfloat16):
    """acts: (x,) of shape (N,H,W,Ci) bf16 for stride=1, or 4 pre-padded
    phases (N,Ho+1,Wo+1,Ci) bf16 for stride=2.  w: (9*Ci, Co) bf16.
    scale/bias: (1, Co) f32.  Ci and Co must be lane multiples."""
    acts = tuple(acts)
    N = acts[0].shape[0]
    Ci = acts[0].shape[-1]
    Co = w.shape[-1]
    assert Ci % _LANE == 0 and Co % _LANE == 0
    n_co = Co // _LANE
    HW = Ho * Wo

    kernel = _make_conv_kernel(stride=stride, mode=mode, Ho=Ho, Wo=Wo,
                               Ci=Ci, co_blk=_LANE)

    act_specs = [pl.BlockSpec((None,) + a.shape[1:], lambda n, c: (n, 0, 0, 0))
                 for a in acts]
    in_specs = act_specs + [
        pl.BlockSpec((9 * Ci, _LANE), lambda n, c: (0, c)),   # conv weights
        pl.BlockSpec((1, _LANE), lambda n, c: (0, c)),        # BN scale
        pl.BlockSpec((1, _LANE), lambda n, c: (0, c)),        # BN bias
    ] + list(extra_specs)

    scratch = []
    if stride == 1:
        scratch.append(pltpu.VMEM((Ho + 2, Wo + 2, Ci), jnp.bfloat16))  # halo
    scratch.append(pltpu.VMEM((HW, 9 * Ci), jnp.bfloat16))              # im2col

    # Computed VMEM budget: double-buffered IO + persistent scratch + f32
    # temporaries, with margin, clamped under v7x's 64 MiB per-TC ceiling.
    io = sum(_nbytes(a.shape[1:], a.dtype) for a in acts)
    io += _nbytes((9 * Ci, _LANE), jnp.bfloat16)
    io += 2 * _nbytes((1, _LANE), jnp.float32)
    io += sum(_nbytes(e.shape[1:] if e.ndim == 4 else e.shape, e.dtype)
              for e in extra_inputs)
    io += _nbytes((Ho, Wo, _LANE), out_dtype)
    sc_bytes = _nbytes((HW, 9 * Ci), jnp.bfloat16)
    if stride == 1:
        sc_bytes += _nbytes((Ho + 2, Wo + 2, Ci), jnp.bfloat16)
    tmp_bytes = 4 * _nbytes((HW, _LANE), jnp.float32)
    need = 2 * io + sc_bytes + tmp_bytes
    vmem_limit = int(min(max(need * 3 // 2, 32 * 1024 * 1024), 64 * 1024 * 1024))

    return pl.pallas_call(
        kernel,
        out_shape=jax.ShapeDtypeStruct((N, Ho, Wo, Co), out_dtype),
        grid_spec=pltpu.PrefetchScalarGridSpec(
            num_scalar_prefetch=0,
            grid=(N, n_co),
            in_specs=in_specs,
            out_specs=pl.BlockSpec((None, Ho, Wo, _LANE),
                                   lambda n, c: (n, 0, 0, c)),
            scratch_shapes=scratch,
        ),
        compiler_params=pltpu.CompilerParams(
            # Batch axis shards across TensorCores; Co axis stays sequential on
            # one core because co-block 0 builds the shared im2col scratch.
            dimension_semantics=("parallel", "arbitrary"),
            vmem_limit_bytes=vmem_limit,
        ),
    )(*acts, w, scale, bias, *extra_inputs)


# --------------------------- parameter preparation --------------------------

def _prep_w3x3(w_oihw, ci_pad, co_pad):
    """(O, I, 3, 3) -> (9*ci_pad, co_pad) bf16, tap-major (dy, dx) rows."""
    O, I, kh, kw = w_oihw.shape
    w = jnp.transpose(w_oihw, (2, 3, 1, 0))                   # (3, 3, I, O)
    w = jnp.pad(w, ((0, 0), (0, 0), (0, ci_pad - I), (0, co_pad - O)))
    return w.reshape(kh * kw * ci_pad, co_pad).astype(jnp.bfloat16)


def _fold_bn(bn_params, co_pad):
    gamma, beta, mean, var = bn_params
    scale = gamma / jnp.sqrt(var + _BN_EPS)
    bias = beta - mean * scale
    # Padded channels get scale=0 / bias=0 so padded outputs stay exactly 0.
    scale = jnp.pad(scale, (0, co_pad - scale.shape[0]))
    bias = jnp.pad(bias, (0, co_pad - bias.shape[0]))
    return (scale.reshape(1, -1).astype(jnp.float32),
            bias.reshape(1, -1).astype(jnp.float32))


def init_basic_block(key, in_planes, planes, stride):
    k1, k2, k3, k4, k5, k6 = jax.random.split(key, 6)

    def bn_init(k, c):
        kg, kb, km, kv = jax.random.split(k, 4)
        gamma = 1.0 + 0.1 * jax.random.normal(kg, (c,), jnp.float32)
        beta = 0.1 * jax.random.normal(kb, (c,), jnp.float32)
        mean = 0.1 * jax.random.normal(km, (c,), jnp.float32)
        var = 1.0 + 0.1 * jax.random.uniform(kv, (c,), jnp.float32)
        return gamma, beta, mean, var

    params = {
        "stride": stride,
        "w1": 0.2 * jax.random.normal(k1, (planes, in_planes, 3, 3), jnp.float32),
        "w2": 0.2 * jax.random.normal(k2, (planes, planes, 3, 3), jnp.float32),
        "bn1": bn_init(k3, planes),
        "bn2": bn_init(k4, planes),
        "has_proj": (stride != 1) or (in_planes != planes),
    }
    if params["has_proj"]:
        params["w_sc"] = 0.2 * jax.random.normal(
            k5, (planes, in_planes, 1, 1), jnp.float32)
        params["bn_sc"] = bn_init(k6, planes)
    return params


# ------------------------------ block forward -------------------------------

def basic_block_forward(params, x_nchw, *, nchw_f32_out=True):
    stride = params["stride"]
    assert stride in (1, 2)
    N, Cin, H, W = x_nchw.shape
    planes = params["w1"].shape[0]
    Ci_pad = _round_up(Cin, _LANE)
    Co = _round_up(planes, _LANE)

    # NHWC, bf16, channel-padded to a lane multiple -- single XLA pass.
    x = jnp.transpose(x_nchw, (0, 2, 3, 1)).astype(jnp.bfloat16)
    x = jnp.pad(x, ((0, 0), (0, 0), (0, 0), (0, Ci_pad - Cin)))

    w1 = _prep_w3x3(params["w1"], Ci_pad, Co)
    s1, b1 = _fold_bn(params["bn1"], Co)
    w2 = _prep_w3x3(params["w2"], Co, Co)
    s2, b2 = _fold_bn(params["bn2"], Co)

    Ho = (H - 1) // stride + 1
    Wo = (W - 1) // stride + 1

    if stride == 1:
        conv1_in = (x,)
    else:
        # TODO(synk): stride-2 phase decomposition still materialized in HBM.
        xp = jnp.pad(x, ((0, 0), (1, 1), (1, 1), (0, 0)))
        phases = []
        for py in range(2):
            for px in range(2):
                ph = xp[:, py::2, px::2, :][:, :Ho + 1, :Wo + 1, :]
                dh, dw = Ho + 1 - ph.shape[1], Wo + 1 - ph.shape[2]
                if dh or dw:
                    ph = jnp.pad(ph, ((0, 0), (0, dh), (0, dw), (0, 0)))
                phases.append(ph)
        conv1_in = tuple(phases)

    # conv1 + bn1 + relu; bf16 intermediate halves HBM writeback.
    out1 = _conv3x3_bn_act(conv1_in, w1, s1, b1, stride=stride, mode="relu",
                           Ho=Ho, Wo=Wo, out_dtype=jnp.bfloat16)

    final_dtype = jnp.float32 if nchw_f32_out else jnp.bfloat16

    if params["has_proj"]:
        # Fuse the 1x1 projection conv + BN into the final kernel.
        w_sc = params["w_sc"][:, :, 0, 0].T                            # (Cin, planes)
        w_sc = jnp.pad(w_sc, ((0, Ci_pad - Cin), (0, Co - planes))).astype(jnp.bfloat16)
        s_sc, b_sc = _fold_bn(params["bn_sc"], Co)
        x_sub = x[:, ::stride, ::stride, :]                            # (N,Ho,Wo,Ci_pad) bf16
        extra_inputs = (x_sub, w_sc, s_sc, b_sc)
        extra_specs = (
            pl.BlockSpec((None, Ho, Wo, Ci_pad), lambda n, c: (n, 0, 0, 0)),
            pl.BlockSpec((Ci_pad, _LANE), lambda n, c: (0, c)),
            pl.BlockSpec((1, _LANE), lambda n, c: (0, c)),
            pl.BlockSpec((1, _LANE), lambda n, c: (0, c)),
        )
        out = _conv3x3_bn_act((out1,), w2, s2, b2, stride=1, mode="add_proj",
                              Ho=Ho, Wo=Wo, extra_inputs=extra_inputs,
                              extra_specs=extra_specs, out_dtype=final_dtype)
    else:
        # Identity shortcut (stride==1, Cin==planes): reuse the channel-padded
        # bf16 input buffer as the residual -- no extra padded f32 copy of x.
        assert Ci_pad == Co
        extra_inputs = (x,)
        extra_specs = (
            pl.BlockSpec((None, Ho, Wo, _LANE), lambda n, c: (n, 0, 0, c)),
        )
        out = _conv3x3_bn_act((out1,), w2, s2, b2, stride=1, mode="add_res",
                              Ho=Ho, Wo=Wo, extra_inputs=extra_inputs,
                              extra_specs=extra_specs, out_dtype=final_dtype)

    if nchw_f32_out:
        out = out[..., :planes]                      # strip channel padding
        return jnp.transpose(out, (0, 3, 1, 2))      # back to NCHW (PyTorch)
    # TODO(synk): when chaining BasicBlocks, keep NHWC / bf16 / channel-padded
    # activations and skip the slice + transpose above.
    return out


# ------------------------------ JAX references -------------------------------

def _ref_forward(params, x_nchw, matmul_dtype=jnp.float32):
    """Reference BasicBlock. matmul_dtype=bf16 mimics bf16-MXU/f32-accum math."""
    stride = params["stride"]

    def conv(x, w, s, pad):
        return jax.lax.conv_general_dilated(
            x.astype(matmul_dtype), w.astype(matmul_dtype), (s, s),
            [(pad, pad), (pad, pad)],
            dimension_numbers=("NCHW", "OIHW", "NCHW"),
            preferred_element_type=jnp.float32)

    def bn(x, bnp):
        gamma, beta, mean, var = bnp
        scale = gamma / jnp.sqrt(var + _BN_EPS)
        return (x * scale[None, :, None, None]
                + (beta - mean * scale)[None, :, None, None])

    out = jax.nn.relu(bn(conv(x_nchw, params["w1"], stride, 1), params["bn1"]))
    out = bn(conv(out, params["w2"], 1, 1), params["bn2"])
    if params["has_proj"]:
        sc = bn(conv(x_nchw, params["w_sc"], stride, 0), params["bn_sc"])
    else:
        # Kernel adds the residual from the bf16 activation buffer; mirror that
        # rounding here (no-op when matmul_dtype == f32).
        sc = x_nchw.astype(matmul_dtype).astype(jnp.float32)
    return jax.nn.relu(out + sc)


# --------------------------------- main -------------------------------------

if __name__ == "__main__":
    key = jax.random.PRNGKey(0)
    kx, kp1, kp2 = jax.random.split(key, 3)

    x = jax.random.normal(kx, (2, 4, 16, 16), jnp.float32)  # NCHW, like PyTorch

    # Case 1: identity shortcut (in_planes == planes, stride == 1)
    params1 = init_basic_block(kp1, in_planes=4, planes=4, stride=1)
    out1 = jax.block_until_ready(basic_block_forward(params1, x))
    assert out1.shape == (2, 4, 16, 16)
    ref1_bf16 = _ref_forward(params1, x, jnp.bfloat16)   # same math as kernel
    ref1_f32 = _ref_forward(params1, x, jnp.float32)     # pure-f32 sanity check
    assert jnp.allclose(out1, ref1_bf16, atol=3e-3, rtol=3e-3), \
        "identity shortcut: mismatch vs bf16-matmul reference"
    assert jnp.allclose(out1, ref1_f32, atol=1e-1, rtol=1e-1), \
        "identity shortcut: mismatch vs f32 reference"

    # Case 2: projection shortcut (1x1 conv + BN, stride 2, channel change)
    params2 = init_basic_block(kp2, in_planes=4, planes=8, stride=2)
    out2 = jax.block_until_ready(basic_block_forward(params2, x))
    assert out2.shape == (2, 8, 8, 8)
    ref2_bf16 = _ref_forward(params2, x, jnp.bfloat16)
    ref2_f32 = _ref_forward(params2, x, jnp.float32)
    assert jnp.allclose(out2, ref2_bf16, atol=3e-3, rtol=3e-3), \
        "projection shortcut: mismatch vs bf16-matmul reference"
    assert jnp.allclose(out2, ref2_f32, atol=1e-1, rtol=1e-1), \
        "projection shortcut: mismatch vs f32 reference"

    print("KERNEL_OK")
</pallas_src>

<mosaic_0001>
module attributes {stable_mosaic.version = 11 : i64} {
  func.func @kernel(%arg0: i32, %arg1: i32, %arg2: memref<1x16x16x128xbf16, #tpu.memory_space<vmem>>, %arg3: memref<1152x128xbf16, #tpu.memory_space<vmem>>, %arg4: memref<1x128xf32, #tpu.memory_space<vmem>>, %arg5: memref<1x128xf32, #tpu.memory_space<vmem>>, %arg6: memref<1x16x16x128xbf16, #tpu.memory_space<vmem>>, %arg7: memref<18x18x128xbf16, #tpu.memory_space<vmem>>, %arg8: memref<256x1152xbf16, #tpu.memory_space<vmem>>) attributes {dimension_semantics = [#tpu.dimension_semantics<parallel>, #tpu.dimension_semantics<arbitrary>], iteration_bounds = array<i64: 2, 1>, scalar_prefetch = 0 : i64, scratch_operands = 2 : i64, tpu.core_type = #tpu.core_type<tc>, window_params = [{transform_indices = @transform_0, window_bounds = array<i64: 1, 16, 16, 128>}, {transform_indices = @transform_1, window_bounds = array<i64: 1152, 128>}, {transform_indices = @transform_2, window_bounds = array<i64: 1, 128>}, {transform_indices = @transform_3, window_bounds = array<i64: 1, 128>}, {transform_indices = @transform_4, window_bounds = array<i64: 1, 16, 16, 128>}]} {
    %c0_i32 = arith.constant 0 : i32
    %0 = arith.cmpi eq, %arg1, %c0_i32 : i32
    %1 = arith.extui %0 : i1 to i32
    %c0_i32_0 = arith.constant 0 : i32
    %2 = arith.cmpi ne, %1, %c0_i32_0 : i32
    scf.if %2 {
      %cst_13 = arith.constant 0.000000e+00 : bf16
      %19 = vector.broadcast %cst_13 : bf16 to vector<1x18x128xbf16>
      %cst_14 = arith.constant 0.000000e+00 : bf16
      %20 = vector.broadcast %cst_14 : bf16 to vector<18x1x128xbf16>
      %c0_15 = arith.constant 0 : index
      %c0_16 = arith.constant 0 : index
      %c0_17 = arith.constant 0 : index
      %21 = vector.load %arg7[%c0_15, %c0_16, %c0_17] : memref<18x18x128xbf16, #tpu.memory_space<vmem>>, vector<1x18x128xbf16>
      tpu.vector_store %arg7[%c0_15, %c0_16, %c0_17], %19 {strides = array<i32>} : memref<18x18x128xbf16, #tpu.memory_space<vmem>>, vector<1x18x128xbf16>,
      %c17 = arith.constant 17 : index
      %c0_18 = arith.constant 0 : index
      %c0_19 = arith.constant 0 : index
      %22 = vector.load %arg7[%c17, %c0_18, %c0_19] : memref<18x18x128xbf16, #tpu.memory_space<vmem>>, vector<1x18x128xbf16>
      tpu.vector_store %arg7[%c17, %c0_18, %c0_19], %19 {strides = array<i32>} : memref<18x18x128xbf16, #tpu.memory_space<vmem>>, vector<1x18x128xbf16>,
      %c0_20 = arith.constant 0 : index
      %c0_21 = arith.constant 0 : index
      %c0_22 = arith.constant 0 : index
      %23 = vector.load %arg7[%c0_20, %c0_21, %c0_22] : memref<18x18x128xbf16, #tpu.memory_space<vmem>>, vector<18x1x128xbf16>
      tpu.vector_store %arg7[%c0_20, %c0_21, %c0_22], %20 {strides = array<i32>} : memref<18x18x128xbf16, #tpu.memory_space<vmem>>, vector<18x1x128xbf16>,
      %c0_23 = arith.constant 0 : index
      %c17_24 = arith.constant 17 : index
      %c0_25 = arith.constant 0 : index
      %24 = vector.load %arg7[%c0_23, %c17_24, %c0_25] : memref<18x18x128xbf16, #tpu.memory_space<vmem>>, vector<18x1x128xbf16>
      tpu.vector_store %arg7[%c0_23, %c17_24, %c0_25], %20 {strides = array<i32>} : memref<18x18x128xbf16, #tpu.memory_space<vmem>>, vector<18x1x128xbf16>,
      %c0_26 = arith.constant 0 : index
      %c0_27 = arith.constant 0 : index
      %c0_28 = arith.constant 0 : index
      %c0_29 = arith.constant 0 : index
      %25 = vector.load %arg2[%c0_26, %c0_27, %c0_28, %c0_29] : memref<1x16x16x128xbf16, #tpu.memory_space<vmem>>, vector<1x16x16x128xbf16>
      %26 = vector.shape_cast %25 : vector<1x16x16x128xbf16> to vector<16x16x128xbf16>
      %c1 = arith.constant 1 : index
      %c1_30 = arith.constant 1 : index
      %c0_31 = arith.constant 0 : index
      %27 = vector.load %arg7[%c1, %c1_30, %c0_31] : memref<18x18x128xbf16, #tpu.memory_space<vmem>>, vector<16x16x128xbf16>
      tpu.vector_store %arg7[%c1, %c1_30, %c0_31], %26 {strides = array<i32>} : memref<18x18x128xbf16, #tpu.memory_space<vmem>>, vector<16x16x128xbf16>,
      %c0_32 = arith.constant 0 : index
      %c0_33 = arith.constant 0 : index
      %c0_34 = arith.constant 0 : index
      %28 = vector.load %arg7[%c0_32, %c0_33, %c0_34] : memref<18x18x128xbf16, #tpu.memory_space<vmem>>, vector<16x16x128xbf16>
      %29 = vector.shape_cast %28 : vector<16x16x128xbf16> to vector<256x128xbf16>
      %c0_35 = arith.constant 0 : index
      %c0_36 = arith.constant 0 : index
      %30 = vector.load %arg8[%c0_35, %c0_36] : memref<256x1152xbf16, #tpu.memory_space<vmem>>, vector<256x128xbf16>
      tpu.vector_store %arg8[%c0_35, %c0_36], %29 {strides = array<i32>} : memref<256x1152xbf16, #tpu.memory_space<vmem>>, vector<256x128xbf16>,
      %c0_37 = arith.constant 0 : index
      %c1_38 = arith.constant 1 : index
      %c0_39 = arith.constant 0 : index
      %31 = vector.load %arg7[%c0_37, %c1_38, %c0_39] : memref<18x18x128xbf16, #tpu.memory_space<vmem>>, vector<16x16x128xbf16>
      %32 = vector.shape_cast %31 : vector<16x16x128xbf16> to vector<256x128xbf16>
      %c0_40 = arith.constant 0 : index
      %c128 = arith.constant 128 : index
      %33 = vector.load %arg8[%c0_40, %c128] : memref<256x1152xbf16, #tpu.memory_space<vmem>>, vector<256x128xbf16>
      tpu.vector_store %arg8[%c0_40, %c128], %32 {strides = array<i32>} : memref<256x1152xbf16, #tpu.memory_space<vmem>>, vector<256x128xbf16>,
      %c0_41 = arith.constant 0 : index
      %c2 = arith.constant 2 : index
      %c0_42 = arith.constant 0 : index
      %34 = vector.load %arg7[%c0_41, %c2, %c0_42] : memref<18x18x128xbf16, #tpu.memory_space<vmem>>, vector<16x16x128xbf16>
      %35 = vector.shape_cast %34 : vector<16x16x128xbf16> to vector<256x128xbf16>
      %c0_43 = arith.constant 0 : index
      %c256 = arith.constant 256 : index
      %36 = vector.load %arg8[%c0_43, %c256] : memref<256x1152xbf16, #tpu.memory_space<vmem>>, vector<256x128xbf16>
      tpu.vector_store %arg8[%c0_43, %c256], %35 {strides = array<i32>} : memref<256x1152xbf16, #tpu.memory_space<vmem>>, vector<256x128xbf16>,
      %c1_44 = arith.constant 1 : index
      %c0_45 = arith.constant 0 : index
      %c0_46 = arith.constant 0 : index
      %37 = vector.load %arg7[%c1_44, %c0_45, %c0_46] : memref<18x18x128xbf16, #tpu.memory_space<vmem>>, vector<16x16x128xbf16>
      %38 = vector.shape_cast %37 : vector<16x16x128xbf16> to vector<256x128xbf16>
      %c0_47 = arith.constant 0 : index
      %c384 = arith.constant 384 : index
      %39 = vector.load %arg8[%c0_47, %c384] : memref<256x1152xbf16, #tpu.memory_space<vmem>>, vector<256x128xbf16>
      tpu.vector_store %arg8[%c0_47, %c384], %38 {strides = array<i32>} : memref<256x1152xbf16, #tpu.memory_space<vmem>>, vector<256x128xbf16>,
      %c1_48 = arith.constant 1 : index
      %c1_49 = arith.constant 1 : index
      %c0_50 = arith.constant 0 : index
      %40 = vector.load %arg7[%c1_48, %c1_49, %c0_50] : memref<18x18x128xbf16, #tpu.memory_space<vmem>>, vector<16x16x128xbf16>
      %41 = vector.shape_cast %40 : vector<16x16x128xbf16> to vector<256x128xbf16>
      %c0_51 = arith.constant 0 : index
      %c512 = arith.constant 512 : index
      %42 = vector.load %arg8[%c0_51, %c512] : memref<256x1152xbf16, #tpu.memory_space<vmem>>, vector<256x128xbf16>
      tpu.vector_store %arg8[%c0_51, %c512], %41 {strides = array<i32>} : memref<256x1152xbf16, #tpu.memory_space<vmem>>, vector<256x128xbf16>,
      %c1_52 = arith.constant 1 : index
      %c2_53 = arith.constant 2 : index
      %c0_54 = arith.constant 0 : index
      %43 = vector.load %arg7[%c1_52, %c2_53, %c0_54] : memref<18x18x128xbf16, #tpu.memory_space<vmem>>, vector<16x16x128xbf16>
      %44 = vector.shape_cast %43 : vector<16x16x128xbf16> to vector<256x128xbf16>
      %c0_55 = arith.constant 0 : index
      %c640 = arith.constant 640 : index
      %45 = vector.load %arg8[%c0_55, %c640] : memref<256x1152xbf16, #tpu.memory_space<vmem>>, vector<256x128xbf16>
      tpu.vector_store %arg8[%c0_55, %c640], %44 {strides = array<i32>} : memref<256x1152xbf16, #tpu.memory_space<vmem>>, vector<256x128xbf16>,
      %c2_56 = arith.constant 2 : index
      %c0_57 = arith.constant 0 : index
      %c0_58 = arith.constant 0 : index
      %46 = vector.load %arg7[%c2_56, %c0_57, %c0_58] : memref<18x18x128xbf16, #tpu.memory_space<vmem>>, vector<16x16x128xbf16>
      %47 = vector.shape_cast %46 : vector<16x16x128xbf16> to vector<256x128xbf16>
      %c0_59 = arith.constant 0 : index
      %c768 = arith.constant 768 : index
      %48 = vector.load %arg8[%c0_59, %c768] : memref<256x1152xbf16, #tpu.memory_space<vmem>>, vector<256x128xbf16>
      tpu.vector_store %arg8[%c0_59, %c768], %47 {strides = array<i32>} : memref<256x1152xbf16, #tpu.memory_space<vmem>>, vector<256x128xbf16>,
      %c2_60 = arith.constant 2 : index
      %c1_61 = arith.constant 1 : index
      %c0_62 = arith.constant 0 : index
      %49 = vector.load %arg7[%c2_60, %c1_61, %c0_62] : memref<18x18x128xbf16, #tpu.memory_space<vmem>>, vector<16x16x128xbf16>
      %50 = vector.shape_cast %49 : vector<16x16x128xbf16> to vector<256x128xbf16>
      %c0_63 = arith.constant 0 : index
      %c896 = arith.constant 896 : index
      %51 = vector.load %arg8[%c0_63, %c896] : memref<256x1152xbf16, #tpu.memory_space<vmem>>, vector<256x128xbf16>
      tpu.vector_store %arg8[%c0_63, %c896], %50 {strides = array<i32>} : memref<256x1152xbf16, #tpu.memory_space<vmem>>, vector<256x128xbf16>,
      %c2_64 = arith.constant 2 : index
      %c2_65 = arith.constant 2 : index
      %c0_66 = arith.constant 0 : index
      %52 = vector.load %arg7[%c2_64, %c2_65, %c0_66] : memref<18x18x128xbf16, #tpu.memory_space<vmem>>, vector<16x16x128xbf16>
      %53 = vector.shape_cast %52 : vector<16x16x128xbf16> to vector<256x128xbf16>
      %c0_67 = arith.constant 0 : index
      %c1024 = arith.constant 1024 : index
      %54 = vector.load %arg8[%c0_67, %c1024] : memref<256x1152xbf16, #tpu.memory_space<vmem>>, vector<256x128xbf16>
      tpu.vector_store %arg8[%c0_67, %c1024], %53 {strides = array<i32>} : memref<256x1152xbf16, #tpu.memory_space<vmem>>, vector<256x128xbf16>,
    } else {
    }
    %c0 = arith.constant 0 : index
    %c0_1 = arith.constant 0 : index
    %3 = vector.load %arg8[%c0, %c0_1] : memref<256x1152xbf16, #tpu.memory_space<vmem>>, vector<256x1152xbf16>
    %c0_2 = arith.constant 0 : index
    %c0_3 = arith.constant 0 : index
    %4 = vector.load %arg3[%c0_2, %c0_3] : memref<1152x128xbf16, #tpu.memory_space<vmem>>, vector<1152x128xbf16>
    %cst = arith.constant dense<0.000000e+00> : vector<256x128xf32>
    %5 = tpu.matmul %3, %4, %cst {dimension_numbers = #tpu.dot_dimension_numbers<[1], [0], [0], [1], [0, 0, 1, 1], [], []>} : vector<256x1152xbf16>, vector<1152x128xbf16>, vector<256x128xf32> -> vector<256x128xf32>
    %c0_4 = arith.constant 0 : index
    %c0_5 = arith.constant 0 : index
    %6 = vector.load %arg4[%c0_4, %c0_5] : memref<1x128xf32, #tpu.memory_space<vmem>>, vector<1x128xf32>
    %7 = vector.broadcast %6 : vector<1x128xf32> to vector<256x128xf32>
    %8 = arith.mulf %5, %7 : vector<256x128xf32>
    %c0_6 = arith.constant 0 : index
    %c0_7 = arith.constant 0 : index
    %9 = vector.load %arg5[%c0_6, %c0_7] : memref<1x128xf32, #tpu.memory_space<vmem>>, vector<1x128xf32>
    %10 = vector.broadcast %9 : vector<1x128xf32> to vector<256x128xf32>
    %11 = arith.addf %8, %10 : vector<256x128xf32>
    %cst_8 = arith.constant 0.000000e+00 : f32
    %12 = vector.broadcast %cst_8 : f32 to vector<256x128xf32>
    %13 = arith.maximumf %11, %12 : vector<256x128xf32>
    %14 = vector.shape_cast %13 : vector<256x128xf32> to vector<16x16x128xf32>
    %15 = arith.truncf %14 : vector<16x16x128xf32> to vector<16x16x128xbf16>
    %c0_9 = arith.constant 0 : index
    %c0_10 = arith.constant 0 : index
    %c0_11 = arith.constant 0 : index
    %c0_12 = arith.constant 0 : index
    %16 = vector.load %arg6[%c0_9, %c0_10, %c0_11, %c0_12] : memref<1x16x16x128xbf16, #tpu.memory_space<vmem>>, vector<1x16x16x128xbf16>
    %17 = vector.shape_cast %16 : vector<1x16x16x128xbf16> to vector<16x16x128xbf16>
    %18 = vector.shape_cast %15 : vector<16x16x128xbf16> to vector<1x16x16x128xbf16>
    tpu.vector_store %arg6[%c0_9, %c0_10, %c0_11, %c0_12], %18 {strides = array<i32>} : memref<1x16x16x128xbf16, #tpu.memory_space<vmem>>, vector<1x16x16x128xbf16>,
    return
  }
  func.func @transform_0(%arg0: i32, %arg1: i32) -> (i32, i32, i32, i32) {
    %c0_i32 = arith.constant 0 : i32
    %c0_i32_0 = arith.constant 0 : i32
    %c0_i32_1 = arith.constant 0 : i32
    %c0_i32_2 = arith.constant 0 : i32
    return %arg0, %c0_i32, %c0_i32_0, %c0_i32_1 : i32, i32, i32, i32
  }
  func.func @transform_1(%arg0: i32, %arg1: i32) -> (i32, i32) {
    %c0_i32 = arith.constant 0 : i32
    %c0_i32_0 = arith.constant 0 : i32
    return %c0_i32, %arg1 : i32, i32
  }
  func.func @transform_2(%arg0: i32, %arg1: i32) -> (i32, i32) {
    %c0_i32 = arith.constant 0 : i32
    %c0_i32_0 = arith.constant 0 : i32
    return %c0_i32, %arg1 : i32, i32
  }
  func.func @transform_3(%arg0: i32, %arg1: i32) -> (i32, i32) {
    %c0_i32 = arith.constant 0 : i32
    %c0_i32_0 = arith.constant 0 : i32
    return %c0_i32, %arg1 : i32, i32
  }
  func.func @transform_4(%arg0: i32, %arg1: i32) -> (i32, i32, i32, i32) {
    %c0_i32 = arith.constant 0 : i32
    %c0_i32_0 = arith.constant 0 : i32
    %c0_i32_1 = arith.constant 0 : i32
    return %arg0, %c0_i32, %c0_i32_0, %arg1 : i32, i32, i32, i32
  }
}

</mosaic_0001>

<bundles_post_ra>
// kernel: tpu_custom_call.1
= control target key start
LH: loop header
LB: loop body
LE: loop exit
PB: predicated region body
PF: predicated region fallthrough
CT: control target
= control target key end

     0   :  { %s8836_s0 = inlined_call_operand.hbm [shape: bf16[2,16,16,128], index: 0, kind: input, shape index: {}]   ;;  %s8837_s1 = inlined_call_operand.hbm [shape: bf16[1152,128], index: 1, kind: input, shape index: {}]   ;;  %s8838_s2 = inlined_call_operand.vmem [shape: f32[1,128], index: 2, kind: input, shape index: {}]   ;;  %s8839_s3 = inlined_call_operand.vmem [shape: f32[1,128], index: 3, kind: input, shape index: {}]   ;;  %s8840_s4 = inlined_call_operand.hbm [shape: bf16[2,16,16,128], index: 4, kind: output, shape index: {}]  }
   0x1   :  { %8844 = sst [smem:[#allocation35_spill]] %s8837_s1 }
   0x2   :  { %9 = vsyncpa [#allocation5], 0 }
   0x3   :  { %11 = vsyncpa [#allocation5 + $0x1], 0 }
   0x4   :  { %12 = vsyncpa [#allocation8], 0 }
   0x5   :  { %13 = vsyncpa [#allocation6], 0 }
   0x6   :  { %15 = vsyncpa [#allocation6 + $0x1], 0  ;;  %s7487_s15 = smov 0   ;;  %s7489_s16 = smov 0  }
   0x7   :  { %s7491_s17 = smov 0   ;;  %s7493_s18 = smov 0  }
   0x8   :  { %s7495_s19 = smov 0   ;;  %s7497_s20 = smov 0  }
   0x9 LB: > { %s5958_s21 = sadd.s32 4294967295, %s7454_s20   ;;  %s5959_s22 = sadd.s32 4294967294, %s7454_s20   ;;  %s7454_s20 = sphi %s7497_s20, %s21_s20   ;;  %s7450_s19 = sphi %s7495_s19, %s8934_s19   ;;  %s7446_s18 = sphi %s7493_s18, %s8933_s18   ;;  %s7442_s17 = sphi %s7491_s17, %s8932_s17   ;;  %s7438_s16 = sphi %s7489_s16, %s8931_s16   ;;  %s7434_s15 = sphi %s7487_s15, %s8930_s15  }
   0xa   : > { %p53_p0 = scmp.ne.s32.totalorder %s7438_s16, %s7434_s15  ;;  %p7521_p1 = scmp.eq.s32.totalorder %s5958_s21, 0 }
   0xb   : > { %p7525_p2 = scmp.eq.s32.totalorder %s5958_s21, 1  ;;  %p163_p3 = scmp.eq.s32.totalorder %s5959_s22, 1 }
   0xc   : > { %p7531_p4 = por %p7521_p1, %p53_p0  ;;  %p5960_p5 = scmp.ge.s32.totalorder %s7454_s20, 1 }
   0xd   : > { %p7536_p6 = por %p163_p3, %p53_p0  ;;  %p170_p7 = scmp.lt.s32.totalorder %s7454_s20, 3 }
   0xe   : > { %s8849_s1 = sld [smem:[#allocation35_spill]]  ;;  %s7456_s5 = smov [#allocation7]  }
   0xf   : > { %p7544_p8 = pnand %p5960_p5, %p170_p7  ;;  %s185_s6 = sshll.u32 %s7456_s5, 4  ;;  %s186_s6 = int_to_ptr.vmem [resolvable:$true] %s185_s6 }
  0x10   : > { %p5964_p11 = scmp.ge.s32.totalorder %s7454_s20, 2  ;;  %s8841_s7 = smov 64  }
  0x11   : > { %p7234_p9 = pneg %p7544_p8  ;;  %s8842_s8 = smov 4  }
  0x12   : > { %s33_s9 = sadd.s32 1, %s7450_s19  ;;  %s40_s10 = sadd.s32 1, %s7442_s17 }
  0x13   : > { %p7235_p10 = pnand %p7234_p9, %p7521_p1  ;;  %p35_p12 = scmp.ge.s32.totalorder %s33_s9, 2 }
  0x14   : > { %s183_s29 = sshll.u32 %s8849_s1, 4  ;;  %p47_p13 = scmp.ne.s32.totalorder %s7442_s17, %s7438_s16  ;;  %s184_s29 = int_to_ptr.hbm [resolvable:$true] %s183_s29 }
  0x15   : > { %7237 = dma.hbm_to_vmem [thread:$0]  (!%p7235_p10), %s184_s29, 9216, %s186_s6, [#allocation8], %s8841_s7, %s8841_s7, %s8842_s8  }
  0x16   : > { %p48_p0 = scmp.eq.s32.totalorder %s7454_s20, 0  ;;  %s8936_s9 = smov (%p35_p12, %s33_s9), 0 }
  0x17   : > { %8851 = sst [smem:[#allocation13_spill]] %s8936_s9  ;;  %p7569_p5 = por %p7525_p2, %p47_p13 }
  0x18   : > { %p7563_p3 = por %p48_p0, %p47_p13  ;;  %s37_s13 = ssub.s32 %s7450_s19, %s8936_s9 }
  0x19   : > { %p7247_p7 = scmp.lt.s32.totalorder %s7454_s20, 2  ;;  %p38_p9 = scmp.eq.s32.totalorder %s37_s13, 0 }
  0x1a   : > { %s211_s14 = sand.u32 1, %s7442_s17   ;;  %s6889_s27 = sshll.u32 %s7450_s19, 7 }
  0x1b   : > { %s5965_s21 = sshll.u32 %s211_s14, 7  ;;  %s220_s5 = scalar_lea.hbm %s8836_s0, %s6889_s27 }
  0x1c   : > { %s7578_s22 = scalar_select %p38_p9, %s7442_s17, %s40_s10  }
  0x1d   : > { %s215_s6 = scalar_lea.vmem [#allocation4], %s5965_s21  ;;  %s221_s24 = sshll.u32 %s220_s5, 4  ;;  %s222_s24 = int_to_ptr.hbm [resolvable:$true] %s221_s24 }
  0x1e   : > { %s223_s7 = sshll.u32 %s215_s6, 4  ;;  %p7239_p2 = pnand %p7247_p7, %p7563_p3  ;;  %s224_s7 = int_to_ptr.vmem [resolvable:$true] %s223_s7 }
  0x1f   : > { %s212_s8 = scalar_lea.sflag [#allocation5], %s211_s14  ;;  %s8854_s1 = smov 4  }
  0x20   : > { %s8855_s9 = smov 64   ;;  %235 = sbr.rel (%p7544_p8) target bundleno = 843 (0x34b), region = 36 }
  0x21   : > { %7241 = dma.hbm_to_vmem [thread:$0]  (!%p7239_p2), %s222_s24, 2048, %s224_s7, %s212_s8, %s8855_s9, %s8855_s9, %s8854_s1  }
  0x25   : > { %s7592_s10 = sand.u32 1, %s7438_s16  }
  0x26   : > { %s5969_s13 = sshll.u32 %s7592_s10, 7  ;;  %s238_s21 = scalar_lea.sflag [#allocation5], %s7592_s10 }
  0x27   : > { %s7598_s11 = scalar_lea.vmem [#allocation4], %s5969_s13 }
  0x28   : > { %7421 = dma.done.wait (%p7531_p4), %s238_s21, 2048  }
  0x29   : > { %7423 = vsyncadd (%p7531_p4), %s238_s21, 4294965248 }
  0x2a   : > { %7425 = dma.done.wait (%p7521_p1), [#allocation8], 9216  }
  0x2b   : > { %7427 = vsyncadd (%p7521_p1), [#allocation8], 4294958080  ;;  %v7459_v0 = vmov 0   ;;  %vm296_vm0 = vcmask 1040384   ;;  %vm297_vm1 = vsmask.f32 256 }
  0x2c   : > { %289 = vst [vmem:[#allocation2] sm:$0xf] %v7459_v0  ;;  %vm353_vm2 = vsmask.f32 7938  ;;  %v7041_v2 = vld [vmem:[#allocation7 + $0x38] sm:$0xff]  ;;  %vm7614_vm4 = vmand %vm296_vm0, %vm297_vm1  ;;  %v7040_v4 = vld [vmem:[#allocation7 + $0x30] sm:$0xff] }
  0x2d   : > { %290 = vst [vmem:[#allocation2 + $0x4] sm:$0xf] %v7459_v0  ;;  %vm7609_vm3 = vmand %vm296_vm0, %vm353_vm2  ;;  %7202 = vmatpush.bf16.msra.mxu1 %v7041_v2  ;;  %7203 = vmatpush.bf16.msra.mxu2 %v7041_v2  ;;  %v311_v5 = vld [vmem:[#allocation2 + $0x30] sm:$0x1]  ;;  %vm441_vm5 = vsmask.f32 4368 }
  0x2e   : > { %291 = vst [vmem:[#allocation2 + $0x8] sm:$0x1] %v7459_v0  ;;  %7204 = vmatpush.bf16.msra.mxu3 %v7041_v2  ;;  %4853 = vmatpush.bf16.msra.mxu0 %v7041_v2  ;;  %v312_v6 = vsel %vm7614_vm4, 0, %v311_v5  ;;  %v415_v7 = vld [vmem:[%s7598_s11 + $0x18] sm:$0xf]  ;;  %vm764_vm6 = vcmask 1043456   ;;  %vm7630_vm7 = vmor %vm297_vm1, %vm441_vm5 }
  0x2f   : > { %293 = vst [vmem:[#allocation2 + $0xcc] sm:$0xf] %v7459_v0  ;;  %v416_v8 = vld [vmem:[%s7598_s11 + $0x1c] sm:$0xf]  ;;  %v7039_v9 = vld [vmem:[#allocation7 + $0x28] sm:$0xff]  ;;  %v495_v10 = vshrl.u32 %v415_v7, 16  ;;  %vm7640_vm8 = vmand %vm764_vm6, %vm353_vm2 }
  0x30   : > { %294 = vst [vmem:[#allocation2 + $0xd0] sm:$0xf] %v7459_v0  ;;  %v498_v11 = vshll.u32 %v415_v7, 16  ;;  %v503_v12 = vshrl.u32 %v416_v8, 16  ;;  %v506_v13 = vshll.u32 %v416_v8, 16  ;;  %v7038_v36 = vld [vmem:[#allocation7 + $0x20] sm:$0xff] }
  0x31   : > { %295 = vst [vmem:[#allocation2 + $0xd4] sm:$0x1] %v7459_v0  ;;  %v323_v14 = vld [vmem:[#allocation2 + $0x60] sm:$0x1]  ;;  %v423_v15 = vld [vmem:[%s7598_s11 + $0x38] sm:$0xf]  ;;  %7205 = vmatpush.bf16.msra.mxu1 %v7040_v4  ;;  %7206 = vmatpush.bf16.msra.mxu2 %v7040_v4 }
  0x32   : > { %313 = vst [vmem:[#allocation2 + $0x30] sm:$0x1] %v312_v6  ;;  %v424_v16 = vld [vmem:[%s7598_s11 + $0x3c] sm:$0xf]  ;;  %v497_v17 = vrot.slane %v495_v10, 7  ;;  %v7624_v18 = vrot.slane %v503_v12, 7  ;;  %7207 = vmatpush.bf16.msra.mxu3 %v7040_v4  ;;  %4854 = vmatpush.bf16.msra.mxu0 %v7040_v4 }
  0x33   : > { %v324_v19 = vsel %vm7614_vm4, 0, %v323_v14  ;;  %v563_v20 = vshrl.u32 %v423_v15, 16  ;;  %v335_v21 = vld [vmem:[#allocation2 + $0x90] sm:$0x1]  ;;  %v566_v23 = vshll.u32 %v423_v15, 16  ;;  %v571_v24 = vshrl.u32 %v424_v16, 16 }
  0x34   : > { %325 = vst [vmem:[#allocation2 + $0x60] sm:$0x1] %v324_v19  ;;  %v574_v25 = vshll.u32 %v424_v16, 16  ;;  %v336_v26 = vsel %vm7614_vm4, 0, %v335_v21  ;;  %v500_v27 = vor.u32 %v498_v11, %v497_v17  ;;  %v501_v28 = vrot.slane %v497_v17, 4  ;;  %v7037_v51 = vld [vmem:[#allocation7 + $0x18] sm:$0xff] }
  0x35   : > { %v508_v29 = vor.u32 %v506_v13, %v7624_v18  ;;  %337 = vst [vmem:[#allocation2 + $0x90] sm:$0x1] %v336_v26  ;;  %v431_v30 = vld [vmem:[%s7598_s11 + $0x58] sm:$0xf]  ;;  %v565_v32 = vrot.slane %v563_v20, 7  ;;  %v7644_v33 = vrot.slane %v571_v24, 7  ;;  %7208 = vmatpush.bf16.msra.mxu1 %v7039_v9  ;;  %7209 = vmatpush.bf16.msra.mxu2 %v7039_v9 }
  0x36   : > { %v432_v34 = vld [vmem:[%s7598_s11 + $0x5c] sm:$0xf]  ;;  %v631_v35 = vshrl.u32 %v431_v30, 16  ;;  %v634_v38 = vshll.u32 %v431_v30, 16  ;;  %v299_v41 = vld [vmem:[#allocation2] sm:$0x1]  ;;  %7210 = vmatpush.bf16.msra.mxu3 %v7039_v9  ;;  %4855 = vmatpush.bf16.msra.mxu0 %v7039_v9 }
  0x37   : > { %v509_v37 = vsel %vm7630_vm7, %v501_v28, %v508_v29  ;;  %v639_v39 = vshrl.u32 %v432_v34, 16  ;;  %v642_v40 = vshll.u32 %v432_v34, 16  ;;  %v568_v43 = vor.u32 %v566_v23, %v565_v32  ;;  %v879_v58 = vld [vmem:[#allocation2 + $0x4] sm:$0xf]  ;;  %v314_v61 = vld [vmem:[#allocation2 + $0x3c] sm:$0x1] }
  0x38   : > { %790 = vst [vmem:[#allocation2 + $0x34] sm:$0xf] %v509_v37  ;;  %v569_v44 = vrot.slane %v565_v32, 4  ;;  %v576_v45 = vor.u32 %v574_v25, %v7644_v33  ;;  %v633_v47 = vrot.slane %v631_v35, 7  ;;  %v300_v49 = vsel %vm7614_vm4, 0, %v299_v41  ;;  %v7036_v2 = vld [vmem:[#allocation7 + $0x10] sm:$0xff] }
  0x39   : > { %v787_v42 = vld [vmem:[#allocation2 + $0x30] sm:$0xf]  ;;  %v7652_v48 = vrot.slane %v639_v39, 7  ;;  %7211 = vmatpush.bf16.msra.mxu1 %v7038_v36  ;;  %7212 = vmatpush.bf16.msra.mxu2 %v7038_v36  ;;  %301 = vst [vmem:[#allocation2] sm:$0x1] %v300_v49  ;;  %v7035_v8 = vld [vmem:[#allocation7 + $0x8] sm:$0xff] }
  0x3a   : > { %v788_v46 = vsel %vm7640_vm8, %v500_v27, %v787_v42  ;;  %v577_v50 = vsel %vm7630_vm7, %v569_v44, %v576_v45  ;;  %v636_v53 = vor.u32 %v634_v38, %v633_v47  ;;  %v637_v54 = vrot.slane %v633_v47, 4  ;;  %7213 = vmatpush.bf16.msra.mxu3 %v7038_v36  ;;  %4856 = vmatpush.bf16.msra.mxu0 %v7038_v36  ;;  %v7666_v62 = vld [vmem:[%s7598_s11 + $0x20] sm:$0xf]  ;;  %v418_v63 = vld [vmem:[%s7598_s11 + $0x24] sm:$0xf]  ;;  %v7057_v29 = vld [vmem:[#allocation7 + $0xb8] sm:$0xff] }
  0x3b   : > { %789 = vst [vmem:[#allocation2 + $0x30] sm:$0xf] %v788_v46  ;;  %v815_v52 = vld [vmem:[#allocation2 + $0x60] sm:$0xf]  ;;  %v644_v55 = vor.u32 %v642_v40, %v7652_v48  ;;  %v512_v0 = vshrl.u32 %v7666_v62, 16  ;;  %v520_v5 = vshrl.u32 %v418_v63, 16 }
  0x3c   : > { %818 = vst [vmem:[#allocation2 + $0x64] sm:$0xf] %v577_v50  ;;  %v816_v56 = vsel %vm7640_vm8, %v568_v43, %v815_v52  ;;  %v843_v57 = vld [vmem:[#allocation2 + $0x90] sm:$0xf]  ;;  %v523_v7 = vshll.u32 %v418_v63, 16  ;;  %v315_v12 = vsel %vm7614_vm4, 0, %v314_v61 }
  0x3d   : > { %817 = vst [vmem:[#allocation2 + $0x60] sm:$0xf] %v816_v56  ;;  %v645_v59 = vsel %vm7630_vm7, %v637_v54, %v644_v55  ;;  %v844_v60 = vsel %vm7640_vm8, %v636_v53, %v843_v57  ;;  %7214 = vmatpush.bf16.msra.mxu1 %v7037_v51  ;;  %7215 = vmatpush.bf16.msra.mxu2 %v7037_v51  ;;  %v7670_v6 = vrot.slane %v512_v0, 7  ;;  %v7672_v10 = vrot.slane %v520_v5, 7  ;;  %v326_v16 = vld [vmem:[#allocation2 + $0x6c] sm:$0x1] }
  0x3e   : > { %845 = vst [vmem:[#allocation2 + $0x90] sm:$0xf] %v844_v60  ;;  %7216 = vmatpush.bf16.msra.mxu3 %v7037_v51  ;;  %4857 = vmatpush.bf16.msra.mxu0 %v7037_v51  ;;  %v425_v19 = vld [vmem:[%s7598_s11 + $0x40] sm:$0xf]  ;;  %v426_v23 = vld [vmem:[%s7598_s11 + $0x44] sm:$0xf] }
  0x3f   : > { %v887_v4 = vld [vmem:[#allocation2 + $0x34] sm:$0xf]  ;;  %846 = vst [vmem:[#allocation2 + $0x94] sm:$0xf] %v645_v59  ;;  %v518_v13 = vrot.slane %v7670_v6, 4  ;;  %v525_v15 = vor.u32 %v523_v7, %v7672_v10  ;;  %v7034_v20 = vld [vmem:[#allocation7] sm:$0xff] }
  0x40   : > { %919 = vst [vmem:[#allocation3 + $0x144] sm:$0xf] %v887_v4  ;;  %v878_v14 = vld [vmem:[#allocation2] sm:$0xf]  ;;  %v327_v26 = vsel %vm7614_vm4, 0, %v326_v16  ;;  %v580_v27 = vshrl.u32 %v425_v19, 16 }
  0x41   : > { %911 = vst [vmem:[#allocation3 + $0x24] sm:$0xf] %v879_v58  ;;  %7217 = vmatpush.bf16.msra.mxu1 %v7036_v2  ;;  %7218 = vmatpush.bf16.msra.mxu2 %v7036_v2  ;;  %v526_v25 = vsel %vm7630_vm7, %v518_v13, %v525_v15  ;;  %v7065_v30 = vld [vmem:[#allocation7 + $0xf8] sm:$0xff]  ;;  %v588_v32 = vshrl.u32 %v426_v23, 16  ;;  %v591_v34 = vshll.u32 %v426_v23, 16  ;;  %v515_v36 = vshll.u32 %v7666_v62, 16 }
  0x42   : > { %v886_v9 = vld [vmem:[#allocation2 + $0x30] sm:$0xf]  ;;  %7219 = vmatpush.bf16.msra.mxu3 %v7036_v2  ;;  %4858 = vmatpush.bf16.msra.mxu0 %v7036_v2  ;;  %910 = vst [vmem:[#allocation3] sm:$0xf] %v878_v14  ;;  %v582_v37 = vrot.slane %v580_v27, 7  ;;  %v583_v44 = vshll.u32 %v425_v19, 16 }
  0x43   : > { %918 = vst [vmem:[#allocation3 + $0x120] sm:$0xf] %v886_v9  ;;  %v895_v11 = vld [vmem:[#allocation2 + $0x64] sm:$0xf]  ;;  %v7073_v39 = vld [vmem:[#allocation7 + $0x138] sm:$0xff]  ;;  %v7685_v40 = vrot.slane %v588_v32, 7  ;;  %v517_v54 = vor.u32 %v515_v36, %v7670_v6 }
  0x44   : > { %927 = vst [vmem:[#allocation3 + $0x264] sm:$0xf] %v895_v11  ;;  %v894_v17 = vld [vmem:[#allocation2 + $0x60] sm:$0xf]  ;;  %v7049_v43 = vld [vmem:[#allocation7 + $0x78] sm:$0xff]  ;;  %v586_v45 = vrot.slane %v582_v37, 4  ;;  %v585_v63 = vor.u32 %v583_v44, %v582_v37 }
  0x45   : > { %926 = vst [vmem:[#allocation3 + $0x240] sm:$0xf] %v894_v17  ;;  %v902_v21 = vld [vmem:[#allocation2 + $0x90] sm:$0xf]  ;;  %7220 = vmatpush.bf16.msra.mxu1 %v7035_v8  ;;  %7221 = vmatpush.bf16.msra.mxu2 %v7035_v8  ;;  %v7056_v47 = vld [vmem:[#allocation7 + $0xb0] sm:$0xff]  ;;  %v593_v49 = vor.u32 %v591_v34, %v7685_v40  ;;  %v7071_v44 = vld [vmem:[#allocation7 + $0x128] sm:$0xff] }
  0x46   : > { %v903_v24 = vld [vmem:[#allocation2 + $0x94] sm:$0xf]  ;;  %934 = vst [vmem:[#allocation3 + $0x360] sm:$0xf] %v902_v21  ;;  %7222 = vmatpush.bf16.msra.mxu3 %v7035_v8  ;;  %4859 = vmatpush.bf16.msra.mxu0 %v7035_v8  ;;  %v338_v50 = vld [vmem:[#allocation2 + $0x9c] sm:$0x1] }
  0x47   : > { %v6930_v28 = vld [vmem:[#allocation3 + $0x140] sm:$0xf0]  ;;  %935 = vst [vmem:[#allocation3 + $0x384] sm:$0xf] %v903_v24  ;;  %v7064_v53 = vld [vmem:[#allocation7 + $0xf0] sm:$0xff]  ;;  %v339_v55 = vsel %vm7614_vm4, 0, %v338_v50  ;;  %v594_v59 = vsel %vm7630_vm7, %v586_v45, %v593_v49 }
  0x48   : > { %v6894_v35 = vld [vmem:[#allocation3 + $0x20] sm:$0xf0]  ;;  %316 = vst [vmem:[#allocation2 + $0x3c] sm:$0x1] %v315_v12  ;;  %v433_v56 = vld [vmem:[%s7598_s11 + $0x60] sm:$0xf] }
  0x49   : > { %797 = vst [vmem:[#allocation2 + $0x40] sm:$0xf] %v526_v25  ;;  %7223 = vmatpush.bf16.msra.mxu1 %v7034_v20  ;;  %7224 = vmatpush.bf16.msra.mxu2 %v7034_v20  ;;  %v6022_v46 = vld [vmem:[#allocation3] sm:$0xf]  ;;  %v434_v60 = vld [vmem:[%s7598_s11 + $0x64] sm:$0xf] }
  0x4a   : > { %v6166_v38 = vld [vmem:[#allocation3 + $0x120] sm:$0xf]  ;;  %328 = vst [vmem:[#allocation2 + $0x6c] sm:$0x1] %v327_v26  ;;  %7225 = vmatpush.bf16.msra.mxu3 %v7034_v20  ;;  %4860 = vmatpush.bf16.msra.mxu0 %v7034_v20  ;;  %v6023_v52 = vor.u32 %v6894_v35, %v6022_v46  ;;  %v7048_v62 = vld [vmem:[#allocation7 + $0x70] sm:$0xff]  ;;  %v648_v0 = vshrl.u32 %v433_v56, 16 }
  0x4b   : > { %v6167_v41 = vor.u32 %v6930_v28, %v6166_v38  ;;  %v6966_v42 = vld [vmem:[#allocation3 + $0x260] sm:$0xf0]  ;;  %340 = vst [vmem:[#allocation2 + $0x9c] sm:$0x1] %v339_v55  ;;  %v651_v2 = vshll.u32 %v433_v56, 16  ;;  %v656_v6 = vshrl.u32 %v434_v60, 16 }
  0x4c   : > { %v6310_v51 = vld [vmem:[#allocation3 + $0x240] sm:$0xf]  ;;  %825 = vst [vmem:[#allocation2 + $0x70] sm:$0xf] %v594_v59  ;;  %v659_v7 = vshll.u32 %v434_v60, 16  ;;  %v7055_v8 = vld [vmem:[#allocation7 + $0xa8] sm:$0xff] }
  0x4d   : > { %v6311_v57 = vor.u32 %v6966_v42, %v6310_v51  ;;  %v6454_v58 = vld [vmem:[#allocation3 + $0x360] sm:$0xf]  ;;  %5031 = vmatpush.bf16.msrb.mxu2 %v7057_v29  ;;  %4881 = vmatmul.bf16.vlgmr.msra.gmra.mxu1 %v6167_v41  ;;  %v302_v9 = vld [vmem:[#allocation2 + $0xc] sm:$0x1]  ;;  %v650_v13 = vrot.slane %v648_v0, 7  ;;  %v7700_v17 = vrot.slane %v656_v6, 7 }
  0x4e   : > { %5120 = vmatpush.bf16.msrb.mxu3 %v7065_v30  ;;  %v7002_v61 = vld [vmem:[#allocation3 + $0x380] sm:$0xf0]  ;;  %5209 = vmatpush.bf16.msrb.mxu0 %v7073_v39  ;;  %v303_v14 = vsel %vm7614_vm4, 0, %v302_v9  ;;  %v409_v15 = vld [vmem:[%s7598_s11] sm:$0xf]  ;;  %v7063_v29 = vld [vmem:[#allocation7 + $0xe8] sm:$0xff] }
  0x4f   : > { %4901 = vmatmul.bf16.vlgmr.msra.gmra.mxu2 %v6311_v57  ;;  %v6455_v4 = vor.u32 %v7002_v61, %v6454_v58  ;;  %4861 = vmatmul.bf16.vlgmr.msra.gmra.mxu0 %v6023_v52  ;;  %v794_v5 = vld [vmem:[#allocation2 + $0x3c] sm:$0xf]  ;;  %v444_v19 = vshrl.u32 %v409_v15, 16  ;;  %v653_v21 = vor.u32 %v651_v2, %v650_v13  ;;  %v654_v23 = vrot.slane %v650_v13, 4  ;;  %304 = vst [vmem:[#allocation2 + $0xc] sm:$0x1] %v303_v14 }
  0x50   : > { %4942 = vmatpush.bf16.msrb.mxu1 %v7049_v43  ;;  %v795_v11 = vsel %vm7640_vm8, %v517_v54, %v794_v5  ;;  %v889_v12 = vld [vmem:[#allocation2 + $0x40] sm:$0xf]  ;;  %v410_v24 = vld [vmem:[%s7598_s11 + $0x4] sm:$0xf]  ;;  %v661_v25 = vor.u32 %v659_v7, %v7700_v17  ;;  %v447_v27 = vshll.u32 %v409_v15, 16  ;;  %v7072_v34 = vld [vmem:[#allocation7 + $0x130] sm:$0xff] }
  0x51   : > { %4921 = vmatmul.bf16.vlgmr.msra.gmra.mxu3 %v6455_v4  ;;  %5032 = vmatpush.bf16.msrb.mxu2 %v7056_v47  ;;  %796 = vst [vmem:[#allocation2 + $0x3c] sm:$0xf] %v795_v11  ;;  %v822_v16 = vld [vmem:[#allocation2 + $0x6c] sm:$0xf]  ;;  %v446_v26 = vrot.slane %v444_v19, 7  ;;  %v452_v28 = vshrl.u32 %v410_v24, 16 }
  0x52   : > { %5121 = vmatpush.bf16.msrb.mxu3 %v7064_v53  ;;  %921 = vst [vmem:[#allocation3 + $0x18c] sm:$0xf] %v889_v12  ;;  %v823_v20 = vsel %vm7640_vm8, %v585_v63, %v822_v16  ;;  %v850_v30 = vld [vmem:[#allocation2 + $0x9c] sm:$0xf]  ;;  %v455_v32 = vshll.u32 %v410_v24, 16  ;;  %v662_v36 = vsel %vm7630_vm7, %v654_v23, %v661_v25  ;;  %v7047_v38 = vld [vmem:[#allocation7 + $0x68] sm:$0xff]  ;;  %5210 = vmatpush.bf16.msrb.mxu0 %v7072_v34 }
  0x53   : > { %824 = vst [vmem:[#allocation2 + $0x6c] sm:$0xf] %v823_v20  ;;  %v897_v35 = vld [vmem:[#allocation2 + $0x70] sm:$0xf]  ;;  %v851_v37 = vsel %vm7640_vm8, %v653_v21, %v850_v30  ;;  %v7054_v39 = vld [vmem:[#allocation7 + $0xa0] sm:$0xff]  ;;  %v450_v41 = vrot.slane %v446_v26, 4  ;;  %v449_v49 = vor.u32 %v447_v27, %v446_v26 }
  0x54   : > { %4943 = vmatpush.bf16.msrb.mxu1 %v7048_v62  ;;  %929 = vst [vmem:[#allocation3 + $0x2ac] sm:$0xf] %v897_v35  ;;  %v7710_v42 = vrot.slane %v452_v28, 7  ;;  %v7062_v43 = vld [vmem:[#allocation7 + $0xe0] sm:$0xff]  ;;  %v317_v45 = vld [vmem:[#allocation2 + $0x48] sm:$0x1] }
  0x55   : > { %5033 = vmatpush.bf16.msrb.mxu2 %v7055_v8  ;;  %852 = vst [vmem:[#allocation2 + $0x9c] sm:$0xf] %v851_v37  ;;  %v419_v46 = vld [vmem:[%s7598_s11 + $0x28] sm:$0xf]  ;;  %v7046_v51 = vld [vmem:[#allocation7 + $0x60] sm:$0xff]  ;;  %v318_v52 = vsel %vm7614_vm4, 0, %v317_v45 }
  0x56   : > { %5122 = vmatpush.bf16.msrb.mxu3 %v7063_v29  ;;  %853 = vst [vmem:[#allocation2 + $0xa0] sm:$0xf] %v662_v36  ;;  %v457_v50 = vor.u32 %v455_v32, %v7710_v42  ;;  %v420_v53 = vld [vmem:[%s7598_s11 + $0x2c] sm:$0xf]  ;;  %5211 = vmatpush.bf16.msrb.mxu0 %v7071_v44  ;;  %v529_v56 = vshrl.u32 %v419_v46, 16  ;;  %v532_v57 = vshll.u32 %v419_v46, 16 }
  0x57   : > { %319 = vst [vmem:[#allocation2 + $0x48] sm:$0x1] %v318_v52  ;;  %v766_v58 = vld [vmem:[#allocation2 + $0xc] sm:$0xf]  ;;  %v537_v59 = vshrl.u32 %v420_v53, 16  ;;  %v540_v60 = vshll.u32 %v420_v53, 16 }
  0x58   : > { %v888_v47 = vld [vmem:[#allocation2 + $0x3c] sm:$0xf]  ;;  %4944 = vmatpush.bf16.msrb.mxu1 %v7047_v38  ;;  %v458_v55 = vsel %vm7630_vm7, %v450_v41, %v457_v50  ;;  %v767_v61 = vsel %vm7640_vm8, %v449_v49, %v766_v58  ;;  %v531_v62 = vrot.slane %v529_v56, 7  ;;  %v329_v63 = vld [vmem:[#allocation2 + $0x78] sm:$0x1]  ;;  %v7053_v46 = vld [vmem:[#allocation7 + $0x98] sm:$0xff] }
  0x59   : > { %920 = vst [vmem:[#allocation3 + $0x168] sm:$0xf] %v888_v47  ;;  %5034 = vmatpush.bf16.msrb.mxu2 %v7054_v39  ;;  %v6939_v0 = vld [vmem:[#allocation3 + $0x188] sm:$0xf0]  ;;  %v7721_v2 = vrot.slane %v537_v59, 7  ;;  %v330_v4 = vsel %vm7614_vm4, 0, %v329_v63 }
  0x5a   : > { %v896_v54 = vld [vmem:[#allocation2 + $0x6c] sm:$0xf]  ;;  %5123 = vmatpush.bf16.msrb.mxu3 %v7062_v43  ;;  %769 = vst [vmem:[#allocation2 + $0x10] sm:$0xf] %v458_v55  ;;  %v534_v6 = vor.u32 %v532_v57, %v531_v62  ;;  %v535_v7 = vrot.slane %v531_v62, 4  ;;  %v7061_v58 = vld [vmem:[#allocation7 + $0xd8] sm:$0xff] }
  0x5b   : > { %928 = vst [vmem:[#allocation3 + $0x288] sm:$0xf] %v896_v54  ;;  %v6975_v8 = vld [vmem:[#allocation3 + $0x2a8] sm:$0xf0]  ;;  %v542_v11 = vor.u32 %v540_v60, %v7721_v2  ;;  %v427_v13 = vld [vmem:[%s7598_s11 + $0x48] sm:$0xf] }
  0x5c   : > { %4945 = vmatpush.bf16.msrb.mxu1 %v7046_v51  ;;  %768 = vst [vmem:[#allocation2 + $0xc] sm:$0xf] %v767_v61  ;;  %v904_v5 = vld [vmem:[#allocation2 + $0x9c] sm:$0xf]  ;;  %v428_v19 = vld [vmem:[%s7598_s11 + $0x4c] sm:$0xf] }
  0x5d   : > { %331 = vst [vmem:[#allocation2 + $0x78] sm:$0x1] %v330_v4  ;;  %v905_v9 = vld [vmem:[#allocation2 + $0xa0] sm:$0xf]  ;;  %v543_v15 = vsel %vm7630_vm7, %v535_v7, %v542_v11  ;;  %v597_v20 = vshrl.u32 %v427_v13, 16  ;;  %v600_v21 = vshll.u32 %v427_v13, 16  ;;  %5035 = vmatpush.bf16.msrb.mxu2 %v7053_v46 }
  0x5e   : > { %936 = vst [vmem:[#allocation3 + $0x3a8] sm:$0xf] %v904_v5  ;;  %v801_v16 = vld [vmem:[#allocation2 + $0x48] sm:$0xf]  ;;  %v605_v25 = vshrl.u32 %v428_v19, 16  ;;  %v608_v26 = vshll.u32 %v428_v19, 16  ;;  %5124 = vmatpush.bf16.msrb.mxu3 %v7061_v58 }
  0x5f   : > { %937 = vst [vmem:[#allocation3 + $0x3cc] sm:$0xf] %v905_v9  ;;  %v802_v24 = vsel %vm7640_vm8, %v534_v6, %v801_v16  ;;  %v599_v29 = vrot.slane %v597_v20, 7  ;;  %v341_v39 = vld [vmem:[#allocation2 + $0xa8] sm:$0x1]  ;;  %v7070_v61 = vld [vmem:[#allocation7 + $0x120] sm:$0xff] }
  0x60   : > { %v6202_v12 = vld [vmem:[#allocation3 + $0x168] sm:$0xf]  ;;  %804 = vst [vmem:[#allocation2 + $0x4c] sm:$0xf] %v543_v15  ;;  %v7732_v32 = vrot.slane %v605_v25, 7  ;;  %v342_v44 = vsel %vm7614_vm4, 0, %v341_v39  ;;  %5212 = vmatpush.bf16.msrb.mxu0 %v7070_v61 }
  0x61   : > { %v6203_v14 = vor.u32 %v6939_v0, %v6202_v12  ;;  %v881_v28 = vld [vmem:[#allocation2 + $0x10] sm:$0xf]  ;;  %803 = vst [vmem:[#allocation2 + $0x48] sm:$0xf] %v802_v24  ;;  %v602_v34 = vor.u32 %v600_v21, %v599_v29  ;;  %v603_v35 = vrot.slane %v599_v29, 4  ;;  %vm1537_vm9 = vcmask 1042432  }
  0x62   : > { %v6346_v23 = vld [vmem:[#allocation3 + $0x288] sm:$0xf]  ;;  %913 = vst [vmem:[#allocation3 + $0x6c] sm:$0xf] %v881_v28  ;;  %v610_v38 = vor.u32 %v608_v26, %v7732_v32  ;;  %v436_v50 = vld [vmem:[%s7598_s11 + $0x6c] sm:$0xf] }
  0x63   : > { %4886 = vmatmul.bf16.gmra.mxu1 %v6203_v14  ;;  %v6347_v27 = vor.u32 %v6975_v8, %v6346_v23  ;;  %v880_v30 = vld [vmem:[#allocation2 + $0xc] sm:$0xf]  ;;  %v435_v45 = vld [vmem:[%s7598_s11 + $0x68] sm:$0xf]  ;;  %v673_v54 = vshrl.u32 %v436_v50, 16  ;;  %v676_v55 = vshll.u32 %v436_v50, 16 }
  0x64   : > { %912 = vst [vmem:[#allocation3 + $0x48] sm:$0xf] %v880_v30  ;;  %v829_v36 = vld [vmem:[#allocation2 + $0x78] sm:$0xf]  ;;  %v611_v49 = vsel %vm7630_vm7, %v603_v35, %v610_v38  ;;  %v665_v51 = vshrl.u32 %v435_v45, 16  ;;  %v668_v52 = vshll.u32 %v435_v45, 16 }
  0x65   : > { %4906 = vmatmul.bf16.gmra.mxu2 %v6347_v27  ;;  %v6490_v37 = vld [vmem:[#allocation3 + $0x3a8] sm:$0xf]  ;;  %v830_v43 = vsel %vm7640_vm8, %v602_v34, %v829_v36  ;;  %832 = vst [vmem:[#allocation2 + $0x7c] sm:$0xf] %v611_v49  ;;  %v7743_v60 = vrot.slane %v673_v54, 7  ;;  %v7045_v0 = vld [vmem:[#allocation7 + $0x58] sm:$0xff] }
  0x66   : > { %v7011_v41 = vld [vmem:[#allocation3 + $0x3c8] sm:$0xf0]  ;;  %831 = vst [vmem:[#allocation2 + $0x78] sm:$0xf] %v830_v43  ;;  %v667_v57 = vrot.slane %v665_v51, 7  ;;  %v7052_v8 = vld [vmem:[#allocation7 + $0x90] sm:$0xff]  ;;  %4946 = vmatpush.bf16.msrb.mxu1 %v7045_v0 }
  0x67   : > { %v6491_v47 = vor.u32 %v7011_v41, %v6490_v37  ;;  %v891_v53 = vld [vmem:[#allocation2 + $0x4c] sm:$0xf]  ;;  %343 = vst [vmem:[#allocation2 + $0xa8] sm:$0x1] %v342_v44  ;;  %v678_v5 = vor.u32 %v676_v55, %v7743_v60  ;;  %v305_v6 = vld [vmem:[#allocation2 + $0x18] sm:$0x1]  ;;  %5036 = vmatpush.bf16.msrb.mxu2 %v7052_v8 }
  0x68   : > { %v890_v56 = vld [vmem:[#allocation2 + $0x48] sm:$0xf]  ;;  %923 = vst [vmem:[#allocation3 + $0x1d4] sm:$0xf] %v891_v53  ;;  %v671_v63 = vrot.slane %v667_v57, 4  ;;  %v306_v9 = vsel %vm7614_vm4, 0, %v305_v6  ;;  %v670_v23 = vor.u32 %v668_v52, %v667_v57 }
  0x69   : > { %4926 = vmatmul.bf16.gmra.mxu3 %v6491_v47  ;;  %v6903_v59 = vld [vmem:[#allocation3 + $0x68] sm:$0xf0]  ;;  %922 = vst [vmem:[#allocation3 + $0x1b0] sm:$0xf] %v890_v56  ;;  %v411_v7 = vld [vmem:[%s7598_s11 + $0x8] sm:$0xf] }
  0x6a   : > { %v412_v11 = vld [vmem:[%s7598_s11 + $0xc] sm:$0xf]  ;;  %v461_v12 = vshrl.u32 %v411_v7, 16  ;;  %v464_v13 = vshll.u32 %v411_v7, 16  ;;  %v7060_v14 = vld [vmem:[#allocation7 + $0xd0] sm:$0xff]  ;;  %v679_v16 = vsel %vm7630_vm7, %v671_v63, %v678_v5  ;;  %v7069_v25 = vld [vmem:[#allocation7 + $0x118] sm:$0xff] }
  0x6b   : > { %v6058_v62 = vld [vmem:[#allocation3 + $0x48] sm:$0xf]  ;;  %307 = vst [vmem:[#allocation2 + $0x18] sm:$0x1] %v306_v9  ;;  %v469_v19 = vshrl.u32 %v412_v11, 16  ;;  %v472_v20 = vshll.u32 %v412_v11, 16  ;;  %5125 = vmatpush.bf16.msrb.mxu3 %v7060_v14  ;;  %5213 = vmatpush.bf16.msrb.mxu0 %v7069_v25 }
  0x6c   : > { %v6059_v4 = vor.u32 %v6903_v59, %v6058_v62  ;;  %v899_v21 = vld [vmem:[#allocation2 + $0x7c] sm:$0xf]  ;;  %v463_v24 = vrot.slane %v461_v12, 7  ;;  %v7044_v28 = vld [vmem:[#allocation7 + $0x50] sm:$0xff]  ;;  %860 = vst [vmem:[#allocation2 + $0xac] sm:$0xf] %v679_v16 }
  0x6d   : > { %v898_v15 = vld [vmem:[#allocation2 + $0x78] sm:$0xf]  ;;  %931 = vst [vmem:[#allocation3 + $0x2f4] sm:$0xf] %v899_v21  ;;  %v7752_v27 = vrot.slane %v469_v19, 7  ;;  %4947 = vmatpush.bf16.msrb.mxu1 %v7044_v28  ;;  %v7051_v28 = vld [vmem:[#allocation7 + $0x88] sm:$0xff] }
  0x6e   : > { %4866 = vmatmul.bf16.gmra.mxu0 %v6059_v4  ;;  %930 = vst [vmem:[#allocation3 + $0x2d0] sm:$0xf] %v898_v15  ;;  %v467_v30 = vrot.slane %v463_v24, 4  ;;  %v857_v35 = vld [vmem:[#allocation2 + $0xa8] sm:$0xf]  ;;  %v466_v36 = vor.u32 %v464_v13, %v463_v24  ;;  %5037 = vmatpush.bf16.msrb.mxu2 %v7051_v28  ;;  %vm1538_vm10 = vcmask 1046532  }
  0x6f   : > { %v6948_v26 = vld [vmem:[#allocation3 + $0x1d0] sm:$0xf0]  ;;  %v474_v37 = vor.u32 %v472_v20, %v7752_v27  ;;  %v320_v38 = vld [vmem:[#allocation2 + $0x54] sm:$0x1]  ;;  %v858_v39 = vsel %vm7640_vm8, %v670_v23, %v857_v35  ;;  %v421_v43 = vld [vmem:[%s7598_s11 + $0x30] sm:$0xf] }
  0x70   : > { %v6238_v29 = vld [vmem:[#allocation3 + $0x1b0] sm:$0xf]  ;;  %v321_v41 = vsel %vm7614_vm4, 0, %v320_v38  ;;  %v422_v44 = vld [vmem:[%s7598_s11 + $0x34] sm:$0xf]  ;;  %v546_v46 = vshrl.u32 %v421_v43, 16  ;;  %vm7809_vm13 = vmor %vm1537_vm9, %vm1538_vm10 }
  0x71   : > { %v6239_v34 = vor.u32 %v6948_v26, %v6238_v29  ;;  %859 = vst [vmem:[#allocation2 + $0xa8] sm:$0xf] %v858_v39  ;;  %v475_v45 = vsel %vm7630_vm7, %v467_v30, %v474_v37  ;;  %v554_v47 = vshrl.u32 %v422_v44, 16  ;;  %v549_v50 = vshll.u32 %v421_v43, 16  ;;  %v332_v57 = vld [vmem:[#allocation2 + $0x84] sm:$0x1] }
  0x72   : > { %v773_v49 = vld [vmem:[#allocation2 + $0x18] sm:$0xf]  ;;  %776 = vst [vmem:[#allocation2 + $0x1c] sm:$0xf] %v475_v45  ;;  %v557_v51 = vshll.u32 %v422_v44, 16  ;;  %v548_v54 = vrot.slane %v546_v46, 7 }
  0x73   : > { %4891 = vmatmul.bf16.gmra.mxu1 %v6239_v34  ;;  %v774_v53 = vsel %vm7640_vm8, %v466_v36, %v773_v49  ;;  %322 = vst [vmem:[#allocation2 + $0x54] sm:$0x1] %v321_v41  ;;  %v7765_v55 = vrot.slane %v554_v47, 7  ;;  %v907_v59 = vld [vmem:[#allocation2 + $0xac] sm:$0xf]  ;;  %v333_v4 = vsel %vm7614_vm4, 0, %v332_v57 }
  0x74   : > { %v6984_v56 = vld [vmem:[#allocation3 + $0x2f0] sm:$0xf0]  ;;  %775 = vst [vmem:[#allocation2 + $0x18] sm:$0xf] %v774_v53  ;;  %v552_v61 = vrot.slane %v548_v54, 4  ;;  %v551_v0 = vor.u32 %v549_v50, %v548_v54  ;;  %v7059_v46 = vld [vmem:[#allocation7 + $0xc8] sm:$0xff] }
  0x75   : > { %v6382_v52 = vld [vmem:[#allocation3 + $0x2d0] sm:$0xf]  ;;  %v559_v62 = vor.u32 %v557_v51, %v7765_v55  ;;  %939 = vst [vmem:[#allocation3 + $0x414] sm:$0xf] %v907_v59  ;;  %v430_v5 = vld [vmem:[%s7598_s11 + $0x54] sm:$0xf]  ;;  %5126 = vmatpush.bf16.msrb.mxu3 %v7059_v46 }
  0x76   : > { %v6383_v58 = vor.u32 %v6984_v56, %v6382_v52  ;;  %v429_v63 = vld [vmem:[%s7598_s11 + $0x50] sm:$0xf]  ;;  %334 = vst [vmem:[#allocation2 + $0x84] sm:$0x1] %v333_v4  ;;  %v622_v9 = vshrl.u32 %v430_v5, 16  ;;  %v625_v12 = vshll.u32 %v430_v5, 16 }
  0x77   : > { %v560_v6 = vsel %vm7630_vm7, %v552_v61, %v559_v62  ;;  %v614_v7 = vshrl.u32 %v429_v63, 16  ;;  %v617_v8 = vshll.u32 %v429_v63, 16  ;;  %v344_v19 = vld [vmem:[#allocation2 + $0xb4] sm:$0x1]  ;;  %v437_v26 = vld [vmem:[%s7598_s11 + $0x70] sm:$0xf] }
  0x78   : > { %4911 = vmatmul.bf16.gmra.mxu2 %v6383_v58  ;;  %v906_v11 = vld [vmem:[#allocation2 + $0xa8] sm:$0xf]  ;;  %811 = vst [vmem:[#allocation2 + $0x58] sm:$0xf] %v560_v6  ;;  %v7774_v15 = vrot.slane %v622_v9, 7  ;;  %v345_v29 = vsel %vm7614_vm4, 0, %v344_v19 }
  0x79   : > { %938 = vst [vmem:[#allocation3 + $0x3f0] sm:$0xf] %v906_v11  ;;  %v883_v13 = vld [vmem:[#allocation2 + $0x1c] sm:$0xf]  ;;  %v616_v14 = vrot.slane %v614_v7, 7  ;;  %v682_v36 = vshrl.u32 %v437_v26, 16 }
  0x7a   : > { %915 = vst [vmem:[#allocation3 + $0xb4] sm:$0xf] %v883_v13  ;;  %v808_v16 = vld [vmem:[#allocation2 + $0x54] sm:$0xf]  ;;  %v627_v25 = vor.u32 %v625_v12, %v7774_v15  ;;  %v438_v30 = vld [vmem:[%s7598_s11 + $0x74] sm:$0xf] }
  0x7b   : > { %v882_v20 = vld [vmem:[#allocation2 + $0x18] sm:$0xf]  ;;  %v809_v21 = vsel %vm7640_vm8, %v551_v0, %v808_v16  ;;  %v619_v23 = vor.u32 %v617_v8, %v616_v14  ;;  %v620_v24 = vrot.slane %v616_v14, 4  ;;  %v685_v37 = vshll.u32 %v437_v26, 16  ;;  %346 = vst [vmem:[#allocation2 + $0xb4] sm:$0x1] %v345_v29 }
  0x7c   : > { %914 = vst [vmem:[#allocation3 + $0x90] sm:$0xf] %v882_v20  ;;  %v7020_v34 = vld [vmem:[#allocation3 + $0x410] sm:$0xf0]  ;;  %v690_v39 = vshrl.u32 %v438_v30, 16  ;;  %v693_v41 = vshll.u32 %v438_v30, 16 }
  0x7d   : > { %810 = vst [vmem:[#allocation2 + $0x54] sm:$0xf] %v809_v21  ;;  %v628_v35 = vsel %vm7630_vm7, %v620_v24, %v627_v25  ;;  %v836_v38 = vld [vmem:[#allocation2 + $0x84] sm:$0xf]  ;;  %v684_v45 = vrot.slane %v682_v36, 7  ;;  %v7068_v50 = vld [vmem:[#allocation7 + $0x110] sm:$0xff] }
  0x7e   : > { %839 = vst [vmem:[#allocation2 + $0x88] sm:$0xf] %v628_v35  ;;  %v837_v44 = vsel %vm7640_vm8, %v619_v23, %v836_v38  ;;  %v7787_v49 = vrot.slane %v690_v39, 7  ;;  %v7043_v54 = vld [vmem:[#allocation7 + $0x48] sm:$0xff]  ;;  %v413_v58 = vld [vmem:[%s7598_s11 + $0x10] sm:$0xf]  ;;  %5214 = vmatpush.bf16.msrb.mxu0 %v7068_v50 }
  0x7f   : > { %v893_v43 = vld [vmem:[#allocation2 + $0x58] sm:$0xf]  ;;  %838 = vst [vmem:[#allocation2 + $0x84] sm:$0xf] %v837_v44  ;;  %v688_v53 = vrot.slane %v684_v45, 4  ;;  %v687_v62 = vor.u32 %v685_v37, %v684_v45  ;;  %v478_v4 = vshrl.u32 %v413_v58, 16  ;;  %4948 = vmatpush.bf16.msrb.mxu1 %v7043_v54 }
  0x80   : > { %v6526_v47 = vld [vmem:[#allocation3 + $0x3f0] sm:$0xf]  ;;  %925 = vst [vmem:[#allocation3 + $0x21c] sm:$0xf] %v893_v43  ;;  %v695_v56 = vor.u32 %v693_v41, %v7787_v49  ;;  %v308_v57 = vld [vmem:[#allocation2 + $0x24] sm:$0x1] }
  0x81   : > { %v6527_v51 = vor.u32 %v7020_v34, %v6526_v47  ;;  %v6912_v52 = vld [vmem:[#allocation3 + $0xb0] sm:$0xf0]  ;;  %v7050_v59 = vld [vmem:[#allocation7 + $0x80] sm:$0xff]  ;;  %v309_v63 = vsel %vm7614_vm4, 0, %v308_v57  ;;  %v481_v8 = vshll.u32 %v413_v58, 16  ;;  %v480_v12 = vrot.slane %v478_v4, 7 }
  0x82   : > { %v414_v0 = vld [vmem:[%s7598_s11 + $0x14] sm:$0xf]  ;;  %v696_v7 = vsel %vm7630_vm7, %v688_v53, %v695_v56  ;;  %310 = vst [vmem:[#allocation2 + $0x24] sm:$0x1] %v309_v63  ;;  %5038 = vmatpush.bf16.msrb.mxu2 %v7050_v59  ;;  %v864_v14 = vld [vmem:[#allocation2 + $0xb4] sm:$0xf] }
  0x83   : > { %4931 = vmatmul.bf16.gmra.mxu3 %v6527_v51  ;;  %v6094_v61 = vld [vmem:[#allocation3 + $0x90] sm:$0xf]  ;;  %v486_v9 = vshrl.u32 %v414_v0, 16  ;;  %v489_v13 = vshll.u32 %v414_v0, 16  ;;  %v7058_v19 = vld [vmem:[#allocation7 + $0xc0] sm:$0xff]  ;;  %v865_v20 = vsel %vm7640_vm8, %v687_v62, %v864_v14  ;;  %v484_v21 = vrot.slane %v480_v12, 4 }
  0x84   : > { %v6095_v5 = vor.u32 %v6912_v52, %v6094_v61  ;;  %v892_v6 = vld [vmem:[#allocation2 + $0x54] sm:$0xf]  ;;  %867 = vst [vmem:[#allocation2 + $0xb8] sm:$0xf] %v696_v7  ;;  %v7067_v23 = vld [vmem:[#allocation7 + $0x108] sm:$0xff]  ;;  %v483_v26 = vor.u32 %v481_v8, %v480_v12  ;;  %5127 = vmatpush.bf16.msrb.mxu3 %v7058_v19  ;;  %v7042_v29 = vld [vmem:[#allocation7 + $0x40] sm:$0xff] }
  0x85   : > { %924 = vst [vmem:[#allocation3 + $0x1f8] sm:$0xf] %v892_v6  ;;  %v901_v11 = vld [vmem:[#allocation2 + $0x88] sm:$0xf]  ;;  %v7796_v16 = vrot.slane %v486_v9, 7  ;;  %5215 = vmatpush.bf16.msrb.mxu0 %v7067_v23  ;;  %v7066_v30 = vld [vmem:[#allocation7 + $0x100] sm:$0xff]  ;;  %4949 = vmatpush.bf16.msrb.mxu1 %v7042_v29 }
  0x86   : > { %4871 = vmatmul.bf16.gmra.mxu0 %v6095_v5  ;;  %933 = vst [vmem:[#allocation3 + $0x33c] sm:$0xf] %v901_v11  ;;  %v900_v25 = vld [vmem:[#allocation2 + $0x84] sm:$0xf]  ;;  %v355_v34 = vld [vmem:[#allocation2 + $0x8] sm:$0x1] }
  0x87   : > { %v6957_v24 = vld [vmem:[#allocation3 + $0x218] sm:$0xf0]  ;;  %866 = vst [vmem:[#allocation2 + $0xb4] sm:$0xf] %v865_v20  ;;  %v491_v28 = vor.u32 %v489_v13, %v7796_v16  ;;  %v356_v36 = vsel %vm7609_vm3, 0, %v355_v34  ;;  %s8567_s7 = scalar_lea.vmem [#allocation9], %s5969_s13 }
  0x88   : > { %932 = vst [vmem:[#allocation3 + $0x318] sm:$0xf] %v900_v25  ;;  %v942_v37 = vld [vmem:[#allocation2] sm:$0xf]  ;;  %v943_v38 = vld [vmem:[#allocation2 + $0x4] sm:$0xf] }
  0x89   : > { %v492_v35 = vsel %vm7630_vm7, %v484_v21, %v491_v28  ;;  %v780_v39 = vld [vmem:[#allocation2 + $0x24] sm:$0xf]  ;;  %vm990_vm11 = vsmask.f32 3328  ;;  %357 = vst [vmem:[#allocation2 + $0x8] sm:$0x1] %v356_v36  ;;  %5216 = vmatpush.bf16.msrb.mxu0 %v7066_v30 }
  0x8a   : > { %783 = vst [vmem:[#allocation2 + $0x28] sm:$0xf] %v492_v35  ;;  %v781_v43 = vsel %vm7640_vm8, %v483_v26, %v780_v39  ;;  %vm991_vm12 = vsmask.f32 7440  ;;  %v994_v46 = vshrl.u32 %v942_v37, 16  ;;  %v997_v47 = vshll.u32 %v942_v37, 16 }
  0x8b   : > { %782 = vst [vmem:[#allocation2 + $0x24] sm:$0xf] %v781_v43  ;;  %v909_v50 = vld [vmem:[#allocation2 + $0xb8] sm:$0xf]  ;;  %v1003_v51 = vshll.u32 %v943_v38, 16  ;;  %v1007_v52 = vshrl.u32 %v943_v38, 16  ;;  %vm7815_vm14 = vmor %vm990_vm11, %vm991_vm12 }
  0x8c   : > { %v6274_v41 = vld [vmem:[#allocation3 + $0x1f8] sm:$0xf]  ;;  %v1441_v53 = vld [vmem:[#allocation2] sm:$0xe]  ;;  %941 = vst [vmem:[#allocation3 + $0x45c] sm:$0xf] %v909_v50 }
  0x8d   : > { %v6275_v44 = vor.u32 %v6957_v24, %v6274_v41  ;;  %v6993_v45 = vld [vmem:[#allocation3 + $0x338] sm:$0xf0]  ;;  %v996_v56 = vrot.slane %v994_v46, 4  ;;  %v999_v57 = vrot.slane %v997_v47, 5  ;;  %v1005_v59 = vrot.slane %v1003_v51, 5  ;;  %s7106_s28 = sshll.u32 %s7446_s18, 7 }
  0x8e   : > { %v908_v54 = vld [vmem:[#allocation2 + $0xb4] sm:$0xf]  ;;  %v1009_v61 = vrot.slane %v1007_v52, 4  ;;  %v1442_v0 = vld [vmem:[#allocation2 + $0x4] sm:$0xf]  ;;  %v5972_v5 = vrot.slane %v1441_v53, 9  ;;  %s5835_s6 = scalar_lea.hbm %s8840_s4, %s7106_s28 }
  0x8f   : > { %4896 = vmatmul.bf16.gmra.mxu1 %v6275_v44  ;;  %v6418_v58 = vld [vmem:[#allocation3 + $0x318] sm:$0xf]  ;;  %940 = vst [vmem:[#allocation3 + $0x438] sm:$0xf] %v908_v54  ;;  %v1000_v63 = vor.u32 %v999_v57, %v996_v56  ;;  %v1542_v11 = vrot.slane %v1442_v0, 5  ;;  %s5836_s24 = sshll.u32 %s8567_s7, 4  ;;  %s5837_s24 = int_to_ptr.vmem [resolvable:$true] %s5836_s24 }
  0x90   : > { %v6419_v62 = vor.u32 %v6993_v45, %v6418_v58  ;;  %v7089_v6 = vld [vmem:[#allocation7 + $0x1b8] sm:$0xff]  ;;  %v1010_v9 = vor.u32 %v1009_v61, %v1005_v59  ;;  %v944_v12 = vld [vmem:[#allocation2 + $0x8] sm:$0x1]  ;;  %v1716_v28 = vld [vmem:[#allocation2 + $0xc] sm:$0xf]  ;;  %s5838_s13 = sshll.u32 %s5835_s6, 4  ;;  %s5839_s13 = int_to_ptr.hbm [resolvable:$true] %s5838_s13 }
  0x91   : > { %v885_v7 = vld [vmem:[#allocation2 + $0x28] sm:$0xf]  ;;  %v1001_v13 = vrot.slane %v1000_v63, 4  ;;  %v1013_v20 = vshll.u32 %v944_v12, 16  ;;  %v1543_v23 = vsel %vm7809_vm13, %v5972_v5, %v1542_v11  ;;  %5387 = vmatpush.bf16.msra.mxu2 %v7089_v6  ;;  %v1544_v25 = vrot.slane %v1542_v11, 4  ;;  %v7081_v61 = vld [vmem:[#allocation7 + $0x178] sm:$0xff] }
  0x92   : > { %4916 = vmatmul.bf16.gmra.mxu2 %v6419_v62  ;;  %917 = vst [vmem:[#allocation3 + $0xfc] sm:$0xf] %v885_v7  ;;  %v884_v14 = vld [vmem:[#allocation2 + $0x24] sm:$0xf]  ;;  %v1011_v19 = vrot.slane %v1010_v9, 4  ;;  %v7105_v0 = vld [vmem:[#allocation7 + $0x238] sm:$0xff]  ;;  %5298 = vmatpush.bf16.msra.mxu1 %v7081_v61 }
  0x93   : > { %v1443_v21 = vld [vmem:[#allocation2 + $0x8] sm:$0x1]  ;;  %916 = vst [vmem:[#allocation3 + $0xd8] sm:$0xf] %v884_v14  ;;  %v1006_v24 = vsel %vm7815_vm14, %v1001_v13, %v1005_v59  ;;  %v358_v29 = vld [vmem:[#allocation2 + $0x14] sm:$0x1]  ;;  %5565 = vmatpush.bf16.msra.mxu0 %v7105_v0 }
  0x94   : > { %v1545_v26 = vrot.slane %v1443_v21, 5  ;;  %v7029_v30 = vld [vmem:[#allocation3 + $0x458] sm:$0xf0]  ;;  %v1015_v34 = vrot.slane %v1013_v20, 5  ;;  %1409 = vst [vmem:[#allocation3 + $0x4] sm:$0xf] %v1006_v24 }
  0x95   : > { %v1717_v35 = vld [vmem:[#allocation2 + $0x10] sm:$0xf]  ;;  %1684 = vst [vmem:[#allocation3 + $0x8] sm:$0xf] %v1543_v23  ;;  %v1780_v38 = vld [vmem:[#allocation2 + $0xc] sm:$0xf] }
  0x96   : > { %v6562_v36 = vld [vmem:[#allocation3 + $0x438] sm:$0xf]  ;;  %v1546_v37 = vsel %vm7809_vm13, %v1544_v25, %v1545_v26  ;;  %v1016_v41 = vsel %vm7815_vm14, %v1011_v19, %v1015_v34  ;;  %v1829_v44 = vshrl.u32 %v1780_v38, 16  ;;  %v1832_v45 = vshll.u32 %v1780_v38, 16  ;;  %v945_v50 = vld [vmem:[#allocation2 + $0xc] sm:$0xf] }
  0x97   : > { %v6563_v39 = vor.u32 %v7029_v30, %v6562_v36  ;;  %1685 = vst [vmem:[#allocation3 + $0x2c] sm:$0xf] %v1546_v37  ;;  %v1781_v43 = vld [vmem:[#allocation2 + $0x10] sm:$0xf]  ;;  %v359_v46 = vsel %vm7609_vm3, 0, %v358_v29  ;;  %v1018_v5 = vshrl.u32 %v945_v50, 16 }
  0x98   : > { %1410 = vst [vmem:[#allocation3 + $0x28] sm:$0xf] %v1016_v41  ;;  %v1838_v47 = vshll.u32 %v1781_v43, 16  ;;  %v1831_v52 = vrot.slane %v1829_v44, 4  ;;  %v1834_v53 = vrot.slane %v1832_v45, 5  ;;  %v1842_v54 = vshrl.u32 %v1781_v43, 16 }
  0x99   : > { %4936 = vmatmul.bf16.gmra.mxu3 %v6563_v39  ;;  %v6921_v51 = vld [vmem:[#allocation3 + $0xf8] sm:$0xf0]  ;;  %1748 = vst [vmem:[#allocation3 + $0xc] sm:$0xf] %v1716_v28  ;;  %v946_v56 = vld [vmem:[#allocation2 + $0x10] sm:$0xf] }
  0x9a   : > { %1749 = vst [vmem:[#allocation3 + $0x30] sm:$0xf] %v1717_v35  ;;  %v6130_v57 = vld [vmem:[#allocation3 + $0xd8] sm:$0xf]  ;;  %v1835_v58 = vor.u32 %v1834_v53, %v1831_v52  ;;  %v1021_v6 = vshll.u32 %v945_v50, 16  ;;  %v1840_v11 = vrot.slane %v1838_v47, 5 }
  0x9b   : > { %360 = vst [vmem:[#allocation2 + $0x14] sm:$0x1] %v359_v46  ;;  %v7097_v59 = vld [vmem:[#allocation7 + $0x1f8] sm:$0xff]  ;;  %v6131_v62 = vor.u32 %v6921_v51, %v6130_v57  ;;  %v6890_v63 = vld [vmem:[#allocation3 + $0x4] sm:$0xf]  ;;  %v1027_v12 = vshll.u32 %v946_v56, 16 }
  0x9c   : > { %v6030_v7 = vld [vmem:[#allocation3 + $0x8] sm:$0xf]  ;;  %v1836_v9 = vrot.slane %v1835_v58, 4  ;;  %5476 = vmatpush.bf16.msra.mxu3 %v7097_v59  ;;  %v1031_v13 = vshrl.u32 %v946_v56, 16  ;;  %v1020_v19 = vrot.slane %v1018_v5, 4  ;;  %v1023_v20 = vrot.slane %v1021_v6, 5 }
  0x9d   : > { %4876 = vmatmul.bf16.gmra.mxu0 %v6131_v62  ;;  %v459_v21 = vrot.slane %v7710_v42, 4  ;;  %v1844_v26 = vrot.slane %v1842_v54, 4  ;;  %v1444_v28 = vld [vmem:[#allocation2 + $0xc] sm:$0xe]  ;;  %v1029_v34 = vrot.slane %v1027_v12, 5  ;;  %v476_v5 = vrot.slane %v7752_v27, 4 }
  0x9e   : > { %v6895_v14 = vld [vmem:[#allocation3 + $0x28] sm:$0xf0]  ;;  %v1841_v25 = vsel %vm7815_vm14, %v1836_v9, %v1840_v11  ;;  %v1024_v30 = vor.u32 %v1023_v20, %v1020_v19  ;;  %v1033_v35 = vrot.slane %v1031_v13, 4  ;;  %v1445_v36 = vld [vmem:[#allocation2 + $0x10] sm:$0xf]  ;;  %v5973_v38 = vrot.slane %v1444_v28, 9 }
  0x9f   : > { %v6024_v23 = vld [vmem:[#allocation3 + $0x24] sm:$0xf0]  ;;  %v6031_v24 = vor.u32 %v6895_v14, %v6030_v7  ;;  %2244 = vst [vmem:[#allocation3 + $0x10] sm:$0xf] %v1841_v25  ;;  %v1549_v39 = vrot.slane %v1445_v36, 5  ;;  %v1845_v51 = vor.u32 %v1844_v26, %v1840_v11  ;;  %s5823_s18 = scalar_lea.sflag [#allocation6], %s7592_s10 }
  0xa0   : > { %v6027_v29 = vor.u32 %v6890_v63, %v6024_v23  ;;  %v6891_v37 = vld [vmem:[#allocation3 + $0xc] sm:$0xf]  ;;  %v1718_v41 = vld [vmem:[#allocation2 + $0x18] sm:$0xf]  ;;  %v1025_v44 = vrot.slane %v1024_v30, 4  ;;  %v1034_v53 = vor.u32 %v1033_v35, %v1029_v34  ;;  %s7382_s21 = sshra.s32 %s5839_s13, 4  ;;  %s7383_s21 = int_to_ptr.hbm [resolvable:$true] %s7382_s21 }
  0xa1   : > { %v6032_v42 = vld [vmem:[#allocation3 + $0x2c] sm:$0xf0]  ;;  %v1550_v46 = vsel %vm7809_vm13, %v5973_v38, %v1549_v39  ;;  %v1719_v47 = vld [vmem:[#allocation2 + $0x1c] sm:$0xf]  ;;  %1750 = vst [vmem:[#allocation3 + $0x54] sm:$0xf] %v1718_v41  ;;  %p7389_p10 = scmp.lt.s32.totalorder %s7383_s21, %s8840_s4 }
  0xa2   : > { %4950 = vmatmul.bf16.vlgmr.msrb.gmra.mxu1 %v6027_v29  ;;  %5039 = vmatmul.bf16.vlgmr.msrb.gmra.mxu2 %v6031_v24  ;;  %v770_v43 = vld [vmem:[#allocation2 + $0x14] sm:$0x1]  ;;  %v361_v50 = vld [vmem:[#allocation2 + $0x20] sm:$0x1]  ;;  %v1030_v52 = vsel %vm7815_vm14, %v1025_v44, %v1029_v34  ;;  %v1783_v56 = vld [vmem:[#allocation2 + $0x18] sm:$0xf]  ;;  %v6035_v57 = vor.u32 %v6891_v37, %v6032_v42 }
  0xa3   : > { %v771_v45 = vsel %vm7614_vm4, %v459_v21, %v770_v43  ;;  %v362_v54 = vsel %vm7609_vm3, 0, %v361_v50  ;;  %1411 = vst [vmem:[#allocation3 + $0x4c] sm:$0xf] %v1030_v52  ;;  %v1784_v58 = vld [vmem:[#allocation2 + $0x1c] sm:$0xf]  ;;  %v1853_v59 = vshrl.u32 %v1783_v56, 16 }
  0xa4   : > { %772 = vst [vmem:[#allocation2 + $0x14] sm:$0x1] %v771_v45  ;;  %v1856_v61 = vshll.u32 %v1783_v56, 16  ;;  %v1862_v62 = vshll.u32 %v1784_v58, 16  ;;  %v1866_v63 = vshrl.u32 %v1784_v58, 16  ;;  %v1846_v9 = vrot.slane %v1845_v51, 4 }
  0xa5   : > { %1686 = vst [vmem:[#allocation3 + $0x50] sm:$0xf] %v1550_v46  ;;  %v948_v0 = vld [vmem:[#allocation2 + $0x18] sm:$0xf]  ;;  %v1855_v6 = vrot.slane %v1853_v59, 4  ;;  %v1035_v11 = vrot.slane %v1034_v53, 4 }
  0xa6   : > { %1751 = vst [vmem:[#allocation3 + $0x78] sm:$0xf] %v1719_v47  ;;  %v1858_v7 = vrot.slane %v1856_v61, 5  ;;  %v949_v12 = vld [vmem:[#allocation2 + $0x1c] sm:$0xf]  ;;  %v1042_v14 = vshrl.u32 %v948_v0, 16 }
  0xa7   : > { %363 = vst [vmem:[#allocation2 + $0x20] sm:$0x1] %v362_v54  ;;  %v1045_v19 = vshll.u32 %v948_v0, 16  ;;  %v1051_v20 = vshll.u32 %v949_v12, 16  ;;  %v1551_v21 = vrot.slane %v1549_v39, 4  ;;  %v1864_v23 = vrot.slane %v1862_v62, 5 }
  0xa8   : > { %v1859_v13 = vor.u32 %v1858_v7, %v1855_v6  ;;  %v1868_v24 = vrot.slane %v1866_v63, 4  ;;  %v1055_v25 = vshrl.u32 %v949_v12, 16  ;;  %v1044_v36 = vrot.slane %v1042_v14, 4  ;;  %v1448_v41 = vld [vmem:[#allocation2 + $0x1c] sm:$0xf]  ;;  %v7088_v62 = vld [vmem:[#allocation7 + $0x1b0] sm:$0xff] }
  0xa9   : > { %5128 = vmatmul.bf16.vlgmr.msrb.gmra.mxu3 %v6035_v57  ;;  %v1047_v37 = vrot.slane %v1045_v19, 5  ;;  %v1053_v38 = vrot.slane %v1051_v20, 5  ;;  %v1447_v45 = vld [vmem:[#allocation2 + $0x18] sm:$0xe]  ;;  %v364_v53 = vld [vmem:[#allocation2 + $0x2c] sm:$0x1]  ;;  %5388 = vmatpush.bf16.msra.mxu2 %v7088_v62 }
  0xaa   : > { %v1860_v35 = vrot.slane %v1859_v13, 4  ;;  %v1869_v47 = vor.u32 %v1868_v24, %v1864_v23  ;;  %v1057_v51 = vrot.slane %v1055_v25, 4  ;;  %v5974_v52 = vrot.slane %v1447_v45, 9  ;;  %v6900_v57 = vld [vmem:[#allocation3 + $0x54] sm:$0xf]  ;;  %s7388_s25 = scalar_lea.hbm %s8840_s4, 256 }
  0xab   : > { %v1782_v26 = vld [vmem:[#allocation2 + $0x14] sm:$0x1]  ;;  %v1048_v50 = vor.u32 %v1047_v37, %v1044_v36  ;;  %v1556_v61 = vrot.slane %v1448_v41, 5  ;;  %v1720_v0 = vld [vmem:[#allocation2 + $0x24] sm:$0xf] }
  0xac   : > { %v947_v28 = vld [vmem:[#allocation2 + $0x14] sm:$0x1]  ;;  %v1848_v27 = vshll.u32 %v1782_v26, 16  ;;  %v1865_v39 = vsel %vm7815_vm14, %v1860_v35, %v1864_v23  ;;  %v6066_v6 = vld [vmem:[#allocation3 + $0x50] sm:$0xf]  ;;  %v1058_v7 = vor.u32 %v1057_v51, %v1053_v38  ;;  %v365_v23 = vsel %vm7609_vm3, 0, %v364_v53 }
  0xad   : > { %v1446_v29 = vld [vmem:[#allocation2 + $0x14] sm:$0x1]  ;;  %v1037_v30 = vshll.u32 %v947_v28, 16  ;;  %v6068_v58 = vld [vmem:[#allocation3 + $0x74] sm:$0xf0]  ;;  %v1049_v63 = vrot.slane %v1048_v50, 4 }
  0xae   : > { %v1552_v34 = vrot.slane %v1446_v29, 5  ;;  %v1850_v42 = vrot.slane %v1848_v27, 5  ;;  %v777_v46 = vld [vmem:[#allocation2 + $0x20] sm:$0x1]  ;;  %2246 = vst [vmem:[#allocation3 + $0x58] sm:$0xf] %v1865_v39  ;;  %v6071_v28 = vor.u32 %v6900_v57, %v6068_v58 }
  0xaf   : > { %v1039_v43 = vrot.slane %v1037_v30, 5  ;;  %v778_v59 = vsel %vm7614_vm4, %v476_v5, %v777_v46  ;;  %v1786_v12 = vld [vmem:[#allocation2 + $0x24] sm:$0xf]  ;;  %v1054_v13 = vsel %vm7815_vm14, %v1049_v63, %v1053_v38  ;;  %v1721_v5 = vld [vmem:[#allocation2 + $0x28] sm:$0xf]  ;;  %v1059_v35 = vrot.slane %v1058_v7, 4 }
  0xb0   : > { %v1553_v44 = vsel %vm7809_vm13, %v1551_v21, %v1552_v34  ;;  %v1851_v54 = vsel %vm7815_vm14, %v1846_v9, %v1850_v42  ;;  %v1557_v9 = vsel %vm7809_vm13, %v5974_v52, %v1556_v61  ;;  %779 = vst [vmem:[#allocation2 + $0x20] sm:$0x1] %v778_v59  ;;  %v1877_v14 = vshrl.u32 %v1786_v12, 16  ;;  %v6038_v20 = vld [vmem:[#allocation3 + $0x10] sm:$0xf] }
  0xb1   : > { %1687 = vst [vmem:[#allocation3 + $0x74] sm:$0xf] %v1553_v44  ;;  %v1040_v56 = vsel %vm7815_vm14, %v1035_v11, %v1039_v43  ;;  %v1787_v11 = vld [vmem:[#allocation2 + $0x28] sm:$0xf]  ;;  %v1880_v19 = vshll.u32 %v1786_v12, 16  ;;  %v7855_v21 = vrot.slane %v1869_v47, 4 }
  0xb2   : > { %2245 = vst [vmem:[#allocation3 + $0x34] sm:$0xf] %v1851_v54  ;;  %v1886_v24 = vshll.u32 %v1787_v11, 16  ;;  %v1890_v25 = vshrl.u32 %v1787_v11, 16  ;;  %v6899_v26 = vld [vmem:[#allocation3 + $0x4c] sm:$0xf] }
  0xb3   : > { %1412 = vst [vmem:[#allocation3 + $0x70] sm:$0xf] %v1040_v56  ;;  %v1879_v29 = vrot.slane %v1877_v14, 4  ;;  %v1882_v27 = vrot.slane %v1880_v19, 5  ;;  %v951_v30 = vld [vmem:[#allocation2 + $0x24] sm:$0xf] }
  0xb4   : > { %1413 = vst [vmem:[#allocation3 + $0x94] sm:$0xf] %v1054_v13  ;;  %v1558_v36 = vrot.slane %v1556_v61, 4  ;;  %v1888_v41 = vrot.slane %v1886_v24, 5  ;;  %v1892_v42 = vrot.slane %v1890_v25, 4  ;;  %v1066_v39 = vshrl.u32 %v951_v30, 16 }
  0xb5   : > { %1688 = vst [vmem:[#allocation3 + $0x98] sm:$0xf] %v1557_v9  ;;  %v1883_v38 = vor.u32 %v1882_v27, %v1879_v29  ;;  %v952_v43 = vld [vmem:[#allocation2 + $0x28] sm:$0xf]  ;;  %v1069_v45 = vshll.u32 %v951_v30, 16 }
  0xb6   : > { %1752 = vst [vmem:[#allocation3 + $0x9c] sm:$0xf] %v1720_v0  ;;  %v1075_v51 = vshll.u32 %v952_v43, 16  ;;  %v1079_v52 = vshrl.u32 %v952_v43, 16  ;;  %v7096_v63 = vld [vmem:[#allocation7 + $0x1f0] sm:$0xff]  ;;  %v493_v0 = vrot.slane %v7796_v16, 4 }
  0xb7   : > { %1753 = vst [vmem:[#allocation3 + $0xc0] sm:$0xf] %v1721_v5  ;;  %v1884_v50 = vrot.slane %v1883_v38, 4  ;;  %v1785_v54 = vld [vmem:[#allocation2 + $0x20] sm:$0x1]  ;;  %5477 = vmatpush.bf16.msra.mxu3 %v7096_v63  ;;  %v7104_v11 = vld [vmem:[#allocation7 + $0x230] sm:$0xff]  ;;  %v1893_v5 = vor.u32 %v1892_v42, %v1888_v41 }
  0xb8   : > { %v6904_v34 = vld [vmem:[#allocation3 + $0x70] sm:$0xf0]  ;;  %366 = vst [vmem:[#allocation2 + $0x2c] sm:$0x1] %v365_v23  ;;  %v950_v56 = vld [vmem:[#allocation2 + $0x20] sm:$0x1]  ;;  %5566 = vmatpush.bf16.msra.mxu0 %v7104_v11 }
  0xb9   : > { %v6067_v37 = vor.u32 %v6904_v34, %v6066_v6  ;;  %v6896_v44 = vld [vmem:[#allocation3 + $0x30] sm:$0xf0]  ;;  %5133 = vmatmul.bf16.gmra.mxu3 %v6071_v28  ;;  %v1449_v57 = vld [vmem:[#allocation2 + $0x20] sm:$0x1]  ;;  %v1872_v58 = vshll.u32 %v1785_v54, 16  ;;  %v1061_v59 = vshll.u32 %v950_v56, 16  ;;  %v1889_v62 = vsel %vm7815_vm14, %v1884_v50, %v1888_v41 }
  0xba   : > { %v6039_v46 = vor.u32 %v6896_v44, %v6038_v20  ;;  %v6060_v47 = vld [vmem:[#allocation3 + $0x6c] sm:$0xf0]  ;;  %v1559_v61 = vrot.slane %v1449_v57, 5  ;;  %2248 = vst [vmem:[#allocation3 + $0xa0] sm:$0xf] %v1889_v62  ;;  %v1068_v13 = vrot.slane %v1066_v39, 4 }
  0xbb   : > { %5044 = vmatmul.bf16.gmra.mxu2 %v6067_v37  ;;  %v6063_v53 = vor.u32 %v6899_v26, %v6060_v47  ;;  %v7080_v6 = vld [vmem:[#allocation7 + $0x170] sm:$0xff]  ;;  %v1874_v7 = vrot.slane %v1872_v58, 5  ;;  %v1063_v9 = vrot.slane %v1061_v59, 5  ;;  %v1071_v14 = vrot.slane %v1069_v45, 5  ;;  %v367_v20 = vld [vmem:[#allocation2 + $0x38] sm:$0x1] }
  0xbc   : > { %5217 = vmatmul.bf16.vlgmr.msrb.gmra.mxu0 %v6039_v46  ;;  %v1560_v12 = vsel %vm7809_vm13, %v1558_v36, %v1559_v61  ;;  %5299 = vmatpush.bf16.msra.mxu1 %v7080_v6  ;;  %v1077_v19 = vrot.slane %v1075_v51, 5  ;;  %v1081_v25 = vrot.slane %v1079_v52, 4  ;;  %v1450_v26 = vld [vmem:[#allocation2 + $0x24] sm:$0xe]  ;;  %v1451_v30 = vld [vmem:[#allocation2 + $0x28] sm:$0xf] }
  0xbd   : > { %4955 = vmatmul.bf16.gmra.mxu1 %v6063_v53  ;;  %1689 = vst [vmem:[#allocation3 + $0xbc] sm:$0xf] %v1560_v12  ;;  %v1875_v16 = vsel %vm7815_vm14, %v7855_v21, %v1874_v7  ;;  %v1064_v23 = vsel %vm7815_vm14, %v1059_v35, %v1063_v9  ;;  %v6909_v28 = vld [vmem:[#allocation3 + $0x9c] sm:$0xf]  ;;  %v1072_v27 = vor.u32 %v1071_v14, %v1068_v13  ;;  %v5975_v34 = vrot.slane %v1450_v26, 9 }
  0xbe   : > { %2247 = vst [vmem:[#allocation3 + $0x7c] sm:$0xf] %v1875_v16  ;;  %v510_v36 = vrot.slane %v7624_v18, 4  ;;  %v6102_v37 = vld [vmem:[#allocation3 + $0x98] sm:$0xf]  ;;  %v1082_v21 = vor.u32 %v1081_v25, %v1077_v19  ;;  %v1563_v38 = vrot.slane %v1451_v30, 5 }
  0xbf   : > { %v784_v24 = vld [vmem:[#allocation2 + $0x2c] sm:$0x1]  ;;  %1414 = vst [vmem:[#allocation3 + $0xb8] sm:$0xf] %v1064_v23  ;;  %v1722_v41 = vld [vmem:[#allocation2 + $0x30] sm:$0xf] }
  0xc0   : > { %v785_v29 = vsel %vm7614_vm4, %v493_v0, %v784_v24  ;;  %v6104_v35 = vld [vmem:[#allocation3 + $0xbc] sm:$0xf0]  ;;  %v7872_v42 = vrot.slane %v1893_v5, 4  ;;  %v1073_v43 = vrot.slane %v1072_v27, 4  ;;  %v6074_v44 = vld [vmem:[#allocation3 + $0x58] sm:$0xf]  ;;  %v1564_v45 = vsel %vm7809_vm13, %v5975_v34, %v1563_v38 }
  0xc1   : > { %786 = vst [vmem:[#allocation2 + $0x2c] sm:$0x1] %v785_v29  ;;  %v7874_v39 = vrot.slane %v1082_v21, 4  ;;  %v1723_v46 = vld [vmem:[#allocation2 + $0x34] sm:$0xf]  ;;  %v368_v47 = vsel %vm7609_vm3, 0, %v367_v20  ;;  %v6107_v56 = vor.u32 %v6909_v28, %v6104_v35 }
  0xc2   : > { %1754 = vst [vmem:[#allocation3 + $0xe4] sm:$0xf] %v1722_v41  ;;  %v6908_v50 = vld [vmem:[#allocation3 + $0x94] sm:$0xf]  ;;  %v1078_v51 = vsel %vm7815_vm14, %v1073_v43, %v1077_v19  ;;  %v1789_v52 = vld [vmem:[#allocation2 + $0x30] sm:$0xf] }
  0xc3   : > { %1690 = vst [vmem:[#allocation3 + $0xe0] sm:$0xf] %v1564_v45  ;;  %v1790_v53 = vld [vmem:[#allocation2 + $0x34] sm:$0xf]  ;;  %v1901_v57 = vshrl.u32 %v1789_v52, 16  ;;  %v1904_v58 = vshll.u32 %v1789_v52, 16 }
  0xc4   : > { %v6913_v54 = vld [vmem:[#allocation3 + $0xb8] sm:$0xf0]  ;;  %1415 = vst [vmem:[#allocation3 + $0xdc] sm:$0xf] %v1078_v51  ;;  %v1910_v61 = vshll.u32 %v1790_v53, 16  ;;  %v1914_v62 = vshrl.u32 %v1790_v53, 16 }
  0xc5   : > { %v6103_v59 = vor.u32 %v6913_v54, %v6102_v37  ;;  %1755 = vst [vmem:[#allocation3 + $0x108] sm:$0xf] %v1723_v46  ;;  %v954_v63 = vld [vmem:[#allocation2 + $0x30] sm:$0xf]  ;;  %v6905_v0 = vld [vmem:[#allocation3 + $0x78] sm:$0xf0] }
  0xc6   : > { %369 = vst [vmem:[#allocation2 + $0x38] sm:$0x1] %v368_v47  ;;  %v1903_v6 = vrot.slane %v1901_v57, 4  ;;  %v1906_v7 = vrot.slane %v1904_v58, 5  ;;  %v6075_v9 = vor.u32 %v6905_v0, %v6074_v44  ;;  %v6096_v12 = vld [vmem:[#allocation3 + $0xb4] sm:$0xf0] }
  0xc7   : > { %v1565_v11 = vrot.slane %v1563_v38, 4  ;;  %v1912_v13 = vrot.slane %v1910_v61, 5  ;;  %v955_v5 = vld [vmem:[#allocation2 + $0x34] sm:$0xf]  ;;  %v6099_v14 = vor.u32 %v6908_v50, %v6096_v12  ;;  %v1916_v28 = vrot.slane %v1914_v62, 4  ;;  %v7087_v41 = vld [vmem:[#allocation7 + $0x1a8] sm:$0xff] }
  0xc8   : > { %v1788_v19 = vld [vmem:[#allocation2 + $0x2c] sm:$0x1]  ;;  %v1907_v23 = vor.u32 %v1906_v7, %v1903_v6  ;;  %v1090_v27 = vshrl.u32 %v954_v63, 16  ;;  %v1093_v30 = vshll.u32 %v954_v63, 16  ;;  %v1099_v34 = vshll.u32 %v955_v5, 16  ;;  %5389 = vmatpush.bf16.msra.mxu2 %v7087_v41 }
  0xc9   : > { %5138 = vmatmul.bf16.gmra.mxu3 %v6107_v56  ;;  %v953_v20 = vld [vmem:[#allocation2 + $0x2c] sm:$0x1]  ;;  %v1896_v24 = vshll.u32 %v1788_v19, 16  ;;  %v1917_v50 = vor.u32 %v1916_v28, %v1912_v13  ;;  %v6918_v51 = vld [vmem:[#allocation3 + $0xe4] sm:$0xf]  ;;  %v1103_v57 = vshrl.u32 %v955_v5, 16 }
  0xca   : > { %v1452_v16 = vld [vmem:[#allocation2 + $0x2c] sm:$0x1]  ;;  %v1085_v25 = vshll.u32 %v953_v20, 16  ;;  %v1908_v29 = vrot.slane %v1907_v23, 4  ;;  %v1092_v43 = vrot.slane %v1090_v27, 4  ;;  %v1095_v44 = vrot.slane %v1093_v30, 5  ;;  %v7898_v7 = vpop.f32.mrf.mxu1 }
  0xcb   : > { %5049 = vmatmul.bf16.gmra.mxu2 %v6103_v59  ;;  %v1566_v26 = vrot.slane %v1452_v16, 5  ;;  %v1898_v37 = vrot.slane %v1896_v24, 5  ;;  %v1101_v56 = vrot.slane %v1099_v34, 5  ;;  %v6138_v58 = vld [vmem:[#allocation3 + $0xe0] sm:$0xf]  ;;  %v1105_v62 = vrot.slane %v1103_v57, 4 }
  0xcc   : > { %5222 = vmatmul.bf16.gmra.mxu0 %v6075_v9  ;;  %v1087_v21 = vrot.slane %v1085_v25, 5  ;;  %v1913_v35 = vsel %vm7815_vm14, %v1908_v29, %v1912_v13  ;;  %v6140_v52 = vld [vmem:[#allocation3 + $0x104] sm:$0xf0]  ;;  %v1096_v54 = vor.u32 %v1095_v44, %v1092_v43  ;;  %v1454_v59 = vld [vmem:[#allocation2 + $0x34] sm:$0xf]  ;;  %v7896_v6 = vrot.slane %v1917_v50, 4 }
  0xcd   : > { %4960 = vmatmul.bf16.gmra.mxu1 %v6099_v14  ;;  %v1567_v38 = vsel %vm7809_vm13, %v1565_v11, %v1566_v26  ;;  %v1899_v45 = vsel %vm7815_vm14, %v7872_v42, %v1898_v37  ;;  %v791_v47 = vld [vmem:[#allocation2 + $0x38] sm:$0x1]  ;;  %2250 = vst [vmem:[#allocation3 + $0xe8] sm:$0xf] %v1913_v35  ;;  %v1453_v42 = vld [vmem:[#allocation2 + $0x30] sm:$0xe]  ;;  %v1106_v11 = vor.u32 %v1105_v62, %v1101_v56 }
  0xce   : > { %1691 = vst [vmem:[#allocation3 + $0x104] sm:$0xf] %v1567_v38  ;;  %v1088_v46 = vsel %vm7815_vm14, %v7874_v39, %v1087_v21  ;;  %v792_v53 = vsel %vm7614_vm4, %v510_v36, %v791_v47  ;;  %v5976_v39 = vrot.slane %v1453_v42, 9  ;;  %v1097_v61 = vrot.slane %v1096_v54, 4  ;;  %v6110_v0 = vld [vmem:[#allocation3 + $0xa0] sm:$0xf] }
  0xcf   : > { %2249 = vst [vmem:[#allocation3 + $0xc4] sm:$0xf] %v1899_v45  ;;  %v1570_v63 = vrot.slane %v1454_v59, 5  ;;  %v1724_v18 = vld [vmem:[#allocation2 + $0x3c] sm:$0xf]  ;;  %v6143_v20 = vor.u32 %v6918_v51, %v6140_v52  ;;  %v1107_v25 = vrot.slane %v1106_v11, 4 }
  0xd0   : > { %1416 = vst [vmem:[#allocation3 + $0x100] sm:$0xf] %v1088_v46  ;;  %v370_v9 = vld [vmem:[#allocation2 + $0x44] sm:$0x1]  ;;  %v6917_v36 = vld [vmem:[#allocation3 + $0xdc] sm:$0xf]  ;;  %v1102_v12 = vsel %vm7815_vm14, %v1097_v61, %v1101_v56 }
  0xd1   : > { %793 = vst [vmem:[#allocation2 + $0x38] sm:$0x1] %v792_v53  ;;  %v1571_v13 = vsel %vm7809_vm13, %v5976_v39, %v1570_v63  ;;  %v1725_v5 = vld [vmem:[#allocation2 + $0x40] sm:$0xf]  ;;  %v1792_v14 = vld [vmem:[#allocation2 + $0x3c] sm:$0xf] }
  0xd2   : > { %1756 = vst [vmem:[#allocation3 + $0x12c] sm:$0xf] %v1724_v18  ;;  %v371_v16 = vsel %vm7609_vm3, 0, %v370_v9  ;;  %v1925_v23 = vshrl.u32 %v1792_v14, 16  ;;  %v1572_v26 = vrot.slane %v1570_v63, 4  ;;  %v1928_v28 = vshll.u32 %v1792_v14, 16  ;;  %v7909_v59 = vpop.f32.mrf.mxu2  ;;  %v7911_v63 = vpop.f32.mrf.mxu1 }
  0xd3   : > { %1417 = vst [vmem:[#allocation3 + $0x124] sm:$0xf] %v1102_v12  ;;  %v1793_v27 = vld [vmem:[#allocation2 + $0x40] sm:$0xf]  ;;  %v527_v50 = vrot.slane %v7672_v10, 4 }
  0xd4   : > { %1692 = vst [vmem:[#allocation3 + $0x128] sm:$0xf] %v1571_v13  ;;  %v1927_v37 = vrot.slane %v1925_v23, 4  ;;  %v1930_v21 = vrot.slane %v1928_v28, 5  ;;  %v1934_v51 = vshll.u32 %v1793_v27, 16  ;;  %v1938_v52 = vshrl.u32 %v1793_v27, 16 }
  0xd5   : > { %v6922_v19 = vld [vmem:[#allocation3 + $0x100] sm:$0xf0]  ;;  %1757 = vst [vmem:[#allocation3 + $0x150] sm:$0xf] %v1725_v5  ;;  %v958_v39 = vld [vmem:[#allocation2 + $0x40] sm:$0xf] }
  0xd6   : > { %v6139_v24 = vor.u32 %v6922_v19, %v6138_v58  ;;  %v6914_v29 = vld [vmem:[#allocation3 + $0xc0] sm:$0xf0]  ;;  %372 = vst [vmem:[#allocation2 + $0x44] sm:$0x1] %v371_v16  ;;  %v1931_v47 = vor.u32 %v1930_v21, %v1927_v37  ;;  %v7095_v58 = vld [vmem:[#allocation7 + $0x1e8] sm:$0xff]  ;;  %v1936_v61 = vrot.slane %v1934_v51, 5 }
  0xd7   : > { %v6111_v30 = vor.u32 %v6914_v29, %v6110_v0  ;;  %v6132_v34 = vld [vmem:[#allocation3 + $0xfc] sm:$0xf0]  ;;  %v957_v53 = vld [vmem:[#allocation2 + $0x3c] sm:$0xf]  ;;  %v1940_v62 = vrot.slane %v1938_v52, 4  ;;  %5478 = vmatpush.bf16.msra.mxu3 %v7095_v58  ;;  %v7079_v18 = vld [vmem:[#allocation7 + $0x168] sm:$0xff] }
  0xd8   : > { %v6135_v38 = vor.u32 %v6917_v36, %v6132_v34  ;;  %v1791_v41 = vld [vmem:[#allocation2 + $0x38] sm:$0x1]  ;;  %v1932_v42 = vrot.slane %v1931_v47, 4  ;;  %v7103_v9 = vld [vmem:[#allocation7 + $0x228] sm:$0xff]  ;;  %v1114_v36 = vshrl.u32 %v957_v53, 16  ;;  %v1117_v12 = vshll.u32 %v957_v53, 16  ;;  %5300 = vmatpush.bf16.msra.mxu1 %v7079_v18 }
  0xd9   : > { %v956_v35 = vld [vmem:[#allocation2 + $0x38] sm:$0x1]  ;;  %5143 = vmatmul.bf16.gmra.mxu3 %v6143_v20  ;;  %v1920_v44 = vshll.u32 %v1791_v41, 16  ;;  %v1123_v5 = vshll.u32 %v958_v39, 16  ;;  %v6927_v14 = vld [vmem:[#allocation3 + $0x12c] sm:$0xf]  ;;  %5567 = vmatpush.bf16.msra.mxu0 %v7103_v9 }
  0xda   : > { %v1455_v43 = vld [vmem:[#allocation2 + $0x38] sm:$0x1]  ;;  %v1109_v45 = vshll.u32 %v956_v35, 16  ;;  %v1937_v13 = vsel %vm7815_vm14, %v1932_v42, %v1936_v61  ;;  %v1116_v20 = vrot.slane %v1114_v36, 4  ;;  %v1119_v16 = vrot.slane %v1117_v12, 5 }
  0xdb   : > { %5054 = vmatmul.bf16.gmra.mxu2 %v6139_v24  ;;  %v1573_v46 = vrot.slane %v1455_v43, 5  ;;  %v1922_v54 = vrot.slane %v1920_v44, 5  ;;  %v1127_v23 = vshrl.u32 %v958_v39, 16  ;;  %v6174_v24 = vld [vmem:[#allocation3 + $0x128] sm:$0xf]  ;;  %v1125_v28 = vrot.slane %v1123_v5, 5 }
  0xdc   : > { %5227 = vmatmul.bf16.gmra.mxu0 %v6111_v30  ;;  %v1111_v56 = vrot.slane %v1109_v45, 5  ;;  %v6176_v19 = vld [vmem:[#allocation3 + $0x14c] sm:$0xf0]  ;;  %v1456_v29 = vld [vmem:[#allocation2 + $0x3c] sm:$0xe]  ;;  %v1120_v27 = vor.u32 %v1119_v16, %v1116_v20  ;;  %v7924_v45 = vpop.f32.mrf.mxu2 }
  0xdd   : > { %v1574_v57 = vsel %vm7809_vm13, %v1572_v26, %v1573_v46  ;;  %4965 = vmatmul.bf16.gmra.mxu1 %v6135_v38  ;;  %v1923_v10 = vsel %vm7815_vm14, %v7896_v6, %v1922_v54  ;;  %v798_v11 = vld [vmem:[#allocation2 + $0x44] sm:$0x1]  ;;  %v7922_v26 = vpop.f32.mrf.mxu3  ;;  %2252 = vst [vmem:[#allocation3 + $0x130] sm:$0xf] %v1937_v13  ;;  %v1129_v30 = vrot.slane %v1127_v23, 4  ;;  %v5977_v37 = vrot.slane %v1456_v29, 9 }
  0xde   : > { %1693 = vst [vmem:[#allocation3 + $0x14c] sm:$0xf] %v1574_v57  ;;  %v1112_v0 = vsel %vm7815_vm14, %v1107_v25, %v1111_v56  ;;  %v799_v6 = vsel %vm7614_vm4, %v527_v50, %v798_v11  ;;  %v1941_v25 = vor.u32 %v1940_v62, %v1936_v61  ;;  %v1457_v34 = vld [vmem:[#allocation2 + $0x40] sm:$0xf]  ;;  %v6926_v38 = vld [vmem:[#allocation3 + $0x124] sm:$0xf]  ;;  %v6179_v50 = vor.u32 %v6927_v14, %v6176_v19  ;;  %v7934_v11 = vpop.f32.mrf.mxu0 }
  0xdf   : > { %2251 = vst [vmem:[#allocation3 + $0x10c] sm:$0xf] %v1923_v10  ;;  %v6146_v21 = vld [vmem:[#allocation3 + $0xe8] sm:$0xf]  ;;  %v1577_v41 = vrot.slane %v1457_v34, 5  ;;  %v1121_v46 = vrot.slane %v1120_v27, 4  ;;  %v1130_v47 = vor.u32 %v1129_v30, %v1125_v28 }
  0xe0   : > { %1418 = vst [vmem:[#allocation3 + $0x148] sm:$0xf] %v1112_v0  ;;  %v1726_v35 = vld [vmem:[#allocation2 + $0x48] sm:$0xf]  ;;  %v1727_v43 = vld [vmem:[#allocation2 + $0x4c] sm:$0xf]  ;;  %v7928_v42 = vpop.f32.mrf.mxu1 }
  0xe1   : > { %800 = vst [vmem:[#allocation2 + $0x44] sm:$0x1] %v799_v6  ;;  %v1942_v51 = vrot.slane %v1941_v25, 4  ;;  %v1578_v52 = vsel %vm7809_vm13, %v5977_v37, %v1577_v41  ;;  %v1579_v53 = vrot.slane %v1577_v41, 4  ;;  %v373_v54 = vld [vmem:[#allocation2 + $0x50] sm:$0x1]  ;;  %v1126_v58 = vsel %vm7815_vm14, %v1121_v46, %v1125_v28 }
  0xe2   : > { %8868 = vst [vmem:[#allocation14_spill] sm:$0xff] %v7922_v26  ;;  %v1131_v39 = vrot.slane %v1130_v47, 4  ;;  %v374_v61 = vsel %vm7609_vm3, 0, %v373_v54  ;;  %v1795_v10 = vld [vmem:[#allocation2 + $0x48] sm:$0xf]  ;;  %v544_v41 = vrot.slane %v7721_v2, 4 }
  0xe3   : > { %1758 = vst [vmem:[#allocation3 + $0x174] sm:$0xf] %v1726_v35  ;;  %v1949_v19 = vshrl.u32 %v1795_v10, 16  ;;  %v1796_v6 = vld [vmem:[#allocation2 + $0x4c] sm:$0xf]  ;;  %v1952_v20 = vshll.u32 %v1795_v10, 16 }
  0xe4   : > { %1759 = vst [vmem:[#allocation3 + $0x198] sm:$0xf] %v1727_v43  ;;  %v1958_v27 = vshll.u32 %v1796_v6, 16  ;;  %v1962_v37 = vshrl.u32 %v1796_v6, 16  ;;  %v6182_v6 = vld [vmem:[#allocation3 + $0x130] sm:$0xf] }
  0xe5   : > { %v6931_v44 = vld [vmem:[#allocation3 + $0x148] sm:$0xf0]  ;;  %1694 = vst [vmem:[#allocation3 + $0x170] sm:$0xf] %v1578_v52  ;;  %v7936_v23 = vpop.f32.mrf.mxu3  ;;  %v1951_v28 = vrot.slane %v1949_v19, 4  ;;  %v1954_v29 = vrot.slane %v1952_v20, 5 }
  0xe6   : > { %v6923_v56 = vld [vmem:[#allocation3 + $0x108] sm:$0xf0]  ;;  %v6175_v57 = vor.u32 %v6931_v44, %v6174_v24  ;;  %1419 = vst [vmem:[#allocation3 + $0x16c] sm:$0xf] %v1126_v58  ;;  %v1960_v43 = vrot.slane %v1958_v27, 5  ;;  %v1964_v47 = vrot.slane %v1962_v37, 4  ;;  %v7953_v20 = vpop.f32.mrf.mxu0 }
  0xe7   : > { %v6168_v62 = vld [vmem:[#allocation3 + $0x144] sm:$0xf0]  ;;  %v6147_v0 = vor.u32 %v6923_v56, %v6146_v21  ;;  %375 = vst [vmem:[#allocation2 + $0x50] sm:$0x1] %v374_v61  ;;  %v960_v21 = vld [vmem:[#allocation2 + $0x48] sm:$0xf]  ;;  %v1955_v35 = vor.u32 %v1954_v29, %v1951_v28 }
  0xe8   : > { %v6171_v18 = vor.u32 %v6926_v38, %v6168_v62  ;;  %v1794_v9 = vld [vmem:[#allocation2 + $0x44] sm:$0x1]  ;;  %8869 = vst [vmem:[#allocation15_spill] sm:$0xff] %v7936_v23  ;;  %v7086_v38 = vld [vmem:[#allocation7 + $0x1a0] sm:$0xff]  ;;  %v7945_v44 = vpop.f32.mrf.mxu2  ;;  %v1138_v46 = vshrl.u32 %v960_v21, 16  ;;  %v1141_v52 = vshll.u32 %v960_v21, 16  ;;  %v1965_v10 = vor.u32 %v1964_v47, %v1960_v43 }
  0xe9   : > { %v959_v36 = vld [vmem:[#allocation2 + $0x44] sm:$0x1]  ;;  %v1944_v13 = vshll.u32 %v1794_v9, 16  ;;  %5148 = vmatmul.bf16.gmra.mxu3 %v6179_v50  ;;  %v961_v50 = vld [vmem:[#allocation2 + $0x4c] sm:$0xf]  ;;  %5390 = vmatpush.bf16.msra.mxu2 %v7086_v38 }
  0xea   : > { %v1458_v12 = vld [vmem:[#allocation2 + $0x44] sm:$0x1]  ;;  %v1133_v5 = vshll.u32 %v959_v36, 16  ;;  %v1140_v54 = vrot.slane %v1138_v46, 4  ;;  %v1147_v56 = vshll.u32 %v961_v50, 16  ;;  %v1966_v46 = vrot.slane %v1965_v10, 4 }
  0xeb   : > { %v1580_v14 = vrot.slane %v1458_v12, 5  ;;  %5059 = vmatmul.bf16.gmra.mxu2 %v6175_v57  ;;  %v1946_v16 = vrot.slane %v1944_v13, 5  ;;  %v1151_v57 = vshrl.u32 %v961_v50, 16  ;;  %v1459_v58 = vld [vmem:[#allocation2 + $0x48] sm:$0xe] }
  0xec   : > { %v1135_v24 = vrot.slane %v1133_v5, 5  ;;  %5232 = vmatmul.bf16.gmra.mxu0 %v6147_v0  ;;  %v6936_v2 = vld [vmem:[#allocation3 + $0x174] sm:$0xf]  ;;  %v6212_v61 = vld [vmem:[#allocation3 + $0x194] sm:$0xf0]  ;;  %v1143_v0 = vrot.slane %v1141_v52, 5 }
  0xed   : > { %v1581_v25 = vsel %vm7809_vm13, %v1579_v53, %v1580_v14  ;;  %4970 = vmatmul.bf16.gmra.mxu1 %v6171_v18  ;;  %v1947_v30 = vsel %vm7815_vm14, %v1942_v51, %v1946_v16  ;;  %v1956_v51 = vrot.slane %v1955_v35, 4  ;;  %v7947_v53 = vpop.f32.mrf.mxu1  ;;  %v1460_v18 = vld [vmem:[#allocation2 + $0x4c] sm:$0xf]  ;;  %v5978_v9 = vrot.slane %v1459_v58, 9  ;;  %v1728_v14 = vld [vmem:[#allocation2 + $0x54] sm:$0xf] }
  0xee   : > { %1695 = vst [vmem:[#allocation3 + $0x194] sm:$0xf] %v1581_v25  ;;  %v1136_v34 = vsel %vm7815_vm14, %v1131_v39, %v1135_v24  ;;  %v6210_v39 = vld [vmem:[#allocation3 + $0x170] sm:$0xf]  ;;  %v805_v62 = vld [vmem:[#allocation2 + $0x50] sm:$0x1]  ;;  %v1144_v24 = vor.u32 %v1143_v0, %v1140_v54 }
  0xef   : > { %2253 = vst [vmem:[#allocation3 + $0x154] sm:$0xf] %v1947_v30  ;;  %v806_v36 = vsel %vm7614_vm4, %v544_v41, %v805_v62  ;;  %v1961_v12 = vsel %vm7815_vm14, %v1956_v51, %v1960_v43  ;;  %v1149_v13 = vrot.slane %v1147_v56, 5  ;;  %v1153_v5 = vrot.slane %v1151_v57, 4  ;;  %v1729_v19 = vld [vmem:[#allocation2 + $0x58] sm:$0xf] }
  0xf0   : > { %1420 = vst [vmem:[#allocation3 + $0x190] sm:$0xf] %v1136_v34  ;;  %v1584_v25 = vrot.slane %v1460_v18, 5  ;;  %v6935_v28 = vld [vmem:[#allocation3 + $0x16c] sm:$0xf]  ;;  %v7955_v34 = vpop.f32.mrf.mxu3  ;;  %v1145_v37 = vrot.slane %v1144_v24, 4  ;;  %v6215_v43 = vor.u32 %v6936_v2, %v6212_v61  ;;  %v7963_v57 = vpop.f32.mrf.mxu2 }
  0xf1   : > { %807 = vst [vmem:[#allocation2 + $0x50] sm:$0x1] %v806_v36  ;;  %v376_v29 = vld [vmem:[#allocation2 + $0x5c] sm:$0x1]  ;;  %v1798_v27 = vld [vmem:[#allocation2 + $0x54] sm:$0xf]  ;;  %v1154_v21 = vor.u32 %v1153_v5, %v1149_v13 }
  0xf2   : > { %2254 = vst [vmem:[#allocation3 + $0x178] sm:$0xf] %v1961_v12  ;;  %v1585_v38 = vsel %vm7809_vm13, %v5978_v9, %v1584_v25  ;;  %v377_v47 = vsel %vm7609_vm3, 0, %v376_v29  ;;  %v1150_v50 = vsel %vm7815_vm14, %v1145_v37, %v1149_v13  ;;  %v1799_v52 = vld [vmem:[#allocation2 + $0x58] sm:$0xf]  ;;  %v1973_v51 = vshrl.u32 %v1798_v27, 16 }
  0xf3   : > { %8870 = vst [vmem:[#allocation16_spill] sm:$0xff] %v7955_v34  ;;  %v1976_v54 = vshll.u32 %v1798_v27, 16  ;;  %v1586_v58 = vrot.slane %v1584_v25, 4  ;;  %v1982_v62 = vshll.u32 %v1799_v52, 16  ;;  %v1155_v61 = vrot.slane %v1154_v21, 4  ;;  %v7078_v29 = vld [vmem:[#allocation7 + $0x160] sm:$0xff]  ;;  %v7968_v27 = vpop.f32.mrf.mxu0 }
  0xf4   : > { %1760 = vst [vmem:[#allocation3 + $0x1bc] sm:$0xf] %v1728_v14  ;;  %v1975_v10 = vrot.slane %v1973_v51, 4  ;;  %5301 = vmatpush.bf16.msra.mxu1 %v7078_v29  ;;  %v1462_v51 = vld [vmem:[#allocation2 + $0x54] sm:$0xe] }
  0xf5   : > { %v6940_v16 = vld [vmem:[#allocation3 + $0x190] sm:$0xf0]  ;;  %1696 = vst [vmem:[#allocation3 + $0x1b8] sm:$0xf] %v1585_v38  ;;  %v1978_v0 = vrot.slane %v1976_v54, 5  ;;  %v7965_v9 = vpop.f32.mrf.mxu1  ;;  %v1984_v24 = vrot.slane %v1982_v62, 5 }
  0xf6   : > { %v6932_v30 = vld [vmem:[#allocation3 + $0x150] sm:$0xf0]  ;;  %v6211_v35 = vor.u32 %v6940_v16, %v6210_v39  ;;  %1761 = vst [vmem:[#allocation3 + $0x1e0] sm:$0xf] %v1729_v19  ;;  %v1986_v39 = vshrl.u32 %v1799_v52, 16  ;;  %v561_v16 = vrot.slane %v7765_v55, 4 }
  0xf7   : > { %v6204_v41 = vld [vmem:[#allocation3 + $0x18c] sm:$0xf0]  ;;  %v6183_v56 = vor.u32 %v6932_v30, %v6182_v6  ;;  %1421 = vst [vmem:[#allocation3 + $0x1b4] sm:$0xf] %v1150_v50  ;;  %v1979_v19 = vor.u32 %v1978_v0, %v1975_v10  ;;  %v963_v6 = vld [vmem:[#allocation2 + $0x54] sm:$0xf] }
  0xf8   : > { %v6207_v2 = vor.u32 %v6935_v28, %v6204_v41  ;;  %378 = vst [vmem:[#allocation2 + $0x5c] sm:$0x1] %v377_v47  ;;  %v1797_v18 = vld [vmem:[#allocation2 + $0x50] sm:$0x1]  ;;  %v1988_v25 = vrot.slane %v1986_v39, 4  ;;  %v7094_v28 = vld [vmem:[#allocation7 + $0x1e0] sm:$0xff]  ;;  %v7974_v50 = vpop.f32.mrf.mxu3 }
  0xf9   : > { %5153 = vmatmul.bf16.gmra.mxu3 %v6215_v43  ;;  %v962_v36 = vld [vmem:[#allocation2 + $0x50] sm:$0x1]  ;;  %v1968_v13 = vshll.u32 %v1797_v18, 16  ;;  %v1980_v38 = vrot.slane %v1979_v19, 4  ;;  %v7102_v41 = vld [vmem:[#allocation7 + $0x220] sm:$0xff]  ;;  %v1162_v55 = vshrl.u32 %v963_v6, 16 }
  0xfa   : > { %v1461_v12 = vld [vmem:[#allocation2 + $0x50] sm:$0x1]  ;;  %v1157_v5 = vshll.u32 %v962_v36, 16  ;;  %5479 = vmatpush.bf16.msra.mxu3 %v7094_v28  ;;  %v1165_v43 = vshll.u32 %v963_v6, 16  ;;  %8871 = vst [vmem:[#allocation17_spill] sm:$0xff] %v7974_v50  ;;  %5568 = vmatpush.bf16.msra.mxu0 %v7102_v41  ;;  %v1989_v62 = vor.u32 %v1988_v25, %v1984_v24 }
  0xfb   : > { %5064 = vmatmul.bf16.gmra.mxu2 %v6211_v35  ;;  %v1587_v14 = vrot.slane %v1461_v12, 5  ;;  %v1970_v30 = vrot.slane %v1968_v13, 5  ;;  %v964_v35 = vld [vmem:[#allocation2 + $0x58] sm:$0xf]  ;;  %v1164_v39 = vrot.slane %v1162_v55, 4  ;;  %v7982_v12 = vpop.f32.mrf.mxu2  ;;  %v5979_v13 = vrot.slane %v1462_v51, 9 }
  0xfc   : > { %5237 = vmatmul.bf16.gmra.mxu0 %v6183_v56  ;;  %v1159_v37 = vrot.slane %v1157_v5, 5  ;;  %v1463_v54 = vld [vmem:[#allocation2 + $0x58] sm:$0xf]  ;;  %v6945_v10 = vld [vmem:[#allocation3 + $0x1bc] sm:$0xf]  ;;  %v1167_v18 = vrot.slane %v1165_v43, 5 }
  0xfd   : > { %4975 = vmatmul.bf16.gmra.mxu1 %v6207_v2  ;;  %v1588_v21 = vsel %vm7809_vm13, %v1586_v58, %v1587_v14  ;;  %v1971_v47 = vsel %vm7815_vm14, %v1966_v46, %v1970_v30  ;;  %v1985_v58 = vsel %vm7815_vm14, %v1980_v38, %v1984_v24  ;;  %v6246_v2 = vld [vmem:[#allocation3 + $0x1b8] sm:$0xf]  ;;  %v6248_v0 = vld [vmem:[#allocation3 + $0x1dc] sm:$0xf0]  ;;  %v1171_v36 = vshll.u32 %v964_v35, 16 }
  0xfe   : > { %1697 = vst [vmem:[#allocation3 + $0x1dc] sm:$0xf] %v1588_v21  ;;  %v1160_v52 = vsel %vm7815_vm14, %v1155_v61, %v1159_v37  ;;  %v1175_v61 = vshrl.u32 %v964_v35, 16  ;;  %v1591_v5 = vrot.slane %v1463_v54, 5  ;;  %v1730_v14 = vld [vmem:[#allocation2 + $0x60] sm:$0xf]  ;;  %v1168_v6 = vor.u32 %v1167_v18, %v1164_v39  ;;  %v7984_v37 = vpop.f32.mrf.mxu1 }
  0xff   : > { %2255 = vst [vmem:[#allocation3 + $0x19c] sm:$0xf] %v1971_v47  ;;  %v812_v56 = vld [vmem:[#allocation2 + $0x5c] sm:$0x1]  ;;  %v6218_v19 = vld [vmem:[#allocation3 + $0x178] sm:$0xf] }
 0x100   : > { %1422 = vst [vmem:[#allocation3 + $0x1d8] sm:$0xf] %v1160_v52  ;;  %v813_v46 = vsel %vm7614_vm4, %v561_v16, %v812_v56  ;;  %v1173_v24 = vrot.slane %v1171_v36, 5  ;;  %v1177_v25 = vrot.slane %v1175_v61, 4  ;;  %v1731_v28 = vld [vmem:[#allocation2 + $0x64] sm:$0xf]  ;;  %v1592_v16 = vsel %vm7809_vm13, %v5979_v13, %v1591_v5 }
 0x101   : > { %814 = vst [vmem:[#allocation2 + $0x5c] sm:$0x1] %v813_v46  ;;  %v6944_v29 = vld [vmem:[#allocation3 + $0x1b4] sm:$0xf]  ;;  %v1990_v30 = vrot.slane %v1989_v62, 4  ;;  %v1593_v21 = vrot.slane %v1591_v5, 4  ;;  %v6251_v52 = vor.u32 %v6945_v10, %v6248_v0 }
 0x102   : > { %2256 = vst [vmem:[#allocation3 + $0x1c0] sm:$0xf] %v1985_v58  ;;  %v379_v38 = vld [vmem:[#allocation2 + $0x68] sm:$0x1]  ;;  %v1169_v35 = vrot.slane %v1168_v6, 4  ;;  %v1178_v55 = vor.u32 %v1177_v25, %v1173_v24  ;;  %v7990_v58 = vpop.f32.mrf.mxu0 }
 0x103   : > { %1762 = vst [vmem:[#allocation3 + $0x204] sm:$0xf] %v1730_v14  ;;  %v380_v43 = vsel %vm7609_vm3, 0, %v379_v38  ;;  %v1801_v51 = vld [vmem:[#allocation2 + $0x60] sm:$0xf] }
 0x104   : > { %1698 = vst [vmem:[#allocation3 + $0x200] sm:$0xf] %v1592_v16  ;;  %v1802_v54 = vld [vmem:[#allocation2 + $0x64] sm:$0xf]  ;;  %v1174_v62 = vsel %vm7815_vm14, %v1169_v35, %v1173_v24  ;;  %v1179_v39 = vrot.slane %v1178_v55, 4  ;;  %v1997_v46 = vshrl.u32 %v1801_v51, 16  ;;  %v7997_v35 = vpop.f32.mrf.mxu2 }
 0x105   : > { %v6949_v41 = vld [vmem:[#allocation3 + $0x1d8] sm:$0xf0]  ;;  %1763 = vst [vmem:[#allocation3 + $0x228] sm:$0xf] %v1731_v28  ;;  %v2000_v61 = vshll.u32 %v1801_v51, 16  ;;  %v2006_v13 = vshll.u32 %v1802_v54, 16 }
 0x106   : > { %v6247_v47 = vor.u32 %v6949_v41, %v6246_v2  ;;  %v6941_v56 = vld [vmem:[#allocation3 + $0x198] sm:$0xf0]  ;;  %381 = vst [vmem:[#allocation2 + $0x68] sm:$0x1] %v380_v43  ;;  %v7994_v10 = vpop.f32.mrf.mxu3  ;;  %v1999_v24 = vrot.slane %v1997_v46, 4  ;;  %v578_v16 = vrot.slane %v7644_v33, 4 }
 0x107   : > { %v6219_v18 = vor.u32 %v6941_v56, %v6218_v19  ;;  %v6240_v36 = vld [vmem:[#allocation3 + $0x1d4] sm:$0xf0]  ;;  %1423 = vst [vmem:[#allocation3 + $0x1fc] sm:$0xf] %v1174_v62  ;;  %v2002_v38 = vrot.slane %v2000_v61, 5  ;;  %v2010_v19 = vshrl.u32 %v1802_v54, 16 }
 0x108   : > { %v6243_v5 = vor.u32 %v6944_v29, %v6240_v36  ;;  %v1800_v2 = vld [vmem:[#allocation2 + $0x5c] sm:$0x1]  ;;  %8872 = vst [vmem:[#allocation18_spill] sm:$0xff] %v7994_v10  ;;  %v966_v43 = vld [vmem:[#allocation2 + $0x60] sm:$0xf] }
 0x109   : > { %v965_v0 = vld [vmem:[#allocation2 + $0x5c] sm:$0x1]  ;;  %5158 = vmatmul.bf16.gmra.mxu3 %v6251_v52  ;;  %v1992_v6 = vshll.u32 %v1800_v2, 16  ;;  %v2008_v52 = vrot.slane %v2006_v13, 5  ;;  %v2012_v51 = vrot.slane %v2010_v19, 4  ;;  %v1186_v56 = vshrl.u32 %v966_v43, 16 }
 0x10a   : > { %v1464_v14 = vld [vmem:[#allocation2 + $0x5c] sm:$0x1]  ;;  %v1181_v25 = vshll.u32 %v965_v0, 16  ;;  %v1189_v36 = vshll.u32 %v966_v43, 16 }
 0x10b   : > { %5069 = vmatmul.bf16.gmra.mxu2 %v6247_v47  ;;  %v1594_v28 = vrot.slane %v1464_v14, 5  ;;  %v1994_v41 = vrot.slane %v1992_v6, 5  ;;  %v2003_v47 = vor.u32 %v2002_v38, %v1999_v24  ;;  %v6954_v13 = vld [vmem:[#allocation3 + $0x204] sm:$0xf]  ;;  %v6282_v6 = vld [vmem:[#allocation3 + $0x200] sm:$0xf] }
 0x10c   : > { %5242 = vmatmul.bf16.gmra.mxu0 %v6219_v18  ;;  %v1183_v29 = vrot.slane %v1181_v25, 5  ;;  %v8003_v62 = vpop.f32.mrf.mxu1  ;;  %v967_v18 = vld [vmem:[#allocation2 + $0x64] sm:$0xf]  ;;  %v1191_v2 = vrot.slane %v1189_v36, 5  ;;  %v6284_v25 = vld [vmem:[#allocation3 + $0x224] sm:$0xf0] }
 0x10d   : > { %v1595_v55 = vsel %vm7809_vm13, %v1593_v21, %v1594_v28  ;;  %4980 = vmatmul.bf16.gmra.mxu1 %v6243_v5  ;;  %v1995_v33 = vsel %vm7815_vm14, %v1990_v30, %v1994_v41  ;;  %v819_v46 = vld [vmem:[#allocation2 + $0x68] sm:$0x1]  ;;  %v2004_v61 = vrot.slane %v2003_v47, 4  ;;  %v1188_v5 = vrot.slane %v1186_v56, 4  ;;  %v8009_v30 = vpop.f32.mrf.mxu0  ;;  %v1465_v24 = vld [vmem:[#allocation2 + $0x60] sm:$0xe] }
 0x10e   : > { %1699 = vst [vmem:[#allocation3 + $0x224] sm:$0xf] %v1595_v55  ;;  %v1184_v54 = vsel %vm7815_vm14, %v1179_v39, %v1183_v29  ;;  %v820_v21 = vsel %vm7614_vm4, %v578_v16, %v819_v46  ;;  %v1195_v0 = vshll.u32 %v967_v18, 16  ;;  %v1199_v14 = vshrl.u32 %v967_v18, 16  ;;  %v1466_v41 = vld [vmem:[#allocation2 + $0x64] sm:$0xf]  ;;  %v8013_v55 = vpop.f32.mrf.mxu3 }
 0x10f   : > { %2257 = vst [vmem:[#allocation3 + $0x1e4] sm:$0xf] %v1995_v33  ;;  %v2009_v39 = vsel %vm7815_vm14, %v2004_v61, %v2008_v52  ;;  %v2013_v28 = vor.u32 %v2012_v51, %v2008_v52  ;;  %v1192_v38 = vor.u32 %v1191_v2, %v1188_v5  ;;  %v6254_v29 = vld [vmem:[#allocation3 + $0x1c0] sm:$0xf]  ;;  %v5980_v43 = vrot.slane %v1465_v24, 9 }
 0x110   : > { %1424 = vst [vmem:[#allocation3 + $0x220] sm:$0xf] %v1184_v54  ;;  %v1197_v16 = vrot.slane %v1195_v0, 5  ;;  %v1201_v19 = vrot.slane %v1199_v14, 4  ;;  %v1598_v47 = vrot.slane %v1466_v41, 5 }
 0x111   : > { %821 = vst [vmem:[#allocation2 + $0x68] sm:$0x1] %v820_v21  ;;  %v1732_v56 = vld [vmem:[#allocation2 + $0x6c] sm:$0xf]  ;;  %v1733_v33 = vld [vmem:[#allocation2 + $0x70] sm:$0xf]  ;;  %v6287_v21 = vor.u32 %v6954_v13, %v6284_v25 }
 0x112   : > { %2258 = vst [vmem:[#allocation3 + $0x208] sm:$0xf] %v2009_v39  ;;  %v6953_v54 = vld [vmem:[#allocation3 + $0x1fc] sm:$0xf]  ;;  %v1193_v18 = vrot.slane %v1192_v38, 4  ;;  %v1202_v36 = vor.u32 %v1201_v19, %v1197_v16  ;;  %v2014_v52 = vrot.slane %v2013_v28, 4  ;;  %v1599_v51 = vsel %vm7809_vm13, %v5980_v43, %v1598_v47 }
 0x113   : > { %8873 = vst [vmem:[#allocation19_spill] sm:$0xff] %v8013_v55  ;;  %v1600_v61 = vrot.slane %v1598_v47, 4  ;;  %v382_v5 = vld [vmem:[#allocation2 + $0x74] sm:$0x1]  ;;  %v1804_v25 = vld [vmem:[#allocation2 + $0x6c] sm:$0xf] }
 0x114   : > { %1764 = vst [vmem:[#allocation3 + $0x24c] sm:$0xf] %v1732_v56  ;;  %v1198_v39 = vsel %vm7815_vm14, %v1193_v18, %v1197_v16  ;;  %v1203_v24 = vrot.slane %v1202_v36, 4  ;;  %v383_v38 = vsel %vm7609_vm3, 0, %v382_v5  ;;  %v8023_v41 = vpop.f32.mrf.mxu1  ;;  %v7085_v55 = vld [vmem:[#allocation7 + $0x198] sm:$0xff]  ;;  %v2021_v18 = vshrl.u32 %v1804_v25, 16 }
 0x115   : > { %v6958_v46 = vld [vmem:[#allocation3 + $0x220] sm:$0xf0]  ;;  %1765 = vst [vmem:[#allocation3 + $0x270] sm:$0xf] %v1733_v33  ;;  %v8017_v14 = vpop.f32.mrf.mxu2  ;;  %v1805_v16 = vld [vmem:[#allocation2 + $0x70] sm:$0xf]  ;;  %5391 = vmatpush.bf16.msra.mxu2 %v7085_v55 }
 0x116   : > { %v6950_v2 = vld [vmem:[#allocation3 + $0x1e0] sm:$0xf0]  ;;  %v6283_v0 = vor.u32 %v6958_v46, %v6282_v6  ;;  %1700 = vst [vmem:[#allocation3 + $0x248] sm:$0xf] %v1599_v51  ;;  %v2024_v36 = vshll.u32 %v1804_v25, 16  ;;  %v8025_v51 = vpop.f32.mrf.mxu0  ;;  %v7093_v25 = vld [vmem:[#allocation7 + $0x1d8] sm:$0xff] }
 0x117   : > { %v6276_v13 = vld [vmem:[#allocation3 + $0x21c] sm:$0xf0]  ;;  %1425 = vst [vmem:[#allocation3 + $0x244] sm:$0xf] %v1198_v39  ;;  %v6255_v28 = vor.u32 %v6950_v2, %v6254_v29  ;;  %5480 = vmatpush.bf16.msra.mxu3 %v7093_v25  ;;  %v1469_v25 = vld [vmem:[#allocation2 + $0x70] sm:$0xf] }
 0x118   : > { %v1803_v19 = vld [vmem:[#allocation2 + $0x68] sm:$0x1]  ;;  %v6279_v6 = vor.u32 %v6953_v54, %v6276_v13  ;;  %384 = vst [vmem:[#allocation2 + $0x74] sm:$0x1] %v383_v38  ;;  %v2023_v54 = vrot.slane %v2021_v18, 4  ;;  %v2026_v39 = vrot.slane %v2024_v36, 5 }
 0x119   : > { %v968_v43 = vld [vmem:[#allocation2 + $0x68] sm:$0x1]  ;;  %v2016_v56 = vshll.u32 %v1803_v19, 16  ;;  %5163 = vmatmul.bf16.gmra.mxu3 %v6287_v21  ;;  %v2030_v13 = vshll.u32 %v1805_v16, 16  ;;  %v7077_v19 = vld [vmem:[#allocation7 + $0x158] sm:$0xff]  ;;  %v1605_v50 = vrot.slane %v1469_v25, 5 }
 0x11a   : > { %v1467_v47 = vld [vmem:[#allocation2 + $0x68] sm:$0x1]  ;;  %v1205_v33 = vshll.u32 %v968_v43, 16  ;;  %v595_v43 = vrot.slane %v7685_v40, 4  ;;  %5302 = vmatpush.bf16.msra.mxu1 %v7077_v19  ;;  %v1468_v18 = vld [vmem:[#allocation2 + $0x6c] sm:$0xe] }
 0x11b   : > { %v1601_v46 = vrot.slane %v1467_v47, 5  ;;  %5074 = vmatmul.bf16.gmra.mxu2 %v6283_v0  ;;  %v2018_v5 = vrot.slane %v2016_v56, 5  ;;  %v2034_v47 = vshrl.u32 %v1805_v16, 16  ;;  %v6963_v40 = vld [vmem:[#allocation3 + $0x24c] sm:$0xf]  ;;  %v5981_v19 = vrot.slane %v1468_v18, 9 }
 0x11c   : > { %v1207_v29 = vrot.slane %v1205_v33, 5  ;;  %5247 = vmatmul.bf16.gmra.mxu0 %v6255_v28  ;;  %v8031_v0 = vpop.f32.mrf.mxu3  ;;  %v2027_v28 = vor.u32 %v2026_v39, %v2023_v54  ;;  %v8039_v33 = vrot.slane %v2030_v13, 5  ;;  %v6290_v10 = vld [vmem:[#allocation3 + $0x208] sm:$0xf]  ;;  %v1735_v23 = vld [vmem:[#allocation2 + $0x7c] sm:$0xf] }
 0x11d   : > { %v1602_v2 = vsel %vm7809_vm13, %v1600_v61, %v1601_v46  ;;  %4985 = vmatmul.bf16.gmra.mxu1 %v6279_v6  ;;  %v2019_v21 = vsel %vm7815_vm14, %v2014_v52, %v2018_v5  ;;  %8874 = vst [vmem:[#allocation20_spill] sm:$0xff] %v8031_v0  ;;  %v8037_v61 = vpop.f32.mrf.mxu2  ;;  %v969_v52 = vld [vmem:[#allocation2 + $0x6c] sm:$0xf]  ;;  %v970_v6 = vld [vmem:[#allocation2 + $0x70] sm:$0xf] }
 0x11e   : > { %1701 = vst [vmem:[#allocation3 + $0x26c] sm:$0xf] %v1602_v2  ;;  %v1208_v38 = vsel %vm7815_vm14, %v1203_v24, %v1207_v29  ;;  %v2028_v56 = vrot.slane %v2027_v28, 4  ;;  %v1210_v24 = vshrl.u32 %v969_v52, 16  ;;  %v1213_v46 = vshll.u32 %v969_v52, 16  ;;  %v8046_v34 = vpop.f32.mrf.mxu0 }
 0x11f   : > { %2259 = vst [vmem:[#allocation3 + $0x22c] sm:$0xf] %v2019_v21  ;;  %v6318_v36 = vld [vmem:[#allocation3 + $0x248] sm:$0xf]  ;;  %v6320_v5 = vld [vmem:[#allocation3 + $0x26c] sm:$0xf0]  ;;  %v4951_v16 = vpop.f32.mrf.mxu1 }
 0x120   : > { %8875 = vst [vmem:[#allocation21_spill] sm:$0xff] %v8037_v61  ;;  %v826_v29 = vld [vmem:[#allocation2 + $0x74] sm:$0x1]  ;;  %v2036_v2 = vrot.slane %v2034_v47, 4  ;;  %v1219_v55 = vshll.u32 %v970_v6, 16  ;;  %v1223_v54 = vshrl.u32 %v970_v6, 16  ;;  %v2033_v13 = vsel %vm7815_vm14, %v2028_v56, %v8039_v33 }
 0x121   : > { %1426 = vst [vmem:[#allocation3 + $0x268] sm:$0xf] %v1208_v38  ;;  %v7101_v21 = vld [vmem:[#allocation7 + $0x218] sm:$0xff]  ;;  %v827_v39 = vsel %vm7614_vm4, %v595_v43, %v826_v29  ;;  %v1212_v38 = vrot.slane %v1210_v24, 4  ;;  %v1734_v28 = vld [vmem:[#allocation2 + $0x78] sm:$0xf]  ;;  %v4952_v56 = vadd.f32 %v4951_v16, %v7934_v11 }
 0x122   : > { %828 = vst [vmem:[#allocation2 + $0x74] sm:$0x1] %v827_v39  ;;  %5569 = vmatpush.bf16.msra.mxu0 %v7101_v21  ;;  %v1215_v0 = vrot.slane %v1213_v46, 5  ;;  %v1221_v47 = vrot.slane %v1219_v55, 5  ;;  %v1225_v6 = vrot.slane %v1223_v54, 4  ;;  %v6323_v21 = vor.u32 %v6963_v40, %v6320_v5 }
 0x123   : > { %2260 = vst [vmem:[#allocation3 + $0x250] sm:$0xf] %v2033_v13  ;;  %v6962_v18 = vld [vmem:[#allocation3 + $0x244] sm:$0xf]  ;;  %v1606_v55 = vsel %vm7809_vm13, %v5981_v19, %v1605_v50  ;;  %v2037_v54 = vor.u32 %v2036_v2, %v8039_v33  ;;  %v972_v33 = vld [vmem:[#allocation2 + $0x78] sm:$0xf] }
 0x124   : > { %v8048_v29 = vpop.f32.mrf.mxu3  ;;  %v1216_v24 = vor.u32 %v1215_v0, %v1212_v38  ;;  %1766 = vst [vmem:[#allocation3 + $0x294] sm:$0xf] %v1734_v28  ;;  %v1226_v61 = vor.u32 %v1225_v6, %v1221_v47  ;;  %v1607_v0 = vrot.slane %v1605_v50, 4  ;;  %v1807_v38 = vld [vmem:[#allocation2 + $0x78] sm:$0xf] }
 0x125   : > { %v6967_v52 = vld [vmem:[#allocation3 + $0x268] sm:$0xf0]  ;;  %8876 = vst [vmem:[#allocation22_spill] sm:$0xff] %v8048_v29  ;;  %v5040_v46 = vpop.f32.mrf.mxu2  ;;  %v385_v29 = vld [vmem:[#allocation2 + $0x80] sm:$0x1]  ;;  %v2048_v19 = vshll.u32 %v1807_v38, 16 }
 0x126   : > { %v6959_v43 = vld [vmem:[#allocation3 + $0x228] sm:$0xf0]  ;;  %v6319_v39 = vor.u32 %v6967_v52, %v6318_v36  ;;  %1767 = vst [vmem:[#allocation3 + $0x2b8] sm:$0xf] %v1735_v23  ;;  %v5041_v13 = vadd.f32 %v5040_v46, %v4952_v56  ;;  %v1217_v25 = vrot.slane %v1216_v24, 4  ;;  %v386_v16 = vsel %vm7609_vm3, 0, %v385_v29 }
 0x127   : > { %1702 = vst [vmem:[#allocation3 + $0x290] sm:$0xf] %v1606_v55  ;;  %v6291_v11 = vor.u32 %v6959_v43, %v6290_v10  ;;  %v1808_v36 = vld [vmem:[#allocation2 + $0x7c] sm:$0xf]  ;;  %v2045_v23 = vshrl.u32 %v1807_v38, 16  ;;  %v2038_v10 = vrot.slane %v2037_v54, 4  ;;  %v4953_v46 = vpop.f32.mrf.mxu1 }
 0x128   : > { %v6312_v26 = vld [vmem:[#allocation3 + $0x264] sm:$0xf0]  ;;  %v1222_v5 = vsel %vm7815_vm14, %v1217_v25, %v1221_v47  ;;  %387 = vst [vmem:[#allocation2 + $0x80] sm:$0x1] %v386_v16  ;;  %v1227_v52 = vrot.slane %v1226_v61, 4  ;;  %v2050_v56 = vrot.slane %v2048_v19, 5 }
 0x129   : > { %v6315_v40 = vor.u32 %v6962_v18, %v6312_v26  ;;  %5168 = vmatmul.bf16.gmra.mxu3 %v6323_v21  ;;  %v1806_v2 = vld [vmem:[#allocation2 + $0x74] sm:$0x1]  ;;  %1427 = vst [vmem:[#allocation3 + $0x28c] sm:$0xf] %v1222_v5  ;;  %v2047_v26 = vrot.slane %v2045_v23, 4  ;;  %v2054_v24 = vshll.u32 %v1808_v36, 16 }
 0x12a   : > { %v971_v28 = vld [vmem:[#allocation2 + $0x74] sm:$0x1]  ;;  %v2040_v50 = vshll.u32 %v1806_v2, 16  ;;  %v1234_v21 = vshrl.u32 %v972_v33, 16  ;;  %v973_v16 = vld [vmem:[#allocation2 + $0x7c] sm:$0xf] }
 0x12b   : > { %5079 = vmatmul.bf16.gmra.mxu2 %v6319_v39  ;;  %v1229_v6 = vshll.u32 %v971_v28, 16  ;;  %v1470_v43 = vld [vmem:[#allocation2 + $0x74] sm:$0x1]  ;;  %v2058_v39 = vshrl.u32 %v1808_v36, 16  ;;  %v2051_v61 = vor.u32 %v2050_v56, %v2047_v26  ;;  %v1471_v38 = vld [vmem:[#allocation2 + $0x78] sm:$0xe] }
 0x12c   : > { %5252 = vmatmul.bf16.gmra.mxu0 %v6291_v11  ;;  %v1608_v29 = vrot.slane %v1470_v43, 5  ;;  %v2042_v47 = vrot.slane %v2040_v50, 5  ;;  %v5129_v18 = vpop.f32.mrf.mxu3  ;;  %v8062_v11 = vpop.f32.mrf.mxu0  ;;  %v2056_v36 = vrot.slane %v2054_v24, 5  ;;  %v1472_v19 = vld [vmem:[#allocation2 + $0x7c] sm:$0xf]  ;;  %v8877_v43 = vrot.slane %v7732_v32, 4 }
 0x12d   : > { %4990 = vmatmul.bf16.gmra.mxu1 %v6315_v40  ;;  %v1231_v55 = vrot.slane %v1229_v6, 5  ;;  %v8058_v25 = vadd.f32 %v5129_v18, %v5041_v13  ;;  %v5042_v40 = vpop.f32.mrf.mxu2  ;;  %v4954_v13 = vadd.f32 %v4953_v46, %v7953_v20  ;;  %v2060_v28 = vrot.slane %v2058_v39, 4  ;;  %v6972_v50 = vld [vmem:[#allocation3 + $0x294] sm:$0xf]  ;;  %v6356_v6 = vld [vmem:[#allocation3 + $0x2b4] sm:$0xf0] }
 0x12e   : > { %v1609_v54 = vsel %vm7809_vm13, %v1607_v0, %v1608_v29  ;;  %v2043_v5 = vsel %vm7815_vm14, %v2038_v10, %v2042_v47  ;;  %v2052_v0 = vrot.slane %v2051_v61, 4  ;;  %v1236_v29 = vrot.slane %v1234_v21, 4  ;;  %v1736_v47 = vld [vmem:[#allocation2 + $0x84] sm:$0xf]  ;;  %v6326_v18 = vld [vmem:[#allocation3 + $0x250] sm:$0xf] }
 0x12f   : > { %v1232_v23 = vsel %vm7815_vm14, %v1227_v52, %v1231_v55  ;;  %1703 = vst [vmem:[#allocation3 + $0x2b4] sm:$0xf] %v1609_v54  ;;  %v833_v2 = vld [vmem:[#allocation2 + $0x80] sm:$0x1]  ;;  %v1237_v26 = vshll.u32 %v972_v33, 16  ;;  %v5043_v52 = vadd.f32 %v5042_v40, %v4954_v13  ;;  %v1243_v24 = vshll.u32 %v973_v16, 16 }
 0x130   : > { %2261 = vst [vmem:[#allocation3 + $0x274] sm:$0xf] %v2043_v5  ;;  %v834_v10 = vsel %vm7614_vm4, %v8877_v43, %v833_v2  ;;  %v2057_v56 = vsel %vm7815_vm14, %v2052_v0, %v2056_v36  ;;  %v1247_v20 = vshrl.u32 %v973_v16, 16  ;;  %v5982_v55 = vrot.slane %v1471_v38, 9  ;;  %v6354_v54 = vld [vmem:[#allocation3 + $0x290] sm:$0xf] }
 0x131   : > { %1428 = vst [vmem:[#allocation3 + $0x2b0] sm:$0xf] %v1232_v23  ;;  %v1239_v46 = vrot.slane %v1237_v26, 5  ;;  %v1612_v39 = vrot.slane %v1472_v19, 5  ;;  %v2061_v32 = vor.u32 %v2060_v28, %v2056_v36  ;;  %v1245_v61 = vrot.slane %v1243_v24, 5 }
 0x132   : > { %835 = vst [vmem:[#allocation2 + $0x80] sm:$0x1] %v834_v10  ;;  %v1249_v5 = vrot.slane %v1247_v20, 4  ;;  %v1737_v23 = vld [vmem:[#allocation2 + $0x88] sm:$0xf]  ;;  %v6359_v43 = vor.u32 %v6972_v50, %v6356_v6  ;;  %v629_v36 = vrot.slane %v7774_v15, 4 }
 0x133   : > { %2262 = vst [vmem:[#allocation3 + $0x298] sm:$0xf] %v2057_v56  ;;  %v6971_v33 = vld [vmem:[#allocation3 + $0x28c] sm:$0xf]  ;;  %v1240_v40 = vor.u32 %v1239_v46, %v1236_v29  ;;  %v1613_v13 = vsel %vm7809_vm13, %v5982_v55, %v1612_v39  ;;  %v388_v2 = vld [vmem:[#allocation2 + $0x8c] sm:$0x1] }
 0x134   : > { %v5131_v21 = vpop.f32.mrf.mxu3  ;;  %1768 = vst [vmem:[#allocation3 + $0x2dc] sm:$0xf] %v1736_v47  ;;  %v1250_v10 = vor.u32 %v1249_v5, %v1245_v61  ;;  %v389_v38 = vsel %vm7609_vm3, 0, %v388_v2  ;;  %v2062_v24 = vrot.slane %v2061_v32, 4  ;;  %v1614_v20 = vrot.slane %v1612_v39, 4 }
 0x135   : > { %v8077_v16 = vadd.f32 %v5131_v21, %v5043_v52  ;;  %1704 = vst [vmem:[#allocation3 + $0x2d8] sm:$0xf] %v1613_v13  ;;  %v1241_v26 = vrot.slane %v1240_v40, 4  ;;  %v1811_v40 = vld [vmem:[#allocation2 + $0x88] sm:$0xf] }
 0x136   : > { %v6976_v0 = vld [vmem:[#allocation3 + $0x2b0] sm:$0xf0]  ;;  %1769 = vst [vmem:[#allocation3 + $0x300] sm:$0xf] %v1737_v23 }
 0x137   : > { %v6968_v19 = vld [vmem:[#allocation3 + $0x270] sm:$0xf0]  ;;  %v6355_v28 = vor.u32 %v6976_v0, %v6354_v54  ;;  %390 = vst [vmem:[#allocation2 + $0x8c] sm:$0x1] %v389_v38  ;;  %v1246_v6 = vsel %vm7815_vm14, %v1241_v26, %v1245_v61  ;;  %v1251_v54 = vrot.slane %v1250_v10, 4 }
 0x138   : > { %v6327_v29 = vor.u32 %v6968_v19, %v6326_v18  ;;  %v6348_v56 = vld [vmem:[#allocation3 + $0x2ac] sm:$0xf0]  ;;  %1429 = vst [vmem:[#allocation3 + $0x2d4] sm:$0xf] %v1246_v6  ;;  %v2082_v19 = vshrl.u32 %v1811_v40, 16 }
 0x139   : > { %v5218_v52 = vpop.f32.mrf.mxu0  ;;  %v6351_v47 = vor.u32 %v6971_v33, %v6348_v56  ;;  %v1809_v46 = vld [vmem:[#allocation2 + $0x80] sm:$0x1]  ;;  %5173 = vmatmul.bf16.gmra.mxu3 %v6359_v43  ;;  %v7084_v23 = vld [vmem:[#allocation7 + $0x190] sm:$0xff]  ;;  %v1810_v33 = vld [vmem:[#allocation2 + $0x84] sm:$0xf] }
 0x13a   : > { %v974_v50 = vld [vmem:[#allocation2 + $0x80] sm:$0x1]  ;;  %v4956_v5 = vpop.f32.mrf.mxu1  ;;  %v2064_v15 = vshll.u32 %v1809_v46, 16  ;;  %v8085_v18 = vadd.f32 %v5218_v52, %v8058_v25  ;;  %v2069_v2 = vshrl.u32 %v1810_v33, 16  ;;  %v2072_v0 = vshll.u32 %v1810_v33, 16  ;;  %5392 = vmatpush.bf16.msra.mxu2 %v7084_v23 }
 0x13b   : > { %v1473_v55 = vld [vmem:[#allocation2 + $0x80] sm:$0x1]  ;;  %5084 = vmatmul.bf16.gmra.mxu2 %v6355_v28  ;;  %v1253_v21 = vshll.u32 %v974_v50, 16  ;;  %v4957_v39 = vadd.f32 %v4956_v5, %v7968_v27  ;;  %v2078_v25 = vshll.u32 %v1811_v40, 16  ;;  %v7092_v28 = vld [vmem:[#allocation7 + $0x1d0] sm:$0xff]  ;;  %v2084_v5 = vrot.slane %v2082_v19, 4 }
 0x13c   : > { %v1615_v32 = vrot.slane %v1473_v55, 5  ;;  %5257 = vmatmul.bf16.gmra.mxu0 %v6327_v29  ;;  %v2066_v13 = vrot.slane %v2064_v15, 5  ;;  %v5134_v38 = vpop.f32.mrf.mxu3  ;;  %v7076_v27 = vld [vmem:[#allocation7 + $0x150] sm:$0xff]  ;;  %v8094_v52 = vld [vmem:[#allocation3 + $0x2dc] sm:$0xf]  ;;  %v2071_v46 = vrot.slane %v2069_v2, 4  ;;  %5481 = vmatpush.bf16.msra.mxu3 %v7092_v28 }
 0x13d   : > { %v1255_v61 = vrot.slane %v1253_v21, 5  ;;  %4995 = vmatmul.bf16.gmra.mxu1 %v6351_v47  ;;  %v8096_v47 = vld [vmem:[#allocation3 + $0x2fc] sm:$0xf0]  ;;  %v2074_v50 = vrot.slane %v2072_v0, 5  ;;  %v2080_v6 = vrot.slane %v2078_v25, 5 }
 0x13e   : > { %v5045_v43 = vpop.f32.mrf.mxu2  ;;  %v1616_v10 = vsel %vm7809_vm13, %v1614_v20, %v1615_v32  ;;  %v2067_v26 = vsel %vm7815_vm14, %v2062_v24, %v2066_v13  ;;  %v840_v20 = vld [vmem:[#allocation2 + $0x8c] sm:$0x1]  ;;  %5303 = vmatpush.bf16.msra.mxu1 %v7076_v27  ;;  %v975_v15 = vld [vmem:[#allocation2 + $0x84] sm:$0xf]  ;;  %v6390_v21 = vld [vmem:[#allocation3 + $0x2d8] sm:$0xf] }
 0x13f   : > { %v5046_v56 = vadd.f32 %v5045_v43, %v4957_v39  ;;  %v1256_v29 = vsel %vm7815_vm14, %v1251_v54, %v1255_v61  ;;  %1705 = vst [vmem:[#allocation3 + $0x2fc] sm:$0xf] %v1616_v10  ;;  %v841_v24 = vsel %vm7614_vm4, %v629_v36, %v840_v20  ;;  %v2075_v39 = vor.u32 %v2074_v50, %v2071_v46  ;;  %v7100_v32 = vld [vmem:[#allocation7 + $0x210] sm:$0xff]  ;;  %v8102_v33 = vld [vmem:[#allocation3 + $0x298] sm:$0xf] }
 0x140   : > { %2263 = vst [vmem:[#allocation3 + $0x2bc] sm:$0xf] %v2067_v26  ;;  %v1258_v23 = vshrl.u32 %v975_v15, 16  ;;  %v2085_v13 = vor.u32 %v2084_v5, %v2080_v6  ;;  %v976_v61 = vld [vmem:[#allocation2 + $0x88] sm:$0xf]  ;;  %v1261_v2 = vshll.u32 %v975_v15, 16  ;;  %v6395_v36 = vor.u32 %v8094_v52, %v8096_v47  ;;  %5570 = vmatpush.bf16.msra.mxu0 %v7100_v32 }
 0x141   : > { %v8098_v55 = vadd.f32 %v5134_v38, %v5046_v56  ;;  %1430 = vst [vmem:[#allocation3 + $0x2f8] sm:$0xf] %v1256_v29  ;;  %v5220_v54 = vpop.f32.mrf.mxu0  ;;  %v1474_v0 = vld [vmem:[#allocation2 + $0x84] sm:$0xe]  ;;  %v2076_v38 = vrot.slane %v2075_v39, 4  ;;  %v1267_v25 = vshll.u32 %v976_v61, 16 }
 0x142   : > { %842 = vst [vmem:[#allocation2 + $0x8c] sm:$0x1] %v841_v24  ;;  %v4958_v40 = vpop.f32.mrf.mxu1  ;;  %v8105_v43 = vadd.f32 %v5220_v54, %v8077_v16  ;;  %v1260_v10 = vrot.slane %v1258_v23, 4  ;;  %v1475_v19 = vld [vmem:[#allocation2 + $0x88] sm:$0xf]  ;;  %v1263_v26 = vrot.slane %v1261_v2, 5 }
 0x143   : > { %v4959_v28 = vadd.f32 %v4958_v40, %v7990_v58  ;;  %v6980_v27 = vld [vmem:[#allocation3 + $0x2d4] sm:$0xf]  ;;  %v1271_v56 = vshrl.u32 %v976_v61, 16  ;;  %v5983_v29 = vrot.slane %v1474_v0, 9  ;;  %v1738_v46 = vld [vmem:[#allocation2 + $0x90] sm:$0xf]  ;;  %v2081_v16 = vsel %vm7815_vm14, %v2076_v38, %v2080_v6 }
 0x144   : > { %v5136_v50 = vpop.f32.mrf.mxu3  ;;  %v2086_v5 = vrot.slane %v2085_v13, 4  ;;  %v1269_v52 = vrot.slane %v1267_v25, 5  ;;  %v1619_v47 = vrot.slane %v1475_v19, 5  ;;  %2264 = vst [vmem:[#allocation3 + $0x2e0] sm:$0xf] %v2081_v16  ;;  %v1264_v32 = vor.u32 %v1263_v26, %v1260_v10 }
 0x145   : > { %v1273_v58 = vrot.slane %v1271_v56, 4  ;;  %v1739_v2 = vld [vmem:[#allocation2 + $0x94] sm:$0xf]  ;;  %1770 = vst [vmem:[#allocation3 + $0x324] sm:$0xf] %v1738_v46 }
 0x146   : > { %v5047_v20 = vpop.f32.mrf.mxu2  ;;  %v6985_v24 = vld [vmem:[#allocation3 + $0x2f8] sm:$0xf0]  ;;  %v1620_v61 = vsel %vm7809_vm13, %v5983_v29, %v1619_v47  ;;  %v1265_v38 = vrot.slane %v1264_v32, 4  ;;  %v1621_v19 = vrot.slane %v1619_v47, 4  ;;  %1771 = vst [vmem:[#allocation3 + $0x348] sm:$0xf] %v1739_v2 }
 0x147   : > { %v6977_v15 = vld [vmem:[#allocation3 + $0x2b8] sm:$0xf0]  ;;  %v5048_v54 = vadd.f32 %v5047_v20, %v4959_v28  ;;  %v6391_v39 = vor.u32 %v6985_v24, %v6390_v21  ;;  %v1274_v25 = vor.u32 %v1273_v58, %v1269_v52  ;;  %1706 = vst [vmem:[#allocation3 + $0x320] sm:$0xf] %v1620_v61 }
 0x148   : > { %v6363_v23 = vor.u32 %v6977_v15, %v8102_v33  ;;  %v6384_v40 = vld [vmem:[#allocation3 + $0x2f4] sm:$0xf0]  ;;  %v1270_v56 = vsel %vm7815_vm14, %v1265_v38, %v1269_v52 }
 0x149   : > { %v8115_v0 = vadd.f32 %v5136_v50, %v5048_v54  ;;  %v1812_v6 = vld [vmem:[#allocation2 + $0x8c] sm:$0x1]  ;;  %v5223_v28 = vpop.f32.mrf.mxu0  ;;  %v6387_v21 = vor.u32 %v6980_v27, %v6384_v40  ;;  %5178 = vmatmul.bf16.gmra.mxu3 %v6395_v36  ;;  %v1275_v29 = vrot.slane %v1274_v25, 4  ;;  %v391_v50 = vld [vmem:[#allocation2 + $0x98] sm:$0x1] }
 0x14a   : > { %v977_v13 = vld [vmem:[#allocation2 + $0x8c] sm:$0x1]  ;;  %v2088_v20 = vshll.u32 %v1812_v6, 16  ;;  %v4961_v33 = vpop.f32.mrf.mxu1  ;;  %v8120_v24 = vadd.f32 %v5223_v28, %v8098_v55  ;;  %1431 = vst [vmem:[#allocation3 + $0x31c] sm:$0xf] %v1270_v56  ;;  %v392_v15 = vsel %vm7609_vm3, 0, %v391_v50 }
 0x14b   : > { %v1277_v10 = vshll.u32 %v977_v13, 16  ;;  %v1476_v26 = vld [vmem:[#allocation2 + $0x8c] sm:$0x1]  ;;  %5089 = vmatmul.bf16.gmra.mxu2 %v6391_v39  ;;  %v4962_v16 = vadd.f32 %v4961_v33, %v8009_v30  ;;  %393 = vst [vmem:[#allocation2 + $0x98] sm:$0x1] %v392_v15 }
 0x14c   : > { %v1622_v46 = vrot.slane %v1476_v26, 5  ;;  %v2090_v27 = vrot.slane %v2088_v20, 5  ;;  %5262 = vmatmul.bf16.gmra.mxu0 %v6363_v23  ;;  %v1813_v52 = vld [vmem:[#allocation2 + $0x90] sm:$0xf]  ;;  %v1814_v54 = vld [vmem:[#allocation2 + $0x94] sm:$0xf]  ;;  %v5139_v32 = vpop.f32.mrf.mxu3 }
 0x14d   : > { %v1279_v47 = vrot.slane %v1277_v10, 5  ;;  %5000 = vmatmul.bf16.gmra.mxu1 %v6387_v21  ;;  %v2093_v58 = vshrl.u32 %v1813_v52, 16  ;;  %v2096_v40 = vshll.u32 %v1813_v52, 16  ;;  %v646_v23 = vrot.slane %v7652_v48, 4  ;;  %v978_v25 = vld [vmem:[#allocation2 + $0x90] sm:$0xf] }
 0x14e   : > { %v1623_v36 = vsel %vm7809_vm13, %v1621_v19, %v1622_v46  ;;  %v2091_v55 = vsel %vm7815_vm14, %v2086_v5, %v2090_v27  ;;  %v5050_v39 = vpop.f32.mrf.mxu2  ;;  %v2102_v2 = vshll.u32 %v1814_v54, 16  ;;  %v2106_v6 = vshrl.u32 %v1814_v54, 16  ;;  %v6990_v5 = vld [vmem:[#allocation3 + $0x324] sm:$0xf]  ;;  %v979_v20 = vld [vmem:[#allocation2 + $0x94] sm:$0xf] }
 0x14f   : > { %v1280_v30 = vsel %vm7815_vm14, %v1275_v29, %v1279_v47  ;;  %1707 = vst [vmem:[#allocation3 + $0x344] sm:$0xf] %v1623_v36  ;;  %v5051_v61 = vadd.f32 %v5050_v39, %v4962_v16  ;;  %v2095_v13 = vrot.slane %v2093_v58, 4  ;;  %v2098_v38 = vrot.slane %v2096_v40, 5  ;;  %v6426_v26 = vld [vmem:[#allocation3 + $0x320] sm:$0xf] }
 0x150   : > { %2265 = vst [vmem:[#allocation3 + $0x304] sm:$0xf] %v2091_v55  ;;  %v2104_v28 = vrot.slane %v2102_v2, 5  ;;  %v2108_v21 = vrot.slane %v2106_v6, 4  ;;  %v1282_v56 = vshrl.u32 %v978_v25, 16  ;;  %v1285_v29 = vshll.u32 %v978_v25, 16 }
 0x151   : > { %1432 = vst [vmem:[#allocation3 + $0x340] sm:$0xf] %v1280_v30  ;;  %v8132_v19 = vadd.f32 %v5139_v32, %v5051_v61  ;;  %v5225_v10 = vpop.f32.mrf.mxu0  ;;  %v2099_v33 = vor.u32 %v2098_v38, %v2095_v13  ;;  %v1291_v48 = vshll.u32 %v979_v20, 16  ;;  %v6428_v50 = vld [vmem:[#allocation3 + $0x344] sm:$0xf0]  ;;  %v1295_v27 = vshrl.u32 %v979_v20, 16 }
 0x152   : > { %v4963_v46 = vpop.f32.mrf.mxu1  ;;  %v2109_v16 = vor.u32 %v2108_v21, %v2104_v28  ;;  %v1477_v47 = vld [vmem:[#allocation2 + $0x90] sm:$0xe]  ;;  %v8135_v15 = vadd.f32 %v5225_v10, %v8115_v0  ;;  %v6398_v36 = vld [vmem:[#allocation3 + $0x2e0] sm:$0xf]  ;;  %v6989_v54 = vld [vmem:[#allocation3 + $0x31c] sm:$0xf]  ;;  %v6431_v25 = vor.u32 %v6990_v5, %v6428_v50 }
 0x153   : > { %v4964_v52 = vadd.f32 %v4963_v46, %v8025_v51  ;;  %v847_v55 = vld [vmem:[#allocation2 + $0x98] sm:$0x1]  ;;  %v2100_v39 = vrot.slane %v2099_v33, 4  ;;  %v1284_v32 = vrot.slane %v1282_v56, 4  ;;  %v1287_v30 = vrot.slane %v1285_v29, 5 }
 0x154   : > { %8878 = vst [vmem:[#allocation23_spill] sm:$0xff] %v8135_v15  ;;  %v848_v40 = vsel %vm7614_vm4, %v646_v23, %v847_v55  ;;  %v8140_v61 = vrot.slane %v2109_v16, 4  ;;  %v1293_v2 = vrot.slane %v1291_v48, 5  ;;  %v1297_v6 = vrot.slane %v1295_v27, 4  ;;  %v5141_v0 = vpop.f32.mrf.mxu3  ;;  %v1478_v20 = vld [vmem:[#allocation2 + $0x94] sm:$0xf] }
 0x155   : > { %849 = vst [vmem:[#allocation2 + $0x98] sm:$0x1] %v848_v40  ;;  %v2105_v51 = vsel %vm7815_vm14, %v2100_v39, %v2104_v28  ;;  %v1288_v21 = vor.u32 %v1287_v30, %v1284_v32  ;;  %v5984_v23 = vrot.slane %v1477_v47, 9  ;;  %v1626_v16 = vrot.slane %v1478_v20, 5  ;;  %v1740_v48 = vld [vmem:[#allocation2 + $0x9c] sm:$0xf] }
 0x156   : > { %v6994_v58 = vld [vmem:[#allocation3 + $0x340] sm:$0xf0]  ;;  %v5052_v38 = vpop.f32.mrf.mxu2  ;;  %2266 = vst [vmem:[#allocation3 + $0x328] sm:$0xf] %v2105_v51  ;;  %v1298_v29 = vor.u32 %v1297_v6, %v1293_v2  ;;  %v1741_v27 = vld [vmem:[#allocation2 + $0xa0] sm:$0xf] }
 0x157   : > { %v6986_v13 = vld [vmem:[#allocation3 + $0x300] sm:$0xf0]  ;;  %v5053_v10 = vadd.f32 %v5052_v38, %v4964_v52  ;;  %v6427_v56 = vor.u32 %v6994_v58, %v6426_v26  ;;  %v1289_v46 = vrot.slane %v1288_v21, 4  ;;  %1772 = vst [vmem:[#allocation3 + $0x36c] sm:$0xf] %v1740_v48  ;;  %v1627_v26 = vsel %vm7809_vm13, %v5984_v23, %v1626_v16  ;;  %v7083_v32 = vld [vmem:[#allocation7 + $0x188] sm:$0xff] }
 0x158   : > { %v6420_v33 = vld [vmem:[#allocation3 + $0x33c] sm:$0xf0]  ;;  %v6399_v55 = vor.u32 %v6986_v13, %v6398_v36  ;;  %v8146_v50 = vrot.slane %v1298_v29, 4  ;;  %v394_v28 = vld [vmem:[#allocation2 + $0xa4] sm:$0x1]  ;;  %v1628_v47 = vrot.slane %v1626_v16, 4  ;;  %5393 = vmatpush.bf16.msra.mxu2 %v7083_v32 }
 0x159   : > { %v8144_v15 = vadd.f32 %v5141_v0, %v5053_v10  ;;  %v6423_v5 = vor.u32 %v6989_v54, %v6420_v33  ;;  %v5228_v39 = vpop.f32.mrf.mxu0  ;;  %v1294_v52 = vsel %vm7815_vm14, %v1289_v46, %v1293_v2  ;;  %1773 = vst [vmem:[#allocation3 + $0x390] sm:$0xf] %v1741_v27  ;;  %v395_v36 = vsel %vm7609_vm3, 0, %v394_v28  ;;  %5183 = vmatmul.bf16.gmra.mxu3 %v6431_v25  ;;  %v1816_v54 = vld [vmem:[#allocation2 + $0x9c] sm:$0xf] }
 0x15a   : > { %v4966_v30 = vpop.f32.mrf.mxu1  ;;  %1433 = vst [vmem:[#allocation3 + $0x364] sm:$0xf] %v1294_v52  ;;  %v1817_v58 = vld [vmem:[#allocation2 + $0xa0] sm:$0xf]  ;;  %v8155_v40 = vadd.f32 %v5228_v39, %v8132_v19  ;;  %v2117_v6 = vshrl.u32 %v1816_v54, 16  ;;  %v2120_v13 = vshll.u32 %v1816_v54, 16 }
 0x15b   : > { %5094 = vmatmul.bf16.gmra.mxu2 %v6427_v56  ;;  %v4967_v2 = vadd.f32 %v4966_v30, %v8046_v34  ;;  %1708 = vst [vmem:[#allocation3 + $0x368] sm:$0xf] %v1627_v26  ;;  %v2126_v38 = vshll.u32 %v1817_v58, 16  ;;  %v7091_v34 = vld [vmem:[#allocation7 + $0x1c8] sm:$0xff]  ;;  %v2130_v27 = vshrl.u32 %v1817_v58, 16  ;;  %v663_v28 = vrot.slane %v7700_v17, 4 }
 0x15c   : > { %5267 = vmatmul.bf16.gmra.mxu0 %v6399_v55  ;;  %v1815_v0 = vld [vmem:[#allocation2 + $0x98] sm:$0x1]  ;;  %v5144_v10 = vpop.f32.mrf.mxu3  ;;  %v2119_v29 = vrot.slane %v2117_v6, 4  ;;  %396 = vst [vmem:[#allocation2 + $0xa4] sm:$0x1] %v395_v36  ;;  %v2122_v23 = vrot.slane %v2120_v13, 5  ;;  %5482 = vmatpush.bf16.msra.mxu3 %v7091_v34 }
 0x15d   : > { %v980_v51 = vld [vmem:[#allocation2 + $0x98] sm:$0x1]  ;;  %5005 = vmatmul.bf16.gmra.mxu1 %v6423_v5  ;;  %v2112_v20 = vshll.u32 %v1815_v0, 16  ;;  %v7075_v55 = vld [vmem:[#allocation7 + $0x148] sm:$0xff]  ;;  %v981_v54 = vld [vmem:[#allocation2 + $0x9c] sm:$0xf] }
 0x15e   : > { %v1479_v21 = vld [vmem:[#allocation2 + $0x98] sm:$0x1]  ;;  %v5055_v25 = vpop.f32.mrf.mxu2  ;;  %v1301_v33 = vshll.u32 %v980_v51, 16  ;;  %v2123_v39 = vor.u32 %v2122_v23, %v2119_v29  ;;  %v6999_v36 = vld [vmem:[#allocation3 + $0x36c] sm:$0xf]  ;;  %5304 = vmatpush.bf16.msra.mxu1 %v7075_v55  ;;  %v1306_v6 = vshrl.u32 %v981_v54, 16 }
 0x15f   : > { %v1629_v56 = vrot.slane %v1479_v21, 5  ;;  %v5056_v19 = vadd.f32 %v5055_v25, %v4967_v2  ;;  %v2114_v46 = vrot.slane %v2112_v20, 5  ;;  %v7099_v30 = vld [vmem:[#allocation7 + $0x208] sm:$0xff] }
 0x160   : > { %v1303_v16 = vrot.slane %v1301_v33, 5  ;;  %v6464_v58 = vld [vmem:[#allocation3 + $0x38c] sm:$0xf0]  ;;  %v2124_v2 = vrot.slane %v2123_v39, 4  ;;  %5571 = vmatpush.bf16.msra.mxu0 %v7099_v30  ;;  %v982_v51 = vld [vmem:[#allocation2 + $0xa0] sm:$0xf] }
 0x161   : > { %v1630_v48 = vsel %vm7809_vm13, %v1628_v47, %v1629_v56  ;;  %v8161_v5 = vadd.f32 %v5144_v10, %v5056_v19  ;;  %v5230_v52 = vpop.f32.mrf.mxu0  ;;  %v2115_v26 = vsel %vm7815_vm14, %v8140_v61, %v2114_v46  ;;  %v2128_v47 = vrot.slane %v2126_v38, 5  ;;  %v1480_v10 = vld [vmem:[#allocation2 + $0x9c] sm:$0xe]  ;;  %v6434_v33 = vld [vmem:[#allocation3 + $0x328] sm:$0xf] }
 0x162   : > { %1709 = vst [vmem:[#allocation3 + $0x38c] sm:$0xf] %v1630_v48  ;;  %v1304_v32 = vsel %vm7815_vm14, %v8146_v50, %v1303_v16  ;;  %v4968_v17 = vpop.f32.mrf.mxu1  ;;  %v8170_v13 = vadd.f32 %v5230_v52, %v8144_v15  ;;  %v2132_v61 = vrot.slane %v2130_v27, 4  ;;  %v1309_v50 = vshll.u32 %v981_v54, 16  ;;  %v6462_v21 = vld [vmem:[#allocation3 + $0x368] sm:$0xf] }
 0x163   : > { %2267 = vst [vmem:[#allocation3 + $0x34c] sm:$0xf] %v2115_v26  ;;  %v4969_v0 = vadd.f32 %v4968_v17, %v8062_v11  ;;  %v2129_v38 = vsel %vm7815_vm14, %v2124_v2, %v2128_v47  ;;  %v1308_v20 = vrot.slane %v1306_v6, 4  ;;  %v1315_v25 = vshll.u32 %v982_v51, 16  ;;  %v854_v15 = vld [vmem:[#allocation2 + $0xa4] sm:$0x1] }
 0x164   : > { %1434 = vst [vmem:[#allocation3 + $0x388] sm:$0xf] %v1304_v32  ;;  %v5146_v29 = vpop.f32.mrf.mxu3  ;;  %v6467_v19 = vor.u32 %v6999_v36, %v6464_v58  ;;  %v1311_v23 = vrot.slane %v1309_v50, 5  ;;  %v1319_v11 = vshrl.u32 %v982_v51, 16  ;;  %v6998_v46 = vld [vmem:[#allocation3 + $0x364] sm:$0xf]  ;;  %v855_v16 = vsel %vm7614_vm4, %v663_v28, %v854_v15 }
 0x165   : > { %2268 = vst [vmem:[#allocation3 + $0x370] sm:$0xf] %v2129_v38  ;;  %v1317_v48 = vrot.slane %v1315_v25, 5  ;;  %v1481_v27 = vld [vmem:[#allocation2 + $0xa0] sm:$0xf]  ;;  %v5985_v55 = vrot.slane %v1480_v10, 9  ;;  %v2133_v26 = vor.u32 %v2132_v61, %v2128_v47 }
 0x166   : > { %v5057_v56 = vpop.f32.mrf.mxu2  ;;  %v1742_v39 = vld [vmem:[#allocation2 + $0xa8] sm:$0xf]  ;;  %856 = vst [vmem:[#allocation2 + $0xa4] sm:$0x1] %v855_v16  ;;  %v1312_v32 = vor.u32 %v1311_v23, %v1308_v20  ;;  %v1321_v30 = vrot.slane %v1319_v11, 4  ;;  %v1633_v54 = vrot.slane %v1481_v27, 5 }
 0x167   : > { %v5058_v34 = vadd.f32 %v5057_v56, %v4969_v0  ;;  %v1743_v17 = vld [vmem:[#allocation2 + $0xac] sm:$0xf]  ;;  %1774 = vst [vmem:[#allocation3 + $0x3b4] sm:$0xf] %v1742_v39  ;;  %v397_v58 = vld [vmem:[#allocation2 + $0xb0] sm:$0x1] }
 0x168   : > { %v1313_v0 = vrot.slane %v1312_v32, 4  ;;  %v1322_v51 = vor.u32 %v1321_v30, %v1317_v48  ;;  %v1634_v28 = vsel %vm7809_vm13, %v5985_v55, %v1633_v54  ;;  %1775 = vst [vmem:[#allocation3 + $0x3d8] sm:$0xf] %v1743_v17  ;;  %v398_v47 = vsel %vm7609_vm3, 0, %v397_v58  ;;  %v1820_v11 = vld [vmem:[#allocation2 + $0xac] sm:$0xf] }
 0x169   : > { %v7003_v52 = vld [vmem:[#allocation3 + $0x388] sm:$0xf0]  ;;  %v5233_v2 = vpop.f32.mrf.mxu0  ;;  %5188 = vmatmul.bf16.gmra.mxu3 %v6467_v19  ;;  %1710 = vst [vmem:[#allocation3 + $0x3b0] sm:$0xf] %v1634_v28  ;;  %v2134_v10 = vrot.slane %v2133_v26, 4  ;;  %v1635_v23 = vrot.slane %v1633_v54, 4 }
 0x16a   : > { %v6463_v36 = vor.u32 %v7003_v52, %v6462_v21  ;;  %v6995_v6 = vld [vmem:[#allocation3 + $0x348] sm:$0xf0]  ;;  %v4971_v38 = vpop.f32.mrf.mxu1  ;;  %v8182_v61 = vadd.f32 %v5233_v2, %v8161_v5  ;;  %v680_v21 = vrot.slane %v7743_v60, 4  ;;  %v1318_v56 = vsel %vm7815_vm14, %v1313_v0, %v1317_v48  ;;  %399 = vst [vmem:[#allocation2 + $0xb0] sm:$0x1] %v398_v47 }
 0x16b   : > { %v6435_v50 = vor.u32 %v6995_v6, %v6434_v33  ;;  %v6456_v25 = vld [vmem:[#allocation3 + $0x384] sm:$0xf0]  ;;  %v1819_v33 = vld [vmem:[#allocation2 + $0xa8] sm:$0xf]  ;;  %v4972_v15 = vadd.f32 %v4971_v38, %v7898_v7  ;;  %v1323_v19 = vrot.slane %v1322_v51, 4  ;;  %v2150_v60 = vshll.u32 %v1820_v11, 16 }
 0x16c   : > { %5099 = vmatmul.bf16.gmra.mxu2 %v6463_v36  ;;  %v6459_v20 = vor.u32 %v6998_v46, %v6456_v25  ;;  %1435 = vst [vmem:[#allocation3 + $0x3ac] sm:$0xf] %v1318_v56  ;;  %v5149_v5 = vpop.f32.mrf.mxu3  ;;  %v2141_v27 = vshrl.u32 %v1819_v33, 16  ;;  %v2144_v55 = vshll.u32 %v1819_v33, 16  ;;  %v2154_v46 = vshrl.u32 %v1820_v11, 16 }
 0x16d   : > { %5272 = vmatmul.bf16.gmra.mxu0 %v6435_v50  ;;  %v984_v39 = vld [vmem:[#allocation2 + $0xa8] sm:$0xf]  ;;  %v5147_v52 = vadd.f32 %v5146_v29, %v5058_v34  ;;  %v1818_v26 = vld [vmem:[#allocation2 + $0xa4] sm:$0x1]  ;;  %v2152_v51 = vrot.slane %v2150_v60, 5 }
 0x16e   : > { %5010 = vmatmul.bf16.gmra.mxu1 %v6459_v20  ;;  %v5060_v16 = vpop.f32.mrf.mxu2  ;;  %v983_v32 = vld [vmem:[#allocation2 + $0xa4] sm:$0x1]  ;;  %v2136_v36 = vshll.u32 %v1818_v26, 16  ;;  %v8188_v58 = vld [vmem:[#allocation3 + $0x3b4] sm:$0xf]  ;;  %v2143_v54 = vrot.slane %v2141_v27, 4 }
 0x16f   : > { %v5061_v48 = vadd.f32 %v5060_v16, %v4972_v15  ;;  %v1482_v30 = vld [vmem:[#allocation2 + $0xa4] sm:$0x1]  ;;  %v1325_v17 = vshll.u32 %v983_v32, 16  ;;  %v6500_v6 = vld [vmem:[#allocation3 + $0x3d4] sm:$0xf0]  ;;  %v2146_v0 = vrot.slane %v2144_v55, 5 }
 0x170   : > { %v1636_v7 = vrot.slane %v1482_v30, 5  ;;  %v2156_v28 = vrot.slane %v2154_v46, 4  ;;  %v2138_v38 = vrot.slane %v2136_v36, 5  ;;  %v6503_v34 = vor.u32 %v8188_v58, %v6500_v6  ;;  %v985_v47 = vld [vmem:[#allocation2 + $0xac] sm:$0xf] }
 0x171   : > { %v8190_v2 = vadd.f32 %v5149_v5, %v5061_v48  ;;  %v5235_v50 = vpop.f32.mrf.mxu0  ;;  %v1327_v25 = vrot.slane %v1325_v17, 5  ;;  %v861_v56 = vld [vmem:[#allocation2 + $0xb0] sm:$0x1]  ;;  %v2147_v33 = vor.u32 %v2146_v0, %v2143_v54  ;;  %v1330_v11 = vshrl.u32 %v984_v39, 16  ;;  %v1483_v60 = vld [vmem:[#allocation2 + $0xa8] sm:$0xe] }
 0x172   : > { %v1637_v29 = vsel %vm7809_vm13, %v1635_v23, %v1636_v7  ;;  %v4973_v20 = vpop.f32.mrf.mxu1  ;;  %v2157_v15 = vor.u32 %v2156_v28, %v2152_v51  ;;  %v1333_v16 = vshll.u32 %v984_v39, 16  ;;  %v2139_v5 = vsel %vm7815_vm14, %v2134_v10, %v2138_v38  ;;  %v1484_v46 = vld [vmem:[#allocation2 + $0xac] sm:$0xf]  ;;  %v6498_v58 = vld [vmem:[#allocation3 + $0x3b0] sm:$0xf] }
 0x173   : > { %1711 = vst [vmem:[#allocation3 + $0x3d4] sm:$0xf] %v1637_v29  ;;  %v4974_v27 = vadd.f32 %v4973_v20, %v7911_v63  ;;  %v1328_v55 = vsel %vm7815_vm14, %v1323_v19, %v1327_v25  ;;  %v862_v23 = vsel %vm7614_vm4, %v680_v21, %v861_v56  ;;  %v2148_v26 = vrot.slane %v2147_v33, 4  ;;  %v1744_v6 = vld [vmem:[#allocation2 + $0xb4] sm:$0xf] }
 0x174   : > { %2269 = vst [vmem:[#allocation3 + $0x394] sm:$0xf] %v2139_v5  ;;  %v8202_v48 = vrot.slane %v2157_v15, 4  ;;  %v1332_v32 = vrot.slane %v1330_v11, 4  ;;  %v1335_v30 = vrot.slane %v1333_v16, 5  ;;  %v8204_v36 = vpop.f32.mrf.mxu3  ;;  %v1339_v10 = vshll.u32 %v985_v47, 16 }
 0x175   : > { %1436 = vst [vmem:[#allocation3 + $0x3d0] sm:$0xf] %v1328_v55  ;;  %v1343_v63 = vshrl.u32 %v985_v47, 16  ;;  %v5986_v17 = vrot.slane %v1483_v60, 9  ;;  %v1640_v7 = vrot.slane %v1484_v46, 5  ;;  %v2153_v21 = vsel %vm7815_vm14, %v2148_v26, %v2152_v51  ;;  %v7082_v5 = vld [vmem:[#allocation7 + $0x180] sm:$0xff] }
 0x176   : > { %v5062_v39 = vpop.f32.mrf.mxu2  ;;  %863 = vst [vmem:[#allocation2 + $0xb0] sm:$0x1] %v862_v23  ;;  %v1336_v54 = vor.u32 %v1335_v30, %v1332_v32  ;;  %v8210_v0 = vadd.f32 %v5235_v50, %v5147_v52  ;;  %v6470_v28 = vld [vmem:[#allocation3 + $0x370] sm:$0xf]  ;;  %v1341_v38 = vrot.slane %v1339_v10, 5  ;;  %5394 = vmatpush.bf16.msra.mxu2 %v7082_v5 }
 0x177   : > { %v8206_v19 = vadd.f32 %v5062_v39, %v4974_v27  ;;  %2270 = vst [vmem:[#allocation3 + $0x3b8] sm:$0xf] %v2153_v21  ;;  %v1345_v25 = vrot.slane %v1343_v63, 4  ;;  %v1641_v29 = vsel %vm7809_vm13, %v5986_v17, %v1640_v7  ;;  %v1745_v47 = vld [vmem:[#allocation2 + $0xb8] sm:$0xf]  ;;  %v1642_v33 = vrot.slane %v1640_v7, 4 }
 0x178   : > { %v7007_v20 = vld [vmem:[#allocation3 + $0x3ac] sm:$0xf]  ;;  %v1337_v56 = vrot.slane %v1336_v54, 4  ;;  %1712 = vst [vmem:[#allocation3 + $0x3f8] sm:$0xf] %v1641_v29 }
 0x179   : > { %v400_v15 = vld [vmem:[#allocation2 + $0xbc] sm:$0x1]  ;;  %v5238_v11 = vpop.f32.mrf.mxu0  ;;  %v1346_v51 = vor.u32 %v1345_v25, %v1341_v38  ;;  %1776 = vst [vmem:[#allocation3 + $0x3fc] sm:$0xf] %v1744_v6  ;;  %5193 = vmatmul.bf16.gmra.mxu3 %v6503_v34  ;;  %v1822_v23 = vld [vmem:[#allocation2 + $0xb4] sm:$0xf] }
 0x17a   : > { %v7012_v16 = vld [vmem:[#allocation3 + $0x3d0] sm:$0xf0]  ;;  %v401_v52 = vsel %vm7609_vm3, 0, %v400_v15  ;;  %v4976_v50 = vpop.f32.mrf.mxu1  ;;  %v1342_v55 = vsel %vm7815_vm14, %v1337_v56, %v1341_v38  ;;  %1777 = vst [vmem:[#allocation3 + $0x420] sm:$0xf] %v1745_v47  ;;  %v8221_v46 = vadd.f32 %v5238_v11, %v8190_v2  ;;  %v2165_v30 = vshrl.u32 %v1822_v23, 16 }
 0x17b   : > { %v6499_v27 = vor.u32 %v7012_v16, %v6498_v58  ;;  %v8218_v60 = vld [vmem:[#allocation2 + $0xb8] sm:$0xf]  ;;  %v7004_v26 = vld [vmem:[#allocation3 + $0x390] sm:$0xf0]  ;;  %v1347_v32 = vrot.slane %v1346_v51, 4  ;;  %v4977_v10 = vadd.f32 %v4976_v50, %v7928_v42  ;;  %v2168_v34 = vshll.u32 %v1822_v23, 16 }
 0x17c   : > { %1437 = vst [vmem:[#allocation3 + $0x3f4] sm:$0xf] %v1342_v55  ;;  %v6471_v39 = vor.u32 %v7004_v26, %v6470_v28  ;;  %v6492_v63 = vld [vmem:[#allocation3 + $0x3cc] sm:$0xf0]  ;;  %v2174_v17 = vshll.u32 %v8218_v60, 16  ;;  %v5154_v54 = vpop.f32.mrf.mxu3  ;;  %v7090_v28 = vld [vmem:[#allocation7 + $0x1c0] sm:$0xff] }
 0x17d   : > { %5104 = vmatmul.bf16.gmra.mxu2 %v6499_v27  ;;  %402 = vst [vmem:[#allocation2 + $0xbc] sm:$0x1] %v401_v52  ;;  %v6495_v7 = vor.u32 %v7007_v20, %v6492_v63  ;;  %v1821_v58 = vld [vmem:[#allocation2 + $0xb0] sm:$0x1]  ;;  %v697_v42 = vrot.slane %v7787_v49, 4  ;;  %v2167_v56 = vrot.slane %v2165_v30, 4  ;;  %5483 = vmatpush.bf16.msra.mxu3 %v7090_v28 }
 0x17e   : > { %v5065_v21 = vpop.f32.mrf.mxu2  ;;  %v986_v2 = vld [vmem:[#allocation2 + $0xb0] sm:$0x1]  ;;  %5277 = vmatmul.bf16.gmra.mxu0 %v6471_v39  ;;  %v2160_v38 = vshll.u32 %v1821_v58, 16  ;;  %v2170_v15 = vrot.slane %v2168_v34, 5  ;;  %v8226_v11 = vrot.slane %v2174_v17, 5  ;;  %v7074_v52 = vld [vmem:[#allocation7 + $0x140] sm:$0xff] }
 0x17f   : > { %v1485_v6 = vld [vmem:[#allocation2 + $0xb0] sm:$0x1]  ;;  %v5066_v25 = vadd.f32 %v5065_v21, %v4977_v10  ;;  %v1349_v29 = vshll.u32 %v986_v2, 16  ;;  %5015 = vmatmul.bf16.gmra.mxu1 %v6495_v7  ;;  %v2178_v49 = vshrl.u32 %v8218_v60, 16  ;;  %v7098_v23 = vld [vmem:[#allocation7 + $0x200] sm:$0xff] }
 0x180   : > { %v1643_v47 = vrot.slane %v1485_v6, 5  ;;  %v2162_v16 = vrot.slane %v2160_v38, 5  ;;  %v7017_v27 = vld [vmem:[#allocation3 + $0x3fc] sm:$0xf]  ;;  %v2171_v55 = vor.u32 %v2170_v15, %v2167_v56  ;;  %5305 = vmatpush.bf16.msra.mxu1 %v7074_v52  ;;  %v988_v63 = vld [vmem:[#allocation2 + $0xb8] sm:$0xf]  ;;  %5572 = vmatpush.bf16.msra.mxu0 %v7098_v23 }
 0x181   : > { %v8228_v20 = vadd.f32 %v5154_v54, %v5066_v25  ;;  %v1351_v51 = vrot.slane %v1349_v29, 5  ;;  %v8232_v50 = vpop.f32.mrf.mxu0  ;;  %v6536_v10 = vld [vmem:[#allocation3 + $0x41c] sm:$0xf0]  ;;  %v6534_v58 = vld [vmem:[#allocation3 + $0x3f8] sm:$0xf]  ;;  %v1363_v54 = vshll.u32 %v988_v63, 16 }
 0x182   : > { %v1644_v5 = vsel %vm7809_vm13, %v1642_v33, %v1643_v47  ;;  %v2163_v26 = vsel %vm7815_vm14, %v8202_v48, %v2162_v16  ;;  %v4978_v30 = vpop.f32.mrf.mxu1  ;;  %v987_v33 = vld [vmem:[#allocation2 + $0xb4] sm:$0xf]  ;;  %v2172_v7 = vrot.slane %v2171_v55, 4  ;;  %v1367_v2 = vshrl.u32 %v988_v63, 16  ;;  %v6506_v28 = vld [vmem:[#allocation3 + $0x3b8] sm:$0xf] }
 0x183   : > { %1713 = vst [vmem:[#allocation3 + $0x41c] sm:$0xf] %v1644_v5  ;;  %v1352_v39 = vsel %vm7815_vm14, %v1347_v32, %v1351_v51  ;;  %v4979_v34 = vadd.f32 %v4978_v30, %v7947_v53  ;;  %v1354_v60 = vshrl.u32 %v987_v33, 16  ;;  %v1357_v21 = vshll.u32 %v987_v33, 16  ;;  %v1486_v47 = vld [vmem:[#allocation2 + $0xb4] sm:$0xe] }
 0x184   : > { %2271 = vst [vmem:[#allocation3 + $0x3dc] sm:$0xf] %v2163_v26  ;;  %v868_v17 = vld [vmem:[#allocation2 + $0xbc] sm:$0x1]  ;;  %v8243_v6 = vpop.f32.mrf.mxu3  ;;  %v6539_v38 = vor.u32 %v7017_v27, %v6536_v10  ;;  %v2177_v53 = vsel %vm7815_vm14, %v2172_v7, %v8226_v11  ;;  %v2180_v25 = vrot.slane %v2178_v49, 4  ;;  %v1365_v15 = vrot.slane %v1363_v54, 5 }
 0x185   : > { %1438 = vst [vmem:[#allocation3 + $0x418] sm:$0xf] %v1352_v39  ;;  %v869_v48 = vsel %vm7614_vm4, %v697_v42, %v868_v17  ;;  %v1356_v29 = vrot.slane %v1354_v60, 4  ;;  %v1359_v42 = vrot.slane %v1357_v21, 5  ;;  %v1369_v16 = vrot.slane %v1367_v2, 4 }
 0x186   : > { %v5067_v32 = vpop.f32.mrf.mxu2  ;;  %870 = vst [vmem:[#allocation2 + $0xbc] sm:$0x1] %v869_v48  ;;  %v1487_v51 = vld [vmem:[#allocation2 + $0xb8] sm:$0xf]  ;;  %v5987_v5 = vrot.slane %v1486_v47, 9  ;;  %v2181_v10 = vor.u32 %v2180_v25, %v8226_v11 }
 0x187   : > { %v8248_v56 = vadd.f32 %v5067_v32, %v4979_v34  ;;  %2272 = vst [vmem:[#allocation3 + $0x400] sm:$0xf] %v2177_v53  ;;  %v347_v52 = vld [vmem:[#allocation2 + $0xc0] sm:$0x1]  ;;  %v1360_v55 = vor.u32 %v1359_v42, %v1356_v29  ;;  %v1647_v23 = vrot.slane %v1487_v51, 5  ;;  %v1370_v33 = vor.u32 %v1369_v16, %v1365_v15 }
 0x188   : > { %v439_v26 = vld [vmem:[%s7598_s11 + $0x78] sm:$0xf]  ;;  %v7016_v39 = vld [vmem:[#allocation3 + $0x3f4] sm:$0xf]  ;;  %v440_v63 = vld [vmem:[%s7598_s11 + $0x7c] sm:$0xf] }
 0x189   : > { %v5243_v30 = vpop.f32.mrf.mxu0  ;;  %v699_v34 = vshrl.u32 %v439_v26, 16  ;;  %5198 = vmatmul.bf16.gmra.mxu3 %v6539_v38  ;;  %v1361_v60 = vrot.slane %v1360_v55, 4  ;;  %v1648_v48 = vsel %vm7809_vm13, %v5987_v5, %v1647_v23  ;;  %v1649_v21 = vrot.slane %v1647_v23, 4  ;;  %s7384_s11 = scalar_lea.hbm %s7383_s21, 128 }
 0x18a   : > { %v7021_v27 = vld [vmem:[#allocation3 + $0x418] sm:$0xf0]  ;;  %v4981_v7 = vpop.f32.mrf.mxu1  ;;  %v348_v54 = vsel %vm7614_vm4, 0, %v347_v52  ;;  %1714 = vst [vmem:[#allocation3 + $0x440] sm:$0xf] %v1648_v48  ;;  %v707_v53 = vshrl.u32 %v440_v63, 16  ;;  %v8261_v16 = vadd.f32 %v5243_v30, %v8228_v20  ;;  %p7385_p1 = scmp.ne.s32.totalorder %s7383_s21, %s7384_s11  ;;  %p7390_p12 = scmp.lt.s32.totalorder %s7388_s25, %s7384_s11 }
 0x18b   : > { %v6535_v49 = vor.u32 %v7021_v27, %v6534_v58  ;;  %v7013_v17 = vld [vmem:[#allocation3 + $0x3d8] sm:$0xf0]  ;;  %v701_v58 = vrot.slane %v699_v34, 7  ;;  %v4982_v11 = vadd.f32 %v4981_v7, %v7965_v9  ;;  %v1366_v38 = vsel %vm7815_vm14, %v1361_v60, %v1365_v15  ;;  %349 = vst [vmem:[#allocation2 + $0xc0] sm:$0x1] %v348_v54 }
 0x18c   : > { %v6507_v2 = vor.u32 %v7013_v17, %v6506_v28  ;;  %v6528_v32 = vld [vmem:[#allocation3 + $0x414] sm:$0xf0]  ;;  %v2182_v51 = vrot.slane %v2181_v10, 4  ;;  %v5159_v52 = vpop.f32.mrf.mxu3  ;;  %v1371_v27 = vrot.slane %v1370_v33, 4  ;;  %1439 = vst [vmem:[#allocation3 + $0x43c] sm:$0xf] %v1366_v38  ;;  %p7386_p4 = pnand %p7385_p1, %p7569_p5  ;;  %p7391_p13 = por %p7390_p12, %p7389_p10 }
 0x18d   : > { %v6531_v25 = vor.u32 %v7016_v39, %v6528_v32  ;;  %5109 = vmatmul.bf16.gmra.mxu2 %v6535_v49  ;;  %v1824_v29 = vld [vmem:[#allocation2 + $0xbc] sm:$0x1]  ;;  %v702_v39 = vshll.u32 %v439_v26, 16  ;;  %v8263_v49 = vrot.slane %v707_v53, 7  ;;  %v705_v17 = vrot.slane %v701_v58, 4 }
 0x18e   : > { %v989_v47 = vld [vmem:[#allocation2 + $0xbc] sm:$0x1]  ;;  %v2184_v5 = vshll.u32 %v1824_v29, 16  ;;  %v5070_v28 = vpop.f32.mrf.mxu2  ;;  %5282 = vmatmul.bf16.gmra.mxu0 %v6507_v2  ;;  %v710_v20 = vshll.u32 %v440_v63, 16  ;;  %v403_v30 = vld [vmem:[#allocation2 + $0xc8] sm:$0x1]  ;;  %p7387_p8 = pneg %p7386_p4 }
 0x18f   : > { %v1488_v42 = vld [vmem:[#allocation2 + $0xbc] sm:$0x1]  ;;  %v1373_v55 = vshll.u32 %v989_v47, 16  ;;  %v5071_v9 = vadd.f32 %v5070_v28, %v4982_v11  ;;  %5020 = vmatmul.bf16.gmra.mxu1 %v6531_v25  ;;  %v2613_v33 = vld [vmem:[#allocation2 + $0x18] sm:$0xf]  ;;  %v704_v53 = vor.u32 %v702_v39, %v701_v58  ;;  %v714_v11 = vrot.slane %v8263_v49, 4 }
 0x190   : > { %v1650_v23 = vrot.slane %v1488_v42, 5  ;;  %v2186_v15 = vrot.slane %v2184_v5, 5  ;;  %v2614_v60 = vld [vmem:[#allocation2 + $0x1c] sm:$0xf]  ;;  %v712_v2 = vor.u32 %v710_v20, %v8263_v49  ;;  %v2662_v32 = vshrl.u32 %v2613_v33, 16  ;;  %p7392_p0 = pnand %p7391_p13, %p7387_p8 }
 0x191   : > { %v1375_v34 = vrot.slane %v1373_v55, 5  ;;  %v5160_v10 = vadd.f32 %v5159_v52, %v5071_v9  ;;  %v8267_v48 = vpop.f32.mrf.mxu0  ;;  %v2277_v29 = vld [vmem:[#allocation2 + $0x10] sm:$0xf]  ;;  %v2665_v47 = vshll.u32 %v2613_v33, 16  ;;  %v2671_v38 = vshll.u32 %v2614_v60, 16 }
 0x192   : > { %v1651_v7 = vsel %vm7809_vm13, %v1649_v21, %v1650_v23  ;;  %v2187_v54 = vsel %vm7815_vm14, %v2182_v51, %v2186_v15  ;;  %v4983_v63 = vpop.f32.mrf.mxu1  ;;  %v404_v21 = vsel %vm7609_vm3, 0, %v403_v30  ;;  %v713_v25 = vsel %vm7630_vm7, %v705_v17, %v712_v2  ;;  %v6570_v51 = vld [vmem:[#allocation3 + $0x440] sm:$0xf]  ;;  %v871_v55 = vld [vmem:[#allocation2 + $0xc0] sm:$0xf] }
 0x193   : > { %v1376_v26 = vsel %vm7815_vm14, %v1371_v27, %v1375_v34  ;;  %1715 = vst [vmem:[#allocation3 + $0x464] sm:$0xf] %v1651_v7  ;;  %v4984_v42 = vadd.f32 %v4983_v63, %v7984_v37  ;;  %v2374_v5 = vrot.slane %v2277_v29, 5  ;;  %v2664_v28 = vrot.slane %v2662_v32, 4  ;;  %v6542_v52 = vld [vmem:[#allocation3 + $0x400] sm:$0xf] }
 0x194   : > { %2273 = vst [vmem:[#allocation3 + $0x424] sm:$0xf] %v2187_v54  ;;  %v8280_v27 = vpop.f32.mrf.mxu3  ;;  %v2276_v9 = vld [vmem:[#allocation2 + $0xc] sm:$0xe]  ;;  %v2615_v23 = vld [vmem:[#allocation2 + $0x20] sm:$0x1]  ;;  %v872_v49 = vsel %vm7640_vm8, %v704_v53, %v871_v55 }
 0x195   : > { %1440 = vst [vmem:[#allocation3 + $0x460] sm:$0xf] %v1376_v26  ;;  %v7025_v22 = vld [vmem:[#allocation3 + $0x43c] sm:$0xf]  ;;  %v5988_v37 = vrot.slane %v2276_v9, 9  ;;  %v2376_v34 = vrot.slane %v2374_v5, 4 }
 0x196   : > { %874 = vst [vmem:[#allocation2 + $0xc4] sm:$0xf] %v713_v25  ;;  %v5072_v58 = vpop.f32.mrf.mxu2  ;;  %v2278_v15 = vld [vmem:[#allocation2 + $0x14] sm:$0x1]  ;;  %v8286_v17 = vld [vmem:[#allocation2 + $0x1c] sm:$0xf] }
 0x197   : > { %405 = vst [vmem:[#allocation2 + $0xc8] sm:$0x1] %v404_v21  ;;  %v8282_v39 = vadd.f32 %v5072_v58, %v4984_v42  ;;  %v2377_v20 = vrot.slane %v2278_v15, 5  ;;  %v2667_v30 = vrot.slane %v2665_v47, 5  ;;  %v2673_v7 = vrot.slane %v2671_v38, 5 }
 0x198   : > { %873 = vst [vmem:[#allocation2 + $0xc0] sm:$0xf] %v872_v49  ;;  %v2675_v33 = vshrl.u32 %v2614_v60, 16  ;;  %v2375_v26 = vsel %vm7809_vm13, %v5988_v37, %v2374_v5  ;;  %v2549_v2 = vld [vmem:[#allocation2 + $0x18] sm:$0xf]  ;;  %v2681_v60 = vshll.u32 %v2615_v23, 16 }
 0x199   : > { %v2550_v32 = vld [vmem:[#allocation2 + $0x1c] sm:$0xf]  ;;  %v5248_v63 = vpop.f32.mrf.mxu0  ;;  %v2378_v53 = vsel %vm7809_vm13, %v2376_v34, %v2377_v20  ;;  %2516 = vst [vmem:[#allocation3 + $0x14] sm:$0xf] %v2375_v26  ;;  %v2668_v25 = vor.u32 %v2667_v30, %v2664_v28  ;;  %v3207_v38 = vrot.slane %v8286_v17, 5 }
 0x19a   : > { %v7030_v54 = vld [vmem:[#allocation3 + $0x460] sm:$0xf0]  ;;  %v2677_v29 = vrot.slane %v2675_v33, 4  ;;  %v4986_v58 = vpop.f32.mrf.mxu1  ;;  %2517 = vst [vmem:[#allocation3 + $0x38] sm:$0xf] %v2378_v53  ;;  %v8293_v55 = vadd.f32 %v5248_v63, %v5160_v10 }
 0x19b   : > { %v7022_v21 = vld [vmem:[#allocation3 + $0x420] sm:$0xf0]  ;;  %v6571_v31 = vor.u32 %v7030_v54, %v6570_v51  ;;  %2581 = vst [vmem:[#allocation3 + $0x18] sm:$0xf] %v2549_v2  ;;  %v4987_v15 = vadd.f32 %v4986_v58, %v8003_v62  ;;  %v2669_v10 = vrot.slane %v2668_v25, 4 }
 0x19c   : > { %v6543_v42 = vor.u32 %v7022_v21, %v6542_v52  ;;  %v6564_v47 = vld [vmem:[#allocation3 + $0x45c] sm:$0xf0]  ;;  %v2678_v51 = vor.u32 %v2677_v29, %v2673_v7  ;;  %v5164_v20 = vpop.f32.mrf.mxu3  ;;  %2582 = vst [vmem:[#allocation3 + $0x3c] sm:$0xf] %v2550_v32  ;;  %v3111_v53 = vld [vmem:[#allocation2 + $0x20] sm:$0x1] }
 0x19d   : > { %v6567_v5 = vor.u32 %v7025_v22, %v6564_v47  ;;  %v1747_v9 = vld [vmem:[#allocation2 + $0xc4] sm:$0xf]  ;;  %5114 = vmatmul.bf16.gmra.mxu2 %v6571_v31  ;;  %v2683_v22 = vrot.slane %v2681_v60, 5  ;;  %v3109_v31 = vld [vmem:[#allocation2 + $0x18] sm:$0xe] }
 0x19e   : > { %v1826_v49 = vld [vmem:[#allocation2 + $0xc4] sm:$0xf]  ;;  %1779 = vst [vmem:[#allocation3 + $0x468] sm:$0xf] %v1747_v9  ;;  %v875_v28 = vld [vmem:[#allocation2 + $0xc8] sm:$0x1]  ;;  %v5075_v23 = vpop.f32.mrf.mxu2  ;;  %5287 = vmatmul.bf16.gmra.mxu0 %v6543_v42 }
 0x19f   : > { %v2198_v37 = vshll.u32 %v1826_v49, 16  ;;  %v2202_v52 = vshrl.u32 %v1826_v49, 16  ;;  %v876_v34 = vsel %vm7614_vm4, %v714_v11, %v875_v28  ;;  %v2679_v17 = vrot.slane %v2678_v51, 4  ;;  %v1746_v30 = vld [vmem:[#allocation2 + $0xc0] sm:$0xf]  ;;  %5025 = vmatmul.bf16.gmra.mxu1 %v6567_v5 }
 0x1a0   : > { %877 = vst [vmem:[#allocation2 + $0xc8] sm:$0x1] %v876_v34  ;;  %v1825_v33 = vld [vmem:[#allocation2 + $0xc0] sm:$0xf]  ;;  %v5076_v54 = vadd.f32 %v5075_v23, %v4987_v15  ;;  %v2674_v11 = vsel %vm7815_vm14, %v2669_v10, %v2673_v7  ;;  %v6004_v60 = vrot.slane %v3109_v31, 9  ;;  %v3209_v5 = vrot.slane %v3207_v38, 4 }
 0x1a1   : > { %1778 = vst [vmem:[#allocation3 + $0x444] sm:$0xf] %v1746_v30  ;;  %v2189_v62 = vshrl.u32 %v1825_v33, 16  ;;  %v2192_v26 = vshll.u32 %v1825_v33, 16  ;;  %v2200_v2 = vrot.slane %v2198_v37, 5  ;;  %v2204_v63 = vrot.slane %v2202_v52, 4  ;;  %v8302_v25 = vpop.f32.mrf.mxu0 }
 0x1a2   : > { %v5165_v21 = vadd.f32 %v5164_v20, %v5076_v54  ;;  %v2684_v32 = vsel %vm7815_vm14, %v2679_v17, %v2683_v22  ;;  %3077 = vst [vmem:[#allocation3 + $0x1c] sm:$0xf] %v2674_v11  ;;  %v4988_v47 = vpop.f32.mrf.mxu1  ;;  %v6046_v51 = vld [vmem:[#allocation3 + $0x18] sm:$0xf]  ;;  %v3210_v15 = vrot.slane %v3111_v53, 5  ;;  %v3208_v52 = vsel %vm7809_vm13, %v6004_v60, %v3207_v38 }
 0x1a3   : > { %v2191_v29 = vrot.slane %v2189_v62, 4  ;;  %v2194_v42 = vrot.slane %v2192_v26, 5  ;;  %v2205_v58 = vor.u32 %v2204_v63, %v2200_v2  ;;  %3078 = vst [vmem:[#allocation3 + $0x40] sm:$0xf] %v2684_v32  ;;  %v2280_v7 = vld [vmem:[#allocation2 + $0x1c] sm:$0xf]  ;;  %v4989_v28 = vadd.f32 %v4988_v47, %v8023_v41 }
 0x1a4   : > { %v6897_v37 = vld [vmem:[#allocation3 + $0x38] sm:$0xf0]  ;;  %v2381_v34 = vrot.slane %v2280_v7, 5  ;;  %v2616_v23 = vld [vmem:[#allocation2 + $0x24] sm:$0xf]  ;;  %v8307_v30 = vpop.f32.mrf.mxu3  ;;  %v3211_v33 = vsel %vm7809_vm13, %v3209_v5, %v3210_v15 }
 0x1a5   : > { %v6572_v9 = vld [vmem:[#allocation3 + $0x464] sm:$0xf0]  ;;  %v2195_v49 = vor.u32 %v2194_v42, %v2191_v29  ;;  %v2206_v17 = vrot.slane %v2205_v58, 4  ;;  %3349 = vst [vmem:[#allocation3 + $0x20] sm:$0xf] %v3208_v52  ;;  %v2686_v38 = vshrl.u32 %v2616_v23, 16  ;;  %v6047_v58 = vor.u32 %v6897_v37, %v6046_v51 }
 0x1a6   : > { %v5077_v22 = vpop.f32.mrf.mxu2  ;;  %v6892_v41 = vld [vmem:[#allocation3 + $0x14] sm:$0xf]  ;;  %v6040_v63 = vld [vmem:[#allocation3 + $0x34] sm:$0xf0]  ;;  %3350 = vst [vmem:[#allocation3 + $0x44] sm:$0xf] %v3211_v33 }
 0x1a7   : > { %v1827_v20 = vld [vmem:[#allocation2 + $0xc8] sm:$0x1]  ;;  %v2196_v10 = vrot.slane %v2195_v49, 4  ;;  %v8311_v26 = vadd.f32 %v5077_v22, %v4989_v28  ;;  %v2279_v31 = vld [vmem:[#allocation2 + $0x18] sm:$0xe]  ;;  %v2383_v29 = vrot.slane %v2381_v34, 4  ;;  %v6043_v51 = vor.u32 %v6892_v41, %v6040_v63 }
 0x1a8   : > { %v7026_v54 = vld [vmem:[#allocation3 + $0x444] sm:$0xf]  ;;  %v2208_v62 = vshll.u32 %v1827_v20, 16  ;;  %v2281_v53 = vld [vmem:[#allocation2 + $0x20] sm:$0x1]  ;;  %v5989_v47 = vrot.slane %v2279_v31, 9 }
 0x1a9   : > { %v6575_v11 = vor.u32 %v7026_v54, %v6572_v9  ;;  %v2201_v32 = vsel %vm7815_vm14, %v2196_v10, %v2200_v2  ;;  %v2617_v60 = vld [vmem:[#allocation2 + $0x28] sm:$0xf]  ;;  %v5253_v5 = vpop.f32.mrf.mxu0  ;;  %v2384_v49 = vrot.slane %v2281_v53, 5  ;;  %v2551_v15 = vld [vmem:[#allocation2 + $0x24] sm:$0xf]  ;;  %v2688_v52 = vrot.slane %v2686_v38, 4 }
 0x1aa   : > { %v2210_v42 = vrot.slane %v2208_v62, 5  ;;  %2274 = vst [vmem:[#allocation3 + $0x448] sm:$0xf] %v2201_v32  ;;  %v4991_v28 = vpop.f32.mrf.mxu1  ;;  %v2382_v9 = vsel %vm7809_vm13, %v5989_v47, %v2381_v34  ;;  %v2618_v2 = vld [vmem:[#allocation2 + $0x2c] sm:$0x1]  ;;  %v8319_v20 = vadd.f32 %v5253_v5, %v5165_v21  ;;  %v2689_v22 = vshll.u32 %v2616_v23, 16 }
 0x1ab   : > { %5203 = vmatmul.bf16.gmra.mxu3 %v6575_v11  ;;  %2583 = vst [vmem:[#allocation3 + $0x60] sm:$0xf] %v2551_v15  ;;  %v2385_v37 = vsel %vm7809_vm13, %v2383_v29, %v2384_v49  ;;  %v2552_v10 = vld [vmem:[#allocation2 + $0x28] sm:$0xf]  ;;  %v2695_v33 = vshll.u32 %v2617_v60, 16  ;;  %v4992_v54 = vadd.f32 %v4991_v28, %v7909_v59  ;;  %v2705_v62 = vshll.u32 %v2618_v2, 16 }
 0x1ac   : > { %v2211_v7 = vsel %vm7815_vm14, %v2206_v17, %v2210_v42  ;;  %2518 = vst [vmem:[#allocation3 + $0x5c] sm:$0xf] %v2382_v9  ;;  %v2699_v17 = vshrl.u32 %v2617_v60, 16  ;;  %v3112_v34 = vld [vmem:[#allocation2 + $0x24] sm:$0xe]  ;;  %v5169_v32 = vpop.f32.mrf.mxu3  ;;  %v2691_v21 = vrot.slane %v2689_v22, 5 }
 0x1ad   : > { %2275 = vst [vmem:[#allocation3 + $0x46c] sm:$0xf] %v2211_v7  ;;  %5395 = vmatmul.bf16.vlgmr.msra.gmra.mxu2 %v6047_v58  ;;  %v2697_v38 = vrot.slane %v2695_v33, 5  ;;  %v3113_v63 = vld [vmem:[#allocation2 + $0x28] sm:$0xf]  ;;  %v6005_v29 = vrot.slane %v3112_v34, 9 }
 0x1ae   : > { %v5080_v11 = vpop.f32.mrf.mxu2  ;;  %2519 = vst [vmem:[#allocation3 + $0x80] sm:$0xf] %v2385_v37  ;;  %v2701_v41 = vrot.slane %v2699_v17, 4  ;;  %v2692_v53 = vor.u32 %v2691_v21, %v2688_v52  ;;  %v3114_v23 = vld [vmem:[#allocation2 + $0x2c] sm:$0x1]  ;;  %v3214_v42 = vrot.slane %v3113_v63, 5 }
 0x1af   : > { %v5081_v31 = vadd.f32 %v5080_v11, %v4992_v54  ;;  %2584 = vst [vmem:[#allocation3 + $0x84] sm:$0xf] %v2552_v10  ;;  %5306 = vmatmul.bf16.vlgmr.msra.gmra.mxu1 %v6043_v51  ;;  %v6893_v58 = vld [vmem:[#allocation3 + $0x1c] sm:$0xf]  ;;  %v2707_v5 = vrot.slane %v2705_v62, 5  ;;  %v3217_v49 = vrot.slane %v3114_v23, 5 }
 0x1b0   : > { %v2702_v60 = vor.u32 %v2701_v41, %v2697_v38  ;;  %v2619_v15 = vld [vmem:[#allocation2 + $0x30] sm:$0xf]  ;;  %v6048_v28 = vld [vmem:[#allocation3 + $0x3c] sm:$0xf0]  ;;  %v2693_v9 = vrot.slane %v2692_v53, 4  ;;  %v3215_v2 = vsel %vm7809_vm13, %v6005_v29, %v3214_v42  ;;  %v3216_v51 = vrot.slane %v3214_v42, 4 }
 0x1b1   : > { %v6578_v59 = vld [vmem:[#allocation3 + $0x448] sm:$0xf]  ;;  %v8324_v47 = vadd.f32 %v5169_v32, %v5081_v31  ;;  %v8326_v7 = vpop.f32.mrf.mxu0  ;;  %v2710_v52 = vshrl.u32 %v2619_v15, 16  ;;  %3351 = vst [vmem:[#allocation3 + $0x68] sm:$0xf] %v3215_v2  ;;  %v2713_v32 = vshll.u32 %v2619_v15, 16  ;;  %v6051_v23 = vor.u32 %v6893_v58, %v6048_v28 }
 0x1b2   : > { %v4993_v10 = vpop.f32.mrf.mxu1  ;;  %v2703_v22 = vrot.slane %v2702_v60, 4  ;;  %v2620_v33 = vld [vmem:[#allocation2 + $0x34] sm:$0xf]  ;;  %v6082_v17 = vld [vmem:[#allocation3 + $0x60] sm:$0xf]  ;;  %v2698_v62 = vsel %vm7815_vm14, %v2693_v9, %v2697_v38  ;;  %v3218_v34 = vsel %vm7809_vm13, %v3216_v51, %v3217_v49 }
 0x1b3   : > { %v2283_v11 = vld [vmem:[#allocation2 + $0x28] sm:$0xf]  ;;  %v4994_v21 = vadd.f32 %v4993_v10, %v7924_v45  ;;  %3079 = vst [vmem:[#allocation3 + $0x64] sm:$0xf] %v2698_v62  ;;  %v2621_v63 = vld [vmem:[#allocation2 + $0x38] sm:$0x1] }
 0x1b4   : > { %v7031_v37 = vld [vmem:[#allocation3 + $0x468] sm:$0xf0]  ;;  %v2708_v31 = vsel %vm7815_vm14, %v2703_v22, %v2707_v5  ;;  %v2388_v41 = vrot.slane %v2283_v11, 5  ;;  %v2712_v53 = vrot.slane %v2710_v52, 4  ;;  %v8337_v42 = vpop.f32.mrf.mxu3  ;;  %v6901_v38 = vld [vmem:[#allocation3 + $0x5c] sm:$0xf] }
 0x1b5   : > { %v6579_v54 = vor.u32 %v7031_v37, %v6578_v59  ;;  %v6076_v59 = vld [vmem:[#allocation3 + $0x7c] sm:$0xf0]  ;;  %3080 = vst [vmem:[#allocation3 + $0x88] sm:$0xf] %v2708_v31  ;;  %v2282_v49 = vld [vmem:[#allocation2 + $0x24] sm:$0xe] }
 0x1b6   : > { %v5082_v29 = vpop.f32.mrf.mxu2  ;;  %v6906_v60 = vld [vmem:[#allocation3 + $0x80] sm:$0xf0]  ;;  %3352 = vst [vmem:[#allocation3 + $0x8c] sm:$0xf] %v3218_v34  ;;  %v2284_v45 = vld [vmem:[#allocation2 + $0x2c] sm:$0x1] }
 0x1b7   : > { %5292 = vmatmul.bf16.gmra.mxu0 %v6579_v54  ;;  %v8339_v15 = vadd.f32 %v5082_v29, %v4994_v21  ;;  %v5990_v9 = vrot.slane %v2282_v49, 9  ;;  %v2390_v5 = vrot.slane %v2388_v41, 4  ;;  %v2391_v2 = vrot.slane %v2284_v45, 5  ;;  %v3115_v10 = vld [vmem:[#allocation2 + $0x30] sm:$0xe] }
 0x1b8   : > { %v2715_v51 = vrot.slane %v2713_v32, 5  ;;  %v2719_v37 = vshll.u32 %v2620_v33, 16  ;;  %v2723_v52 = vshrl.u32 %v2620_v33, 16  ;;  %v6083_v58 = vor.u32 %v6906_v60, %v6082_v17  ;;  %v2553_v22 = vld [vmem:[#allocation2 + $0x30] sm:$0xf] }
 0x1b9   : > { %v2389_v28 = vsel %vm7809_vm13, %v5990_v9, %v2388_v41  ;;  %v2729_v54 = vshll.u32 %v2621_v63, 16  ;;  %v6006_v62 = vrot.slane %v3115_v10, 9  ;;  %v5258_v11 = vpop.f32.mrf.mxu0  ;;  %v2392_v34 = vsel %vm7809_vm13, %v2390_v5, %v2391_v2  ;;  %v2554_v21 = vld [vmem:[#allocation2 + $0x34] sm:$0xf]  ;;  %2585 = vst [vmem:[#allocation3 + $0xa8] sm:$0xf] %v2553_v22 }
 0x1ba   : > { %2520 = vst [vmem:[#allocation3 + $0xa4] sm:$0xf] %v2389_v28  ;;  %v2716_v31 = vor.u32 %v2715_v51, %v2712_v53  ;;  %v2721_v29 = vrot.slane %v2719_v37, 5  ;;  %v2725_v32 = vrot.slane %v2723_v52, 4  ;;  %v4996_v49 = vpop.f32.mrf.mxu1  ;;  %v6079_v33 = vor.u32 %v6901_v38, %v6076_v59  ;;  %v3116_v17 = vld [vmem:[#allocation2 + $0x34] sm:$0xf] }
 0x1bb   : > { %5484 = vmatmul.bf16.vlgmr.msra.gmra.mxu3 %v6051_v23  ;;  %2521 = vst [vmem:[#allocation3 + $0xc8] sm:$0xf] %v2392_v34  ;;  %v8346_v60 = vadd.f32 %v5258_v11, %v8324_v47  ;;  %v2731_v45 = vrot.slane %v2729_v54, 5  ;;  %v3221_v23 = vrot.slane %v3116_v17, 5  ;;  %v4997_v9 = vadd.f32 %v4996_v49, %v7945_v44  ;;  %v3117_v5 = vld [vmem:[#allocation2 + $0x38] sm:$0x1] }
 0x1bc   : > { %v2717_v41 = vrot.slane %v2716_v31, 4  ;;  %v2726_v63 = vor.u32 %v2725_v32, %v2721_v29  ;;  %2586 = vst [vmem:[#allocation3 + $0xcc] sm:$0xf] %v2554_v21  ;;  %v6054_v53 = vld [vmem:[#allocation3 + $0x20] sm:$0xf]  ;;  %v5174_v51 = vpop.f32.mrf.mxu3  ;;  %v3224_v28 = vrot.slane %v3117_v5, 5 }
 0x1bd   : > { %5400 = vmatmul.bf16.gmra.mxu2 %v6083_v58  ;;  %v3222_v47 = vsel %vm7809_vm13, %v6006_v62, %v3221_v23  ;;  %v6898_v37 = vld [vmem:[#allocation3 + $0x40] sm:$0xf0]  ;;  %v3223_v10 = vrot.slane %v3221_v23, 4  ;;  %v2623_v22 = vld [vmem:[#allocation2 + $0x40] sm:$0xf] }
 0x1be   : > { %v5085_v2 = vpop.f32.mrf.mxu2  ;;  %v2722_v38 = vsel %vm7815_vm14, %v2717_v41, %v2721_v29  ;;  %v2727_v59 = vrot.slane %v2726_v63, 4  ;;  %3353 = vst [vmem:[#allocation3 + $0xb0] sm:$0xf] %v3222_v47  ;;  %v2622_v58 = vld [vmem:[#allocation2 + $0x3c] sm:$0xf]  ;;  %v6055_v62 = vor.u32 %v6898_v37, %v6054_v53  ;;  %v2743_v29 = vshll.u32 %v2623_v22, 16 }
 0x1bf   : > { %v5086_v52 = vadd.f32 %v5085_v2, %v4997_v9  ;;  %3081 = vst [vmem:[#allocation3 + $0xac] sm:$0xf] %v2722_v38  ;;  %5311 = vmatmul.bf16.gmra.mxu1 %v6079_v33  ;;  %v3225_v11 = vsel %vm7809_vm13, %v3223_v10, %v3224_v28  ;;  %v2734_v34 = vshrl.u32 %v2622_v58, 16  ;;  %v2737_v21 = vshll.u32 %v2622_v58, 16  ;;  %v6902_v32 = vld [vmem:[#allocation3 + $0x64] sm:$0xf] }
 0x1c0   : > { %v2732_v44 = vsel %vm7815_vm14, %v2727_v59, %v2731_v45  ;;  %3354 = vst [vmem:[#allocation3 + $0xd4] sm:$0xf] %v3225_v11  ;;  %v6084_v49 = vld [vmem:[#allocation3 + $0x84] sm:$0xf0]  ;;  %v2286_v45 = vld [vmem:[#allocation2 + $0x34] sm:$0xf] }
 0x1c1   : > { %v5175_v54 = vadd.f32 %v5174_v51, %v5086_v52  ;;  %3082 = vst [vmem:[#allocation3 + $0xd0] sm:$0xf] %v2732_v44  ;;  %v8357_v31 = vpop.f32.mrf.mxu0  ;;  %v2736_v17 = vrot.slane %v2734_v34, 4  ;;  %v2739_v41 = vrot.slane %v2737_v21, 5  ;;  %v6118_v63 = vld [vmem:[#allocation3 + $0xa8] sm:$0xf]  ;;  %v6087_v53 = vor.u32 %v6902_v32, %v6084_v49 }
 0x1c2   : > { %8879 = vst [vmem:[#allocation24_spill] sm:$0xff] %v8357_v31  ;;  %v4998_v33 = vpop.f32.mrf.mxu1  ;;  %v2747_v23 = vshrl.u32 %v2623_v22, 16  ;;  %v2395_v2 = vrot.slane %v2286_v45, 5  ;;  %v2624_v51 = vld [vmem:[#allocation2 + $0x44] sm:$0x1]  ;;  %v2745_v10 = vrot.slane %v2743_v29, 5 }
 0x1c3   : > { %v4999_v9 = vadd.f32 %v4998_v33, %v7963_v57  ;;  %v6915_v5 = vld [vmem:[#allocation3 + $0xc8] sm:$0xf0]  ;;  %v2740_v38 = vor.u32 %v2739_v41, %v2736_v17  ;;  %v2285_v37 = vld [vmem:[#allocation2 + $0x30] sm:$0xe]  ;;  %v2287_v52 = vld [vmem:[#allocation2 + $0x38] sm:$0x1] }
 0x1c4   : > { %v8360_v47 = vpop.f32.mrf.mxu3  ;;  %v5991_v44 = vrot.slane %v2285_v37, 9  ;;  %v2397_v58 = vrot.slane %v2395_v2, 4  ;;  %v2398_v11 = vrot.slane %v2287_v52, 5  ;;  %v6910_v22 = vld [vmem:[#allocation3 + $0xa4] sm:$0xf]  ;;  %v2749_v57 = vrot.slane %v2747_v23, 4 }
 0x1c5   : > { %8880 = vst [vmem:[#allocation25_spill] sm:$0xff] %v8360_v47  ;;  %v2741_v34 = vrot.slane %v2740_v38, 4  ;;  %v2753_v21 = vshll.u32 %v2624_v51, 16  ;;  %v6112_v33 = vld [vmem:[#allocation3 + $0xc4] sm:$0xf0]  ;;  %v6119_v45 = vor.u32 %v6915_v5, %v6118_v63 }
 0x1c6   : > { %v5087_v59 = vpop.f32.mrf.mxu2  ;;  %v2399_v32 = vsel %vm7809_vm13, %v2397_v58, %v2398_v11  ;;  %v2555_v49 = vld [vmem:[#allocation2 + $0x3c] sm:$0xf]  ;;  %v2556_v17 = vld [vmem:[#allocation2 + $0x40] sm:$0xf]  ;;  %v2750_v41 = vor.u32 %v2749_v57, %v2745_v10  ;;  %v3120_v5 = vld [vmem:[#allocation2 + $0x44] sm:$0x1] }
 0x1c7   : > { %5573 = vmatmul.bf16.vlgmr.msra.gmra.mxu0 %v6055_v62  ;;  %v8362_v28 = vadd.f32 %v5087_v59, %v4999_v9  ;;  %v2396_v62 = vsel %vm7809_vm13, %v5991_v44, %v2395_v2  ;;  %v2755_v9 = vrot.slane %v2753_v21, 5  ;;  %v3118_v59 = vld [vmem:[#allocation2 + $0x3c] sm:$0xe]  ;;  %2523 = vst [vmem:[#allocation3 + $0x110] sm:$0xf] %v2399_v32  ;;  %v2746_v23 = vsel %vm7815_vm14, %v2741_v34, %v2745_v10 }
 0x1c8   : > { %2522 = vst [vmem:[#allocation3 + $0xec] sm:$0xf] %v2396_v62  ;;  %v3119_v63 = vld [vmem:[#allocation2 + $0x40] sm:$0xf]  ;;  %v6115_v2 = vor.u32 %v6910_v22, %v6112_v33  ;;  %v2751_v38 = vrot.slane %v2750_v41, 4  ;;  %v6007_v52 = vrot.slane %v3118_v59, 9 }
 0x1c9   : > { %8881 = vst [vmem:[#allocation26_spill] sm:$0xff] %v8362_v28  ;;  %v5263_v29 = vpop.f32.mrf.mxu0  ;;  %v3228_v44 = vrot.slane %v3119_v63, 5  ;;  %v3231_v58 = vrot.slane %v3120_v5, 5  ;;  %v6090_v22 = vld [vmem:[#allocation3 + $0x68] sm:$0xf] }
 0x1ca   : > { %v5001_v37 = vpop.f32.mrf.mxu1  ;;  %v8370_v51 = vadd.f32 %v5263_v29, %v5175_v54  ;;  %2587 = vst [vmem:[#allocation3 + $0xf0] sm:$0xf] %v2555_v49  ;;  %v2756_v21 = vsel %vm7815_vm14, %v2751_v38, %v2755_v9  ;;  %v6907_v34 = vld [vmem:[#allocation3 + $0x88] sm:$0xf0]  ;;  %v2626_v62 = vld [vmem:[#allocation2 + $0x4c] sm:$0xf] }
 0x1cb   : > { %5489 = vmatmul.bf16.gmra.mxu3 %v6087_v53  ;;  %v5002_v53 = vadd.f32 %v5001_v37, %v7982_v12  ;;  %2588 = vst [vmem:[#allocation3 + $0x114] sm:$0xf] %v2556_v17  ;;  %v3229_v54 = vsel %vm7809_vm13, %v6007_v52, %v3228_v44  ;;  %v3230_v10 = vrot.slane %v3228_v44, 4  ;;  %v6091_v29 = vor.u32 %v6907_v34, %v6090_v22  ;;  %v6911_v59 = vld [vmem:[#allocation3 + $0xac] sm:$0xf] }
 0x1cc   : > { %8882 = vst [vmem:[#allocation27_spill] sm:$0xff] %v8370_v51  ;;  %v5179_v57 = vpop.f32.mrf.mxu3  ;;  %v2767_v9 = vshll.u32 %v2626_v62, 16  ;;  %v6120_v37 = vld [vmem:[#allocation3 + $0xcc] sm:$0xf0]  ;;  %v2289_v38 = vld [vmem:[#allocation2 + $0x40] sm:$0xf] }
 0x1cd   : > { %5405 = vmatmul.bf16.gmra.mxu2 %v6119_v45  ;;  %3083 = vst [vmem:[#allocation3 + $0xf4] sm:$0xf] %v2746_v23  ;;  %v3232_v12 = vsel %vm7809_vm13, %v3230_v10, %v3231_v58  ;;  %v2625_v45 = vld [vmem:[#allocation2 + $0x48] sm:$0xf]  ;;  %v2771_v52 = vshrl.u32 %v2626_v62, 16  ;;  %v2402_v58 = vrot.slane %v2289_v38, 5 }
 0x1ce   : > { %v5090_v11 = vpop.f32.mrf.mxu2  ;;  %3084 = vst [vmem:[#allocation3 + $0x118] sm:$0xf] %v2756_v21  ;;  %v2758_v49 = vshrl.u32 %v2625_v45, 16  ;;  %v2761_v17 = vshll.u32 %v2625_v45, 16  ;;  %v6123_v21 = vor.u32 %v6911_v59, %v6120_v37  ;;  %v2288_v22 = vld [vmem:[#allocation2 + $0x3c] sm:$0xe] }
 0x1cf   : > { %v5091_v33 = vadd.f32 %v5090_v11, %v5002_v53  ;;  %5316 = vmatmul.bf16.gmra.mxu1 %v6115_v2  ;;  %3355 = vst [vmem:[#allocation3 + $0xf8] sm:$0xf] %v3229_v54  ;;  %v2627_v11 = vld [vmem:[#allocation2 + $0x50] sm:$0x1]  ;;  %v2290_v34 = vld [vmem:[#allocation2 + $0x44] sm:$0x1] }
 0x1d0   : > { %3356 = vst [vmem:[#allocation3 + $0x11c] sm:$0xf] %v3232_v12  ;;  %v2760_v63 = vrot.slane %v2758_v49, 4  ;;  %v2763_v5 = vrot.slane %v2761_v17, 5  ;;  %v6919_v45 = vld [vmem:[#allocation3 + $0xec] sm:$0xf] }
 0x1d1   : > { %v5180_v32 = vadd.f32 %v5179_v57, %v5091_v33  ;;  %v8379_v41 = vpop.f32.mrf.mxu0  ;;  %v6154_v2 = vld [vmem:[#allocation3 + $0xf0] sm:$0xf]  ;;  %v2769_v33 = vrot.slane %v2767_v9, 5  ;;  %v5992_v17 = vrot.slane %v2288_v22, 9  ;;  %v2404_v62 = vrot.slane %v2402_v58, 4 }
 0x1d2   : > { %8883 = vst [vmem:[#allocation28_spill] sm:$0xff] %v8379_v41  ;;  %v5003_v23 = vpop.f32.mrf.mxu1  ;;  %v6924_v53 = vld [vmem:[#allocation3 + $0x110] sm:$0xf0]  ;;  %v2764_v57 = vor.u32 %v2763_v5, %v2760_v63  ;;  %v6148_v49 = vld [vmem:[#allocation3 + $0x10c] sm:$0xf0]  ;;  %v2405_v41 = vrot.slane %v2290_v34, 5 }
 0x1d3   : > { %v5004_v44 = vadd.f32 %v5003_v23, %v7997_v35  ;;  %v2773_v23 = vrot.slane %v2771_v52, 4  ;;  %v2777_v38 = vshll.u32 %v2627_v11, 16  ;;  %v3122_v51 = vld [vmem:[#allocation2 + $0x4c] sm:$0xf]  ;;  %v6155_v63 = vor.u32 %v6924_v53, %v6154_v2  ;;  %v2557_v59 = vld [vmem:[#allocation2 + $0x48] sm:$0xf] }
 0x1d4   : > { %v8382_v10 = vpop.f32.mrf.mxu3  ;;  %v2765_v35 = vrot.slane %v2764_v57, 4  ;;  %v2558_v37 = vld [vmem:[#allocation2 + $0x4c] sm:$0xf]  ;;  %v3121_v5 = vld [vmem:[#allocation2 + $0x48] sm:$0xe]  ;;  %v2406_v9 = vsel %vm7809_vm13, %v2404_v62, %v2405_v41  ;;  %v3235_v53 = vrot.slane %v3122_v51, 5  ;;  %v6151_v34 = vor.u32 %v6919_v45, %v6148_v49 }
 0x1d5   : > { %8884 = vst [vmem:[#allocation29_spill] sm:$0xff] %v8382_v10  ;;  %v2774_v57 = vor.u32 %v2773_v23, %v2769_v33  ;;  %v2779_v52 = vrot.slane %v2777_v38, 5  ;;  %v3123_v11 = vld [vmem:[#allocation2 + $0x50] sm:$0x1]  ;;  %v6008_v2 = vrot.slane %v3121_v5, 9 }
 0x1d6   : > { %v5092_v54 = vpop.f32.mrf.mxu2  ;;  %2525 = vst [vmem:[#allocation3 + $0x158] sm:$0xf] %v2406_v9  ;;  %v6126_v51 = vld [vmem:[#allocation3 + $0xb0] sm:$0xf]  ;;  %v2629_v49 = vld [vmem:[#allocation2 + $0x58] sm:$0xf] }
 0x1d7   : > { %5578 = vmatmul.bf16.gmra.mxu0 %v6091_v29  ;;  %v8384_v12 = vadd.f32 %v5092_v54, %v5004_v44  ;;  %v2403_v29 = vsel %vm7809_vm13, %v5992_v17, %v2402_v58  ;;  %v2770_v44 = vsel %vm7815_vm14, %v2765_v35, %v2769_v33  ;;  %v3238_v58 = vrot.slane %v3123_v11, 5  ;;  %2589 = vst [vmem:[#allocation3 + $0x138] sm:$0xf] %v2557_v59  ;;  %v6920_v9 = vld [vmem:[#allocation3 + $0xf4] sm:$0xf] }
 0x1d8   : > { %2524 = vst [vmem:[#allocation3 + $0x134] sm:$0xf] %v2403_v29  ;;  %v3236_v41 = vsel %vm7809_vm13, %v6008_v2, %v3235_v53  ;;  %v3237_v33 = vrot.slane %v3235_v53, 4  ;;  %v2791_v5 = vshll.u32 %v2629_v49, 16  ;;  %v2292_v2 = vld [vmem:[#allocation2 + $0x4c] sm:$0xf] }
 0x1d9   : > { %8885 = vst [vmem:[#allocation30_spill] sm:$0xff] %v8384_v12  ;;  %v5268_v10 = vpop.f32.mrf.mxu0  ;;  %v2795_v53 = vshrl.u32 %v2629_v49, 16 }
 0x1da   : > { %v5006_v54 = vpop.f32.mrf.mxu1  ;;  %v8392_v22 = vadd.f32 %v5268_v10, %v5180_v32  ;;  %2590 = vst [vmem:[#allocation3 + $0x15c] sm:$0xf] %v2558_v37  ;;  %v6916_v32 = vld [vmem:[#allocation3 + $0xd0] sm:$0xf0]  ;;  %v3239_v45 = vsel %vm7809_vm13, %v3237_v33, %v3238_v58  ;;  %v8888_v58 = vld [vmem:[#allocation21_spill] sm:$0xff] }
 0x1db   : > { %5494 = vmatmul.bf16.gmra.mxu3 %v6123_v21  ;;  %v2775_v21 = vrot.slane %v2774_v57, 4  ;;  %v5007_v17 = vadd.f32 %v5006_v54, %v8017_v14  ;;  %3085 = vst [vmem:[#allocation3 + $0x13c] sm:$0xf] %v2770_v44  ;;  %v2628_v14 = vld [vmem:[#allocation2 + $0x54] sm:$0xf]  ;;  %v6127_v59 = vor.u32 %v6916_v32, %v6126_v51 }
 0x1dc   : > { %8886 = vst [vmem:[#allocation31_spill] sm:$0xff] %v8392_v22  ;;  %v5184_v35 = vpop.f32.mrf.mxu3  ;;  %v2785_v29 = vshll.u32 %v2628_v14, 16  ;;  %v6156_v44 = vld [vmem:[#allocation3 + $0x114] sm:$0xf0]  ;;  %v2291_v51 = vld [vmem:[#allocation2 + $0x48] sm:$0xe] }
 0x1dd   : > { %5410 = vmatmul.bf16.gmra.mxu2 %v6155_v63  ;;  %v2780_v23 = vsel %vm7815_vm14, %v2775_v21, %v2779_v52  ;;  %3357 = vst [vmem:[#allocation3 + $0x140] sm:$0xf] %v3236_v41  ;;  %v2782_v63 = vshrl.u32 %v2628_v14, 16  ;;  %v2630_v41 = vld [vmem:[#allocation2 + $0x5c] sm:$0x1] }
 0x1de   : > { %v5095_v62 = vpop.f32.mrf.mxu2  ;;  %3086 = vst [vmem:[#allocation3 + $0x160] sm:$0xf] %v2780_v23  ;;  %v2787_v11 = vrot.slane %v2785_v29, 5  ;;  %v6190_v54 = vld [vmem:[#allocation3 + $0x138] sm:$0xf]  ;;  %v5993_v29 = vrot.slane %v2291_v51, 9 }
 0x1df   : > { %v5096_v10 = vadd.f32 %v5095_v62, %v5007_v17  ;;  %5321 = vmatmul.bf16.gmra.mxu1 %v6151_v34  ;;  %3358 = vst [vmem:[#allocation3 + $0x164] sm:$0xf] %v3239_v45  ;;  %v2784_v52 = vrot.slane %v2782_v63, 4  ;;  %v2409_v17 = vrot.slane %v2292_v2, 5  ;;  %v6159_v62 = vor.u32 %v6920_v9, %v6156_v44  ;;  %v2293_v32 = vld [vmem:[#allocation2 + $0x50] sm:$0x1] }
 0x1e0   : > { %v6928_v14 = vld [vmem:[#allocation3 + $0x134] sm:$0xf]  ;;  %v6184_v63 = vld [vmem:[#allocation3 + $0x154] sm:$0xf0]  ;;  %v2801_v2 = vshll.u32 %v2630_v41, 16 }
 0x1e1   : > { %v5185_v38 = vadd.f32 %v5184_v35, %v5096_v10  ;;  %v8401_v37 = vpop.f32.mrf.mxu0  ;;  %v6933_v21 = vld [vmem:[#allocation3 + $0x158] sm:$0xf0]  ;;  %v2788_v33 = vor.u32 %v2787_v11, %v2784_v52  ;;  %v2793_v10 = vrot.slane %v2791_v5, 5  ;;  %v2411_v49 = vrot.slane %v2409_v17, 4  ;;  %v3125_v22 = vld [vmem:[#allocation2 + $0x58] sm:$0xf] }
 0x1e2   : > { %8887 = vst [vmem:[#allocation32_spill] sm:$0xff] %v8401_v37  ;;  %v5008_v57 = vpop.f32.mrf.mxu1  ;;  %v2412_v37 = vrot.slane %v2293_v32, 5  ;;  %v6191_v52 = vor.u32 %v6933_v21, %v6190_v54  ;;  %v2559_v9 = vld [vmem:[#allocation2 + $0x54] sm:$0xf]  ;;  %v2560_v44 = vld [vmem:[#allocation2 + $0x58] sm:$0xf]  ;;  %v6187_v32 = vor.u32 %v6928_v14, %v6184_v63 }
 0x1e3   : > { %v5009_v34 = vadd.f32 %v5008_v57, %v8888_v58  ;;  %v2789_v57 = vrot.slane %v2788_v33, 4  ;;  %v2797_v58 = vrot.slane %v2795_v53, 4  ;;  %v3124_v11 = vld [vmem:[#allocation2 + $0x54] sm:$0xe]  ;;  %v2803_v53 = vrot.slane %v2801_v2, 5 }
 0x1e4   : > { %v8404_v23 = vpop.f32.mrf.mxu3  ;;  %v2413_v5 = vsel %vm7809_vm13, %v2411_v49, %v2412_v37  ;;  %v3126_v41 = vld [vmem:[#allocation2 + $0x5c] sm:$0x1]  ;;  %v6009_v54 = vrot.slane %v3124_v11, 9  ;;  %v3242_v21 = vrot.slane %v3125_v22, 5  ;;  %2591 = vst [vmem:[#allocation3 + $0x180] sm:$0xf] %v2559_v9 }
 0x1e5   : > { %8889 = vst [vmem:[#allocation21_spill] sm:$0xff] %v8404_v23  ;;  %v2798_v33 = vor.u32 %v2797_v58, %v2793_v10  ;;  %v6162_v22 = vld [vmem:[#allocation3 + $0xf8] sm:$0xf]  ;;  %v2631_v63 = vld [vmem:[#allocation2 + $0x60] sm:$0xf] }
 0x1e6   : > { %v5097_v35 = vpop.f32.mrf.mxu2  ;;  %2527 = vst [vmem:[#allocation3 + $0x1a0] sm:$0xf] %v2413_v5  ;;  %v3243_v37 = vsel %vm7809_vm13, %v6009_v54, %v3242_v21  ;;  %v2632_v2 = vld [vmem:[#allocation2 + $0x64] sm:$0xf]  ;;  %v2809_v9 = vshll.u32 %v2631_v63, 16 }
 0x1e7   : > { %5583 = vmatmul.bf16.gmra.mxu0 %v6127_v59  ;;  %v8406_v45 = vadd.f32 %v5097_v35, %v5009_v34  ;;  %v2410_v59 = vsel %vm7809_vm13, %v5993_v29, %v2409_v17  ;;  %v2794_v34 = vsel %vm7815_vm14, %v2789_v57, %v2793_v10  ;;  %v3245_v17 = vrot.slane %v3126_v41, 5  ;;  %v8892_v29 = vld [vmem:[#allocation14_spill] sm:$0xff]  ;;  %2592 = vst [vmem:[#allocation3 + $0x1a4] sm:$0xf] %v2560_v44 }
 0x1e8   : > { %2526 = vst [vmem:[#allocation3 + $0x17c] sm:$0xf] %v2410_v59  ;;  %v3244_v10 = vrot.slane %v3242_v21, 4  ;;  %v2806_v59 = vshrl.u32 %v2631_v63, 16  ;;  %v2815_v5 = vshll.u32 %v2632_v2, 16  ;;  %v2811_v41 = vrot.slane %v2809_v9, 5 }
 0x1e9   : > { %8890 = vst [vmem:[#allocation33_spill] sm:$0xff] %v8406_v45  ;;  %v2295_v54 = vld [vmem:[#allocation2 + $0x58] sm:$0xf]  ;;  %v2819_v21 = vshrl.u32 %v2632_v2, 16 }
 0x1ea   : > { %v5273_v23 = vpop.f32.mrf.mxu0  ;;  %3087 = vst [vmem:[#allocation3 + $0x184] sm:$0xf] %v2794_v34  ;;  %v3246_v14 = vsel %vm7809_vm13, %v3244_v10, %v3245_v17  ;;  %v6929_v34 = vld [vmem:[#allocation3 + $0x13c] sm:$0xf]  ;;  %v8894_v17 = vld [vmem:[#allocation15_spill] sm:$0xff] }
 0x1eb   : > { %5499 = vmatmul.bf16.gmra.mxu3 %v6159_v62  ;;  %v5011_v35 = vpop.f32.mrf.mxu1  ;;  %v8414_v51 = vadd.f32 %v5273_v23, %v5185_v38  ;;  %v2799_v62 = vrot.slane %v2798_v33, 4  ;;  %v6925_v38 = vld [vmem:[#allocation3 + $0x118] sm:$0xf0]  ;;  %3359 = vst [vmem:[#allocation3 + $0x188] sm:$0xf] %v3243_v37  ;;  %v2821_v12 = vrot.slane %v2819_v21, 4 }
 0x1ec   : > { %v5012_v45 = vadd.f32 %v5011_v35, %v8892_v29  ;;  %v5189_v57 = vpop.f32.mrf.mxu3  ;;  %3360 = vst [vmem:[#allocation3 + $0x1ac] sm:$0xf] %v3246_v14  ;;  %v6163_v44 = vor.u32 %v6925_v38, %v6162_v22  ;;  %v6192_v33 = vld [vmem:[#allocation3 + $0x15c] sm:$0xf0]  ;;  %v2416_v29 = vrot.slane %v2295_v54, 5 }
 0x1ed   : > { %8891 = vst [vmem:[#allocation34_spill] sm:$0xff] %v8414_v51  ;;  %5415 = vmatmul.bf16.gmra.mxu2 %v6191_v52  ;;  %v2804_v58 = vsel %vm7815_vm14, %v2799_v62, %v2803_v53  ;;  %v6226_v35 = vld [vmem:[#allocation3 + $0x180] sm:$0xf]  ;;  %v2633_v37 = vld [vmem:[#allocation2 + $0x68] sm:$0x1] }
 0x1ee   : > { %3088 = vst [vmem:[#allocation3 + $0x1a8] sm:$0xf] %v2804_v58  ;;  %v6942_v62 = vld [vmem:[#allocation3 + $0x1a0] sm:$0xf0]  ;;  %v2294_v22 = vld [vmem:[#allocation2 + $0x54] sm:$0xe] }
 0x1ef   : > { %v5100_v49 = vpop.f32.mrf.mxu2  ;;  %5326 = vmatmul.bf16.gmra.mxu1 %v6187_v32  ;;  %v2296_v38 = vld [vmem:[#allocation2 + $0x5c] sm:$0x1]  ;;  %v6937_v63 = vld [vmem:[#allocation3 + $0x17c] sm:$0xf]  ;;  %v5994_v9 = vrot.slane %v2294_v22, 9  ;;  %v6227_v54 = vor.u32 %v6942_v62, %v6226_v35 }
 0x1f0   : > { %v5101_v23 = vadd.f32 %v5100_v49, %v5012_v45  ;;  %v2808_v45 = vrot.slane %v2806_v59, 4  ;;  %v6195_v49 = vor.u32 %v6929_v34, %v6192_v33  ;;  %v6220_v59 = vld [vmem:[#allocation3 + $0x19c] sm:$0xf0]  ;;  %v2419_v51 = vrot.slane %v2296_v38, 5  ;;  %v2561_v34 = vld [vmem:[#allocation2 + $0x60] sm:$0xf] }
 0x1f1   : > { %v2562_v33 = vld [vmem:[#allocation2 + $0x64] sm:$0xf]  ;;  %2593 = vst [vmem:[#allocation3 + $0x1c8] sm:$0xf] %v2561_v34 }
 0x1f2   : > { %v5190_v52 = vadd.f32 %v5189_v57, %v5101_v23  ;;  %v8423_v11 = vpop.f32.mrf.mxu0  ;;  %v2812_v10 = vor.u32 %v2811_v41, %v2808_v45  ;;  %v2817_v23 = vrot.slane %v2815_v5, 5  ;;  %v3127_v45 = vld [vmem:[#allocation2 + $0x60] sm:$0xe]  ;;  %2594 = vst [vmem:[#allocation3 + $0x1ec] sm:$0xf] %v2562_v33 }
 0x1f3   : > { %8893 = vst [vmem:[#allocation14_spill] sm:$0xff] %v8423_v11  ;;  %v5013_v53 = vpop.f32.mrf.mxu1  ;;  %v2418_v11 = vrot.slane %v2416_v29, 4 }
 0x1f4   : > { %v5014_v32 = vadd.f32 %v5013_v53, %v8894_v17  ;;  %v5191_v58 = vpop.f32.mrf.mxu3  ;;  %v2813_v2 = vrot.slane %v2812_v10, 4  ;;  %v2825_v53 = vshll.u32 %v2633_v37, 16  ;;  %v3128_v17 = vld [vmem:[#allocation2 + $0x64] sm:$0xf]  ;;  %v2822_v41 = vor.u32 %v2821_v12, %v2817_v23 }
 0x1f5   : > { %v2420_v5 = vsel %vm7809_vm13, %v2418_v11, %v2419_v51  ;;  %v6010_v37 = vrot.slane %v3127_v45, 9  ;;  %v3249_v35 = vrot.slane %v3128_v17, 5 }
 0x1f6   : > { %2529 = vst [vmem:[#allocation3 + $0x1e8] sm:$0xf] %v2420_v5  ;;  %v2818_v21 = vsel %vm7815_vm14, %v2813_v2, %v2817_v23  ;;  %v2823_v22 = vrot.slane %v2822_v41, 4  ;;  %v6934_v2 = vld [vmem:[#allocation3 + $0x160] sm:$0xf0] }
 0x1f7   : > { %5588 = vmatmul.bf16.gmra.mxu0 %v6163_v44  ;;  %v5102_v57 = vpop.f32.mrf.mxu2  ;;  %v2417_v44 = vsel %vm7809_vm13, %v5994_v9, %v2416_v29  ;;  %v6223_v29 = vor.u32 %v6937_v63, %v6220_v59  ;;  %v3250_v51 = vsel %vm7809_vm13, %v6010_v37, %v3249_v35  ;;  %v3251_v12 = vrot.slane %v3249_v35, 4  ;;  %3089 = vst [vmem:[#allocation3 + $0x1cc] sm:$0xf] %v2818_v21  ;;  %v6198_v9 = vld [vmem:[#allocation3 + $0x140] sm:$0xf] }
 0x1f8   : > { %v5103_v14 = vadd.f32 %v5102_v57, %v5014_v32  ;;  %2528 = vst [vmem:[#allocation3 + $0x1c4] sm:$0xf] %v2417_v44  ;;  %v2827_v32 = vrot.slane %v2825_v53, 5  ;;  %v3129_v57 = vld [vmem:[#allocation2 + $0x68] sm:$0x1]  ;;  %v6199_v45 = vor.u32 %v6934_v2, %v6198_v9 }
 0x1f9   : > { %v3252_v62 = vrot.slane %v3129_v57, 5  ;;  %v8896_v53 = vld [vmem:[#allocation16_spill] sm:$0xff]  ;;  %3361 = vst [vmem:[#allocation3 + $0x1d0] sm:$0xf] %v3250_v51  ;;  %v2635_v44 = vld [vmem:[#allocation2 + $0x70] sm:$0xf] }
 0x1fa   : > { %v2828_v23 = vsel %vm7815_vm14, %v2823_v22, %v2827_v32  ;;  %v5192_v5 = vadd.f32 %v5191_v58, %v5103_v14  ;;  %v2839_v41 = vshll.u32 %v2635_v44, 16  ;;  %v6938_v32 = vld [vmem:[#allocation3 + $0x184] sm:$0xf]  ;;  %v6228_v57 = vld [vmem:[#allocation3 + $0x1a4] sm:$0xf0] }
 0x1fb   : > { %5504 = vmatmul.bf16.gmra.mxu3 %v6195_v49  ;;  %v5278_v10 = vpop.f32.mrf.mxu0  ;;  %3090 = vst [vmem:[#allocation3 + $0x1f0] sm:$0xf] %v2828_v23  ;;  %v3253_v59 = vsel %vm7809_vm13, %v3251_v12, %v3252_v62  ;;  %v6262_v22 = vld [vmem:[#allocation3 + $0x1c8] sm:$0xf]  ;;  %v2298_v62 = vld [vmem:[#allocation2 + $0x64] sm:$0xf] }
 0x1fc   : > { %v5016_v38 = vpop.f32.mrf.mxu1  ;;  %v8434_v11 = vadd.f32 %v5278_v10, %v5190_v52  ;;  %v5194_v49 = vpop.f32.mrf.mxu3  ;;  %3362 = vst [vmem:[#allocation3 + $0x1f4] sm:$0xf] %v3253_v59  ;;  %v6951_v51 = vld [vmem:[#allocation3 + $0x1e8] sm:$0xf0]  ;;  %v2423_v12 = vrot.slane %v2298_v62, 5  ;;  %v2841_v14 = vrot.slane %v2839_v41, 5 }
 0x1fd   : > { %5420 = vmatmul.bf16.gmra.mxu2 %v6227_v54  ;;  %v5017_v63 = vadd.f32 %v5016_v38, %v8896_v53  ;;  %v2634_v54 = vld [vmem:[#allocation2 + $0x6c] sm:$0xf]  ;;  %v2636_v23 = vld [vmem:[#allocation2 + $0x74] sm:$0x1]  ;;  %v2297_v9 = vld [vmem:[#allocation2 + $0x60] sm:$0xe] }
 0x1fe   : > { %8895 = vst [vmem:[#allocation15_spill] sm:$0xff] %v8434_v11  ;;  %v2830_v34 = vshrl.u32 %v2634_v54, 16  ;;  %v2833_v33 = vshll.u32 %v2634_v54, 16  ;;  %v2299_v58 = vld [vmem:[#allocation2 + $0x68] sm:$0x1]  ;;  %v2849_v28 = vshll.u32 %v2636_v23, 16 }
 0x1ff   : > { %5331 = vmatmul.bf16.gmra.mxu1 %v6223_v29  ;;  %v2843_v29 = vshrl.u32 %v2635_v44, 16  ;;  %v6946_v54 = vld [vmem:[#allocation3 + $0x1c4] sm:$0xf]  ;;  %v6256_v11 = vld [vmem:[#allocation3 + $0x1e4] sm:$0xf0] }
 0x200   : > { %v5105_v17 = vpop.f32.mrf.mxu2  ;;  %v2832_v37 = vrot.slane %v2830_v34, 4  ;;  %v2835_v35 = vrot.slane %v2833_v33, 5  ;;  %v2425_v34 = vrot.slane %v2423_v12, 4  ;;  %v2426_v33 = vrot.slane %v2299_v58, 5  ;;  %v2563_v41 = vld [vmem:[#allocation2 + $0x6c] sm:$0xf] }
 0x201   : > { %v5106_v52 = vadd.f32 %v5105_v17, %v5017_v63  ;;  %v6231_v63 = vor.u32 %v6938_v32, %v6228_v57  ;;  %v2845_v62 = vrot.slane %v2843_v29, 4  ;;  %v2564_v57 = vld [vmem:[#allocation2 + $0x70] sm:$0xf]  ;;  %v3132_v29 = vld [vmem:[#allocation2 + $0x74] sm:$0x1]  ;;  %v6259_v23 = vor.u32 %v6946_v54, %v6256_v11 }
 0x202   : > { %v2836_v53 = vor.u32 %v2835_v35, %v2832_v37  ;;  %v3130_v35 = vld [vmem:[#allocation2 + $0x6c] sm:$0xe]  ;;  %2595 = vst [vmem:[#allocation3 + $0x210] sm:$0xf] %v2563_v41 }
 0x203   : > { %v5195_v21 = vadd.f32 %v5194_v49, %v5106_v52  ;;  %v5280_v10 = vpop.f32.mrf.mxu0  ;;  %v8898_v49 = vld [vmem:[#allocation17_spill] sm:$0xff]  ;;  %v5995_v52 = vrot.slane %v2297_v9, 9  ;;  %v6011_v58 = vrot.slane %v3130_v35, 9  ;;  %2596 = vst [vmem:[#allocation3 + $0x234] sm:$0xf] %v2564_v57 }
 0x204   : > { %v5018_v38 = vpop.f32.mrf.mxu1  ;;  %v5196_v59 = vpop.f32.mrf.mxu3  ;;  %v8441_v2 = vadd.f32 %v5280_v10, %v5192_v5  ;;  %v2837_v47 = vrot.slane %v2836_v53, 4  ;;  %v2427_v5 = vsel %vm7809_vm13, %v2425_v34, %v2426_v33  ;;  %v2846_v10 = vor.u32 %v2845_v62, %v2841_v14  ;;  %v3131_v9 = vld [vmem:[#allocation2 + $0x70] sm:$0xf]  ;;  %v8900_v33 = vld [vmem:[#allocation18_spill] sm:$0xff]  ;;  %v6947_v35 = vld [vmem:[#allocation3 + $0x1cc] sm:$0xf] }
 0x205   : > { %v5019_v17 = vadd.f32 %v5018_v38, %v8898_v49  ;;  %v2424_v32 = vsel %vm7809_vm13, %v5995_v52, %v2423_v12  ;;  %v2851_v38 = vrot.slane %v2849_v28, 5  ;;  %2531 = vst [vmem:[#allocation3 + $0x230] sm:$0xf] %v2427_v5 }
 0x206   : > { %8897 = vst [vmem:[#allocation16_spill] sm:$0xff] %v8441_v2  ;;  %v2847_v49 = vrot.slane %v2846_v10, 4  ;;  %v6264_v10 = vld [vmem:[#allocation3 + $0x1ec] sm:$0xf0] }
 0x207   : > { %5593 = vmatmul.bf16.gmra.mxu0 %v6199_v45  ;;  %v6263_v45 = vor.u32 %v6951_v51, %v6262_v22  ;;  %2530 = vst [vmem:[#allocation3 + $0x20c] sm:$0xf] %v2424_v32  ;;  %v2842_v22 = vsel %vm7815_vm14, %v2837_v47, %v2841_v14  ;;  %v3256_v51 = vrot.slane %v3131_v9, 5  ;;  %v6234_v47 = vld [vmem:[#allocation3 + $0x188] sm:$0xf] }
 0x208   : > { %v5107_v44 = vpop.f32.mrf.mxu2  ;;  %3091 = vst [vmem:[#allocation3 + $0x214] sm:$0xf] %v2842_v22  ;;  %v6943_v14 = vld [vmem:[#allocation3 + $0x1a8] sm:$0xf0] }
 0x209   : > { %v5108_v37 = vadd.f32 %v5107_v44, %v5019_v17  ;;  %v3259_v17 = vrot.slane %v3132_v29, 5  ;;  %v3257_v28 = vsel %vm7809_vm13, %v6011_v58, %v3256_v51  ;;  %v6235_v41 = vor.u32 %v6943_v14, %v6234_v47  ;;  %v6298_v29 = vld [vmem:[#allocation3 + $0x210] sm:$0xf] }
 0x20a   : > { %3363 = vst [vmem:[#allocation3 + $0x218] sm:$0xf] %v3257_v28 }
 0x20b   : > { %5509 = vmatmul.bf16.gmra.mxu3 %v6231_v63  ;;  %v5197_v53 = vadd.f32 %v5196_v59, %v5108_v37  ;;  %v5283_v12 = vpop.f32.mrf.mxu0  ;;  %v3258_v63 = vrot.slane %v3256_v51, 4  ;;  %v2852_v59 = vsel %vm7815_vm14, %v2847_v49, %v2851_v38  ;;  %v2637_v37 = vld [vmem:[#allocation2 + $0x78] sm:$0xf]  ;;  %v2301_v51 = vld [vmem:[#allocation2 + $0x70] sm:$0xf] }
 0x20c   : > { %v5021_v52 = vpop.f32.mrf.mxu1  ;;  %v8452_v34 = vadd.f32 %v5283_v12, %v5195_v21  ;;  %3092 = vst [vmem:[#allocation3 + $0x238] sm:$0xf] %v2852_v59  ;;  %v5199_v62 = vpop.f32.mrf.mxu3  ;;  %v2854_v32 = vshrl.u32 %v2637_v37, 16  ;;  %v2857_v5 = vshll.u32 %v2637_v37, 16  ;;  %v6960_v49 = vld [vmem:[#allocation3 + $0x230] sm:$0xf0] }
 0x20d   : > { %5425 = vmatmul.bf16.gmra.mxu2 %v6263_v45  ;;  %v5022_v11 = vadd.f32 %v5021_v52, %v8900_v33  ;;  %v3260_v54 = vsel %vm7809_vm13, %v3258_v63, %v3259_v17  ;;  %v2638_v45 = vld [vmem:[#allocation2 + $0x7c] sm:$0xf]  ;;  %v2430_v17 = vrot.slane %v2301_v51, 5  ;;  %v2639_v52 = vld [vmem:[#allocation2 + $0x80] sm:$0x1]  ;;  %v6267_v63 = vor.u32 %v6947_v35, %v6264_v10 }
 0x20e   : > { %8899 = vst [vmem:[#allocation17_spill] sm:$0xff] %v8452_v34  ;;  %v2863_v57 = vshll.u32 %v2638_v45, 16  ;;  %v2856_v9 = vrot.slane %v2854_v32, 4  ;;  %v2859_v58 = vrot.slane %v2857_v5, 5  ;;  %v2867_v12 = vshrl.u32 %v2638_v45, 16 }
 0x20f   : > { %5336 = vmatmul.bf16.gmra.mxu1 %v6259_v23  ;;  %3364 = vst [vmem:[#allocation3 + $0x23c] sm:$0xf] %v3260_v54  ;;  %v2300_v59 = vld [vmem:[#allocation2 + $0x6c] sm:$0xe]  ;;  %v2302_v33 = vld [vmem:[#allocation2 + $0x74] sm:$0x1] }
 0x210   : > { %v5110_v44 = vpop.f32.mrf.mxu2  ;;  %v2860_v28 = vor.u32 %v2859_v58, %v2856_v9  ;;  %v2865_v47 = vrot.slane %v2863_v57, 5  ;;  %v2432_v37 = vrot.slane %v2430_v17, 4  ;;  %v6292_v45 = vld [vmem:[#allocation3 + $0x22c] sm:$0xf0]  ;;  %v2869_v34 = vrot.slane %v2867_v12, 4 }
 0x211   : > { %v5111_v21 = vadd.f32 %v5110_v44, %v5022_v11  ;;  %v8902_v11 = vld [vmem:[#allocation19_spill] sm:$0xff]  ;;  %v2873_v51 = vshll.u32 %v2639_v52, 16  ;;  %v6299_v9 = vor.u32 %v6960_v49, %v6298_v29  ;;  %v2565_v57 = vld [vmem:[#allocation2 + $0x78] sm:$0xf]  ;;  %v2566_v35 = vld [vmem:[#allocation2 + $0x7c] sm:$0xf] }
 0x212   : > { %v6955_v44 = vld [vmem:[#allocation3 + $0x20c] sm:$0xf]  ;;  %v2861_v5 = vrot.slane %v2860_v28, 4  ;;  %v3133_v10 = vld [vmem:[#allocation2 + $0x78] sm:$0xe] }
 0x213   : > { %v5200_v38 = vadd.f32 %v5199_v62, %v5111_v21  ;;  %v5285_v22 = vpop.f32.mrf.mxu0  ;;  %v5996_v62 = vrot.slane %v2300_v59, 9  ;;  %v2433_v21 = vrot.slane %v2302_v33, 5  ;;  %v3134_v59 = vld [vmem:[#allocation2 + $0x7c] sm:$0xf]  ;;  %v6012_v28 = vrot.slane %v3133_v10, 9 }
 0x214   : > { %v5023_v23 = vpop.f32.mrf.mxu1  ;;  %v8459_v14 = vadd.f32 %v5285_v22, %v5197_v53  ;;  %v5201_v58 = vpop.f32.mrf.mxu3  ;;  %v2870_v22 = vor.u32 %v2869_v34, %v2865_v47  ;;  %v2866_v29 = vsel %vm7815_vm14, %v2861_v5, %v2865_v47  ;;  %v3135_v49 = vld [vmem:[#allocation2 + $0x80] sm:$0x1]  ;;  %v6295_v33 = vor.u32 %v6955_v44, %v6292_v45  ;;  %2597 = vst [vmem:[#allocation3 + $0x258] sm:$0xf] %v2565_v57  ;;  %v6270_v47 = vld [vmem:[#allocation3 + $0x1d0] sm:$0xf] }
 0x215   : > { %v5024_v54 = vadd.f32 %v5023_v23, %v8902_v11  ;;  %v2434_v53 = vsel %vm7809_vm13, %v2432_v37, %v2433_v21  ;;  %v2875_v23 = vrot.slane %v2873_v51, 5  ;;  %2598 = vst [vmem:[#allocation3 + $0x27c] sm:$0xf] %v2566_v35  ;;  %v6952_v21 = vld [vmem:[#allocation3 + $0x1f0] sm:$0xf0] }
 0x216   : > { %8901 = vst [vmem:[#allocation18_spill] sm:$0xff] %v8459_v14  ;;  %v2871_v11 = vrot.slane %v2870_v22, 4  ;;  %v2640_v51 = vld [vmem:[#allocation2 + $0x84] sm:$0xf]  ;;  %v6271_v57 = vor.u32 %v6952_v21, %v6270_v47  ;;  %v6956_v35 = vld [vmem:[#allocation3 + $0x214] sm:$0xf] }
 0x217   : > { %5598 = vmatmul.bf16.gmra.mxu0 %v6235_v41  ;;  %v2431_v41 = vsel %vm7809_vm13, %v5996_v62, %v2430_v17  ;;  %2533 = vst [vmem:[#allocation3 + $0x278] sm:$0xf] %v2434_v53  ;;  %v3263_v17 = vrot.slane %v3134_v59, 5  ;;  %v2881_v53 = vshll.u32 %v2640_v51, 16  ;;  %v6300_v10 = vld [vmem:[#allocation3 + $0x234] sm:$0xf0] }
 0x218   : > { %v5112_v32 = vpop.f32.mrf.mxu2  ;;  %2532 = vst [vmem:[#allocation3 + $0x254] sm:$0xf] %v2431_v41  ;;  %v2304_v59 = vld [vmem:[#allocation2 + $0x7c] sm:$0xf]  ;;  %v2303_v21 = vld [vmem:[#allocation2 + $0x78] sm:$0xe] }
 0x219   : > { %v5113_v2 = vadd.f32 %v5112_v32, %v5024_v54  ;;  %v3266_v54 = vrot.slane %v3135_v49, 5  ;;  %v3264_v34 = vsel %vm7809_vm13, %v6012_v28, %v3263_v17  ;;  %3093 = vst [vmem:[#allocation3 + $0x25c] sm:$0xf] %v2866_v29  ;;  %v8904_v32 = vld [vmem:[#allocation20_spill] sm:$0xff]  ;;  %v2883_v22 = vrot.slane %v2881_v53, 5 }
 0x21a   : > { %3365 = vst [vmem:[#allocation3 + $0x260] sm:$0xf] %v3264_v34  ;;  %v2437_v49 = vrot.slane %v2304_v59, 5  ;;  %v3139_v14 = vld [vmem:[#allocation2 + $0x90] sm:$0xe] }
 0x21b   : > { %5514 = vmatmul.bf16.gmra.mxu3 %v6267_v63  ;;  %v5202_v12 = vadd.f32 %v5201_v58, %v5113_v2  ;;  %v5288_v52 = vpop.f32.mrf.mxu0  ;;  %v3265_v63 = vrot.slane %v3263_v17, 4  ;;  %v2876_v2 = vsel %vm7815_vm14, %v2871_v11, %v2875_v23  ;;  %v6334_v11 = vld [vmem:[#allocation3 + $0x258] sm:$0xf] }
 0x21c   : > { %v5026_v62 = vpop.f32.mrf.mxu1  ;;  %v8470_v37 = vadd.f32 %v5288_v52, %v5200_v38  ;;  %3094 = vst [vmem:[#allocation3 + $0x280] sm:$0xf] %v2876_v2  ;;  %v2878_v38 = vshrl.u32 %v2640_v51, 16  ;;  %v5997_v51 = vrot.slane %v2303_v21, 9 }
 0x21d   : > { %5430 = vmatmul.bf16.gmra.mxu2 %v6299_v9  ;;  %v5027_v44 = vadd.f32 %v5026_v62, %v8904_v32  ;;  %v3267_v45 = vsel %vm7809_vm13, %v3265_v63, %v3266_v54  ;;  %v2641_v9 = vld [vmem:[#allocation2 + $0x88] sm:$0xf]  ;;  %v6969_v54 = vld [vmem:[#allocation3 + $0x278] sm:$0xf0]  ;;  %v2642_v62 = vld [vmem:[#allocation2 + $0x8c] sm:$0x1] }
 0x21e   : > { %8903 = vst [vmem:[#allocation19_spill] sm:$0xff] %v8470_v37  ;;  %v2880_v58 = vrot.slane %v2878_v38, 4  ;;  %v2887_v23 = vshll.u32 %v2641_v9, 16  ;;  %v2891_v52 = vshrl.u32 %v2641_v9, 16  ;;  %v8906_v63 = vld [vmem:[#allocation22_spill] sm:$0xff]  ;;  %v2439_v38 = vrot.slane %v2437_v49, 4 }
 0x21f   : > { %5341 = vmatmul.bf16.gmra.mxu1 %v6295_v33  ;;  %3366 = vst [vmem:[#allocation3 + $0x284] sm:$0xf] %v3267_v45  ;;  %v6303_v33 = vor.u32 %v6956_v35, %v6300_v10  ;;  %v6964_v47 = vld [vmem:[#allocation3 + $0x254] sm:$0xf]  ;;  %v2305_v32 = vld [vmem:[#allocation2 + $0x80] sm:$0x1] }
 0x220   : > { %v5115_v5 = vpop.f32.mrf.mxu2  ;;  %v2884_v17 = vor.u32 %v2883_v22, %v2880_v58  ;;  %v2440_v53 = vrot.slane %v2305_v32, 5  ;;  %v2567_v35 = vld [vmem:[#allocation2 + $0x84] sm:$0xf]  ;;  %v2568_v10 = vld [vmem:[#allocation2 + $0x88] sm:$0xf]  ;;  %v2893_v22 = vrot.slane %v2891_v52, 4 }
 0x221   : > { %v5116_v41 = vadd.f32 %v5115_v5, %v5027_v44  ;;  %v2889_v44 = vrot.slane %v2887_v23, 5  ;;  %v6328_v5 = vld [vmem:[#allocation3 + $0x274] sm:$0xf0]  ;;  %v2897_v59 = vshll.u32 %v2642_v62, 16  ;;  %2599 = vst [vmem:[#allocation3 + $0x2a0] sm:$0xf] %v2567_v35 }
 0x222   : > { %v2885_v58 = vrot.slane %v2884_v17, 4  ;;  %v3136_v23 = vld [vmem:[#allocation2 + $0x84] sm:$0xe]  ;;  %v6331_v52 = vor.u32 %v6964_v47, %v6328_v5  ;;  %2600 = vst [vmem:[#allocation3 + $0x2c4] sm:$0xf] %v2568_v10 }
 0x223   : > { %v5290_v28 = vpop.f32.mrf.mxu0 }
 0x224   : > { %v5028_v29 = vpop.f32.mrf.mxu1  ;;  %v8477_v34 = vadd.f32 %v5290_v28, %v5202_v12  ;;  %v2438_v12 = vsel %vm7809_vm13, %v5997_v51, %v2437_v49  ;;  %v2441_v28 = vsel %vm7809_vm13, %v2439_v38, %v2440_v53  ;;  %v2890_v17 = vsel %vm7815_vm14, %v2885_v58, %v2889_v44  ;;  %v6961_v53 = vld [vmem:[#allocation3 + $0x238] sm:$0xf0] }
 0x225   : > { %v5029_v2 = vadd.f32 %v5028_v29, %v8906_v63  ;;  %v3137_v29 = vld [vmem:[#allocation2 + $0x88] sm:$0xf]  ;;  %2534 = vst [vmem:[#allocation3 + $0x29c] sm:$0xf] %v2438_v12  ;;  %v2894_v63 = vor.u32 %v2893_v22, %v2889_v44  ;;  %v6306_v44 = vld [vmem:[#allocation3 + $0x218] sm:$0xf] }
 0x226   : > { %8905 = vst [vmem:[#allocation20_spill] sm:$0xff] %v8477_v34  ;;  %v6307_v22 = vor.u32 %v6961_v53, %v6306_v44  ;;  %v2306_v53 = vld [vmem:[#allocation2 + $0x84] sm:$0xe] }
 0x227   : > { %5603 = vmatmul.bf16.gmra.mxu0 %v6271_v57  ;;  %v6335_v57 = vor.u32 %v6969_v54, %v6334_v11  ;;  %v2899_v11 = vrot.slane %v2897_v59, 5  ;;  %v3138_v54 = vld [vmem:[#allocation2 + $0x8c] sm:$0x1]  ;;  %2535 = vst [vmem:[#allocation3 + $0x2c0] sm:$0xf] %v2441_v28  ;;  %v2895_v32 = vrot.slane %v2894_v63, 4 }
 0x228   : > { %v5117_v45 = vpop.f32.mrf.mxu2  ;;  %v3273_v62 = vrot.slane %v3138_v54, 5  ;;  %3095 = vst [vmem:[#allocation3 + $0x2a4] sm:$0xf] %v2890_v17  ;;  %v6965_v28 = vld [vmem:[#allocation3 + $0x25c] sm:$0xf] }
 0x229   : > { %v5118_v9 = vadd.f32 %v5117_v45, %v5029_v2  ;;  %v6013_v2 = vrot.slane %v3136_v23, 9  ;;  %v2900_v47 = vsel %vm7815_vm14, %v2895_v32, %v2899_v11  ;;  %v6336_v23 = vld [vmem:[#allocation3 + $0x27c] sm:$0xf0]  ;;  %v2307_v11 = vld [vmem:[#allocation2 + $0x88] sm:$0xf] }
 0x22a   : > { %3096 = vst [vmem:[#allocation3 + $0x2c8] sm:$0xf] %v2900_v47  ;;  %v6370_v63 = vld [vmem:[#allocation3 + $0x2a0] sm:$0xf]  ;;  %v6339_v44 = vor.u32 %v6965_v28, %v6336_v23  ;;  %v2308_v47 = vld [vmem:[#allocation2 + $0x8c] sm:$0x1] }
 0x22b   : > { %5519 = vmatmul.bf16.gmra.mxu3 %v6303_v33  ;;  %v3270_v33 = vrot.slane %v3137_v29, 5  ;;  %v2645_v32 = vld [vmem:[#allocation2 + $0x98] sm:$0x1]  ;;  %v2447_v34 = vrot.slane %v2308_v47, 5  ;;  %v2570_v28 = vld [vmem:[#allocation2 + $0x94] sm:$0xf] }
 0x22c   : > { %v8486_v49 = vpop.f32.mrf.mxu1  ;;  %v2921_v37 = vshll.u32 %v2645_v32, 16  ;;  %2602 = vst [vmem:[#allocation3 + $0x30c] sm:$0xf] %v2570_v28 }
 0x22d   : > { %5435 = vmatmul.bf16.gmra.mxu2 %v6335_v57  ;;  %v3271_v51 = vsel %vm7809_vm13, %v6013_v2, %v3270_v33  ;;  %v3272_v38 = vrot.slane %v3270_v33, 4  ;;  %v2643_v57 = vld [vmem:[#allocation2 + $0x90] sm:$0xf] }
 0x22e   : > { %v5204_v21 = vpop.f32.mrf.mxu3  ;;  %3367 = vst [vmem:[#allocation3 + $0x2a8] sm:$0xf] %v3271_v51  ;;  %v2902_v35 = vshrl.u32 %v2643_v57, 16  ;;  %v2905_v10 = vshll.u32 %v2643_v57, 16  ;;  %v6973_v57 = vld [vmem:[#allocation3 + $0x29c] sm:$0xf] }
 0x22f   : > { %v5205_v45 = vadd.f32 %v5204_v21, %v5116_v41  ;;  %5346 = vmatmul.bf16.gmra.mxu1 %v6331_v52  ;;  %v3274_v58 = vsel %vm7809_vm13, %v3272_v38, %v3273_v62  ;;  %v2644_v41 = vld [vmem:[#allocation2 + $0x94] sm:$0xf]  ;;  %v6978_v62 = vld [vmem:[#allocation3 + $0x2c0] sm:$0xf0]  ;;  %v2444_v21 = vrot.slane %v2307_v11, 5 }
 0x230   : > { %v8492_v5 = vpop.f32.mrf.mxu2  ;;  %3368 = vst [vmem:[#allocation3 + $0x2cc] sm:$0xf] %v3274_v58  ;;  %v2911_v59 = vshll.u32 %v2644_v41, 16  ;;  %v2904_v29 = vrot.slane %v2902_v35, 4  ;;  %v2907_v17 = vrot.slane %v2905_v10, 5  ;;  %v2915_v54 = vshrl.u32 %v2644_v41, 16 }
 0x231   : > { %v5998_v35 = vrot.slane %v2306_v53, 9  ;;  %v2446_v10 = vrot.slane %v2444_v21, 4  ;;  %v6371_v31 = vor.u32 %v6978_v62, %v6370_v63  ;;  %v3141_v11 = vld [vmem:[#allocation2 + $0x98] sm:$0x1]  ;;  %v6974_v28 = vld [vmem:[#allocation3 + $0x2a4] sm:$0xf] }
 0x232   : > { %v2908_v51 = vor.u32 %v2907_v17, %v2904_v29  ;;  %v2913_v58 = vrot.slane %v2911_v59, 5  ;;  %v3140_v59 = vld [vmem:[#allocation2 + $0x94] sm:$0xf]  ;;  %v2923_v17 = vrot.slane %v2921_v37, 5  ;;  %v3280_v62 = vrot.slane %v3141_v11, 5 }
 0x233   : > { %v2445_v29 = vsel %vm7809_vm13, %v5998_v35, %v2444_v21  ;;  %v5308_v21 = vadd.f32 %v8486_v49, %v8085_v18  ;;  %v6342_v18 = vld [vmem:[#allocation3 + $0x260] sm:$0xf]  ;;  %v6970_v49 = vld [vmem:[#allocation3 + $0x280] sm:$0xf0]  ;;  %v2647_v35 = vld [vmem:[#allocation2 + $0xa0] sm:$0xf] }
 0x234   : > { %v5293_v12 = vpop.f32.mrf.mxu0  ;;  %v8498_v33 = vpop.f32.mrf.mxu1  ;;  %v2909_v41 = vrot.slane %v2908_v51, 4  ;;  %2536 = vst [vmem:[#allocation3 + $0x2e4] sm:$0xf] %v2445_v29  ;;  %v8526_v11 = vld [vmem:[%s8838_s2] ss:$0 sm:$0xff] }
 0x235   : > { %v8496_v2 = vadd.f32 %v5293_v12, %v5205_v45  ;;  %v6364_v12 = vld [vmem:[#allocation3 + $0x2bc] sm:$0xf0]  ;;  %v5397_v47 = vadd.f32 %v8492_v5, %v5308_v21  ;;  %v6343_v5 = vor.u32 %v6970_v49, %v6342_v18  ;;  %v5310_v29 = vadd.f32 %v8498_v33, %v8105_v43  ;;  %v2648_v33 = vld [vmem:[#allocation2 + $0xa4] sm:$0x1] }
 0x236   : > { %v5206_v52 = vpop.f32.mrf.mxu3  ;;  %v2914_v63 = vsel %vm7815_vm14, %v2909_v41, %v2913_v58 }
 0x237   : > { %8907 = vst [vmem:[#allocation22_spill] sm:$0xff] %v8496_v2  ;;  %5608 = vmatmul.bf16.gmra.mxu0 %v6307_v22  ;;  %v5207_v38 = vadd.f32 %v5206_v52, %v5118_v9  ;;  %v2917_v2 = vrot.slane %v2915_v54, 4  ;;  %v2448_v9 = vsel %vm7809_vm13, %v2446_v10, %v2447_v34  ;;  %v2569_v22 = vld [vmem:[#allocation2 + $0x90] sm:$0xf]  ;;  %v6014_v52 = vrot.slane %v3139_v14, 9 }
 0x238   : > { %v5398_v45 = vpop.f32.mrf.mxu2  ;;  %2537 = vst [vmem:[#allocation3 + $0x308] sm:$0xf] %v2448_v9  ;;  %v3277_v54 = vrot.slane %v3140_v59, 5  ;;  %v6367_v34 = vor.u32 %v6973_v57, %v6364_v12  ;;  %v2935_v9 = vshll.u32 %v2647_v35, 16  ;;  %v6372_v59 = vld [vmem:[#allocation3 + $0x2c4] sm:$0xf0] }
 0x239   : > { %v2918_v23 = vor.u32 %v2917_v2, %v2913_v58  ;;  %2601 = vst [vmem:[#allocation3 + $0x2e8] sm:$0xf] %v2569_v22 }
 0x23a   : > { %v3278_v14 = vsel %vm7809_vm13, %v6014_v52, %v3277_v54  ;;  %v3279_v37 = vrot.slane %v3277_v54, 4  ;;  %3097 = vst [vmem:[#allocation3 + $0x2ec] sm:$0xf] %v2914_v63  ;;  %v5399_v52 = vadd.f32 %v5398_v45, %v5310_v29  ;;  %v2310_v63 = vld [vmem:[#allocation2 + $0x94] sm:$0xf]  ;;  %v2939_v54 = vshrl.u32 %v2647_v35, 16 }
 0x23b   : > { %5524 = vmatmul.bf16.gmra.mxu3 %v6339_v44  ;;  %v2919_v32 = vrot.slane %v2918_v23, 4  ;;  %3369 = vst [vmem:[#allocation3 + $0x2f0] sm:$0xf] %v3278_v14  ;;  %v2451_v43 = vrot.slane %v2310_v63, 5  ;;  %v6375_v14 = vor.u32 %v6974_v28, %v6372_v59  ;;  %v6982_v18 = vld [vmem:[#allocation3 + $0x2e4] sm:$0xf] }
 0x23c   : > { %v5295_v51 = vpop.f32.mrf.mxu0  ;;  %v8510_v2 = vpop.f32.mrf.mxu1  ;;  %v2571_v59 = vld [vmem:[#allocation2 + $0x9c] sm:$0xf] }
 0x23d   : > { %v8508_v53 = vadd.f32 %v5295_v51, %v5207_v38  ;;  %5440 = vmatmul.bf16.gmra.mxu2 %v6371_v31  ;;  %v2924_v58 = vsel %vm7815_vm14, %v2919_v32, %v2923_v17  ;;  %v3281_v38 = vsel %vm7809_vm13, %v3279_v37, %v3280_v62  ;;  %v2646_v31 = vld [vmem:[#allocation2 + $0x9c] sm:$0xf]  ;;  %v2309_v37 = vld [vmem:[#allocation2 + $0x90] sm:$0xe]  ;;  %2603 = vst [vmem:[#allocation3 + $0x330] sm:$0xf] %v2571_v59 }
 0x23e   : > { %v5485_v44 = vpop.f32.mrf.mxu3  ;;  %3098 = vst [vmem:[#allocation3 + $0x310] sm:$0xf] %v2924_v58  ;;  %v2926_v10 = vshrl.u32 %v2646_v31, 16  ;;  %v2929_v41 = vshll.u32 %v2646_v31, 16  ;;  %v2937_v58 = vrot.slane %v2935_v9, 5  ;;  %v5999_v49 = vrot.slane %v2309_v37, 9 }
 0x23f   : > { %5351 = vmatmul.bf16.gmra.mxu1 %v6367_v34  ;;  %3370 = vst [vmem:[#allocation3 + $0x314] sm:$0xf] %v3281_v38  ;;  %v5486_v12 = vadd.f32 %v5485_v44, %v5397_v47  ;;  %v6987_v34 = vld [vmem:[#allocation3 + $0x308] sm:$0xf0]  ;;  %v2311_v47 = vld [vmem:[#allocation2 + $0x98] sm:$0x1] }
 0x240   : > { %v8519_v57 = vpop.f32.mrf.mxu2  ;;  %v2928_v23 = vrot.slane %v2926_v10, 4  ;;  %v2931_v17 = vrot.slane %v2929_v41, 5  ;;  %v6406_v51 = vld [vmem:[#allocation3 + $0x2e8] sm:$0xf]  ;;  %v2453_v38 = vrot.slane %v2451_v43, 4  ;;  %v2454_v45 = vrot.slane %v2311_v47, 5 }
 0x241   : > { %v8533_v31 = vld [vmem:[%s8839_s3] ss:$0 sm:$0xff]  ;;  %v2452_v9 = vsel %vm7809_vm13, %v5999_v49, %v2451_v43 }
 0x242   : > { %v2932_v32 = vor.u32 %v2931_v17, %v2928_v23  ;;  %v6400_v41 = vld [vmem:[#allocation3 + $0x304] sm:$0xf0]  ;;  %v2455_v28 = vsel %vm7809_vm13, %v2453_v38, %v2454_v45  ;;  %v3142_v17 = vld [vmem:[#allocation2 + $0x9c] sm:$0xe]  ;;  %2538 = vst [vmem:[#allocation3 + $0x32c] sm:$0xf] %v2452_v9 }
 0x243   : > { %v2572_v23 = vld [vmem:[#allocation2 + $0xa0] sm:$0xf]  ;;  %2539 = vst [vmem:[#allocation3 + $0x350] sm:$0xf] %v2455_v28  ;;  %v6015_v43 = vrot.slane %v3142_v17, 9  ;;  %v6403_v49 = vor.u32 %v6982_v18, %v6400_v41 }
 0x244   : > { %v5574_v22 = vpop.f32.mrf.mxu0  ;;  %v8528_v21 = vpop.f32.mrf.mxu1  ;;  %v2933_v29 = vrot.slane %v2932_v32, 4  ;;  %v3143_v37 = vld [vmem:[#allocation2 + $0xa0] sm:$0xf]  ;;  %2604 = vst [vmem:[#allocation3 + $0x354] sm:$0xf] %v2572_v23 }
 0x245   : > { %v5575_v44 = vadd.f32 %v5574_v22, %v5486_v12  ;;  %v2945_v12 = vshll.u32 %v2648_v33, 16  ;;  %v6407_v22 = vor.u32 %v6987_v34, %v6406_v51  ;;  %v5313_v51 = vadd.f32 %v8510_v2, %v8120_v24  ;;  %v3144_v34 = vld [vmem:[#allocation2 + $0xa4] sm:$0x1]  ;;  %v2649_v9 = vld [vmem:[#allocation2 + $0xa8] sm:$0xf] }
 0x246   : > { %v5487_v62 = vpop.f32.mrf.mxu3  ;;  %v3284_v33 = vrot.slane %v3143_v37, 5  ;;  %v6979_v18 = vld [vmem:[#allocation3 + $0x2c8] sm:$0xf0]  ;;  %v2650_v28 = vld [vmem:[#allocation2 + $0xac] sm:$0xf]  ;;  %v2950_v17 = vshrl.u32 %v2649_v9, 16 }
 0x247   : > { %5613 = vmatmul.bf16.gmra.mxu0 %v6343_v5  ;;  %v5488_v35 = vadd.f32 %v5487_v62, %v5399_v52  ;;  %v2941_v5 = vrot.slane %v2939_v54, 4  ;;  %v5658_v63 = vmul.f32 %v8526_v11, %v5575_v44  ;;  %v2947_v62 = vrot.slane %v2945_v12, 5  ;;  %v8908_v37 = vld [vmem:[#allocation23_spill] sm:$0xff] }
 0x248   : > { %v8535_v10 = vpop.f32.mrf.mxu2  ;;  %v2938_v54 = vsel %vm7815_vm14, %v2933_v29, %v2937_v58  ;;  %v5402_v38 = vadd.f32 %v8519_v57, %v5313_v51  ;;  %v3285_v24 = vsel %vm7809_vm13, %v6015_v43, %v3284_v33  ;;  %v3286_v2 = vrot.slane %v3284_v33, 4  ;;  %v6408_v43 = vld [vmem:[#allocation3 + $0x30c] sm:$0xf0] }
 0x249   : > { %v2942_v52 = vor.u32 %v2941_v5, %v2937_v58  ;;  %v5694_v58 = vadd.f32 %v8533_v31, %v5658_v63  ;;  %3099 = vst [vmem:[#allocation3 + $0x334] sm:$0xf] %v2938_v54  ;;  %v2953_v63 = vshll.u32 %v2649_v9, 16  ;;  %v2959_v51 = vshll.u32 %v2650_v28, 16  ;;  %v6991_v9 = vld [vmem:[#allocation3 + $0x32c] sm:$0xf] }
 0x24a   : > { %3371 = vst [vmem:[#allocation3 + $0x338] sm:$0xf] %v3285_v24  ;;  %v2952_v33 = vrot.slane %v2950_v17, 4 }
 0x24b   : > { %5529 = vmatmul.bf16.gmra.mxu3 %v6375_v14  ;;  %v2943_v44 = vrot.slane %v2942_v52, 4  ;;  %v3287_v14 = vrot.slane %v3144_v34, 5  ;;  %v5726_v52 = vmax.f32 %v5694_v58, 0.0  ;;  %v6983_v34 = vld [vmem:[#allocation3 + $0x2ec] sm:$0xf] }
 0x24c   : > { %v5576_v32 = vpop.f32.mrf.mxu0  ;;  %v8547_v5 = vpop.f32.mrf.mxu1 }
 0x24d   : > { %v5577_v47 = vadd.f32 %v5576_v32, %v5488_v35  ;;  %5445 = vmatmul.bf16.gmra.mxu2 %v6407_v22  ;;  %v6378_v35 = vld [vmem:[#allocation3 + $0x2a8] sm:$0xf]  ;;  %v2948_v41 = vsel %vm7815_vm14, %v2943_v44, %v2947_v62  ;;  %v3288_v57 = vsel %vm7809_vm13, %v3286_v2, %v3287_v14  ;;  %v5315_v32 = vadd.f32 %v8528_v21, %v8908_v37  ;;  %v6442_v14 = vld [vmem:[#allocation3 + $0x330] sm:$0xf]  ;;  %v2651_v21 = vld [vmem:[#allocation2 + $0xb0] sm:$0x1] }
 0x24e   : > { %v5490_v45 = vpop.f32.mrf.mxu3  ;;  %3100 = vst [vmem:[#allocation3 + $0x358] sm:$0xf] %v2948_v41  ;;  %v6379_v59 = vor.u32 %v6979_v18, %v6378_v35  ;;  %v6411_v41 = vor.u32 %v6983_v34, %v6408_v43  ;;  %v2573_v34 = vld [vmem:[#allocation2 + $0xa8] sm:$0xf]  ;;  %v2574_v43 = vld [vmem:[#allocation2 + $0xac] sm:$0xf] }
 0x24f   : > { %v5659_v29 = vmul.f32 %v8526_v11, %v5577_v47  ;;  %5356 = vmatmul.bf16.gmra.mxu1 %v6403_v49  ;;  %v5491_v23 = vadd.f32 %v5490_v45, %v5402_v38  ;;  %3372 = vst [vmem:[#allocation3 + $0x35c] sm:$0xf] %v3288_v57  ;;  %v2955_v47 = vrot.slane %v2953_v63, 5  ;;  %v5404_v44 = vadd.f32 %v8535_v10, %v5315_v32  ;;  %v2313_v38 = vld [vmem:[#allocation2 + $0xa0] sm:$0xf] }
 0x250   : > { %v8558_v22 = vpop.f32.mrf.mxu2  ;;  %v2963_v45 = vshrl.u32 %v2650_v28, 16  ;;  %v2458_v35 = vrot.slane %v2313_v38, 5  ;;  %v2312_v57 = vld [vmem:[#allocation2 + $0x9c] sm:$0xe]  ;;  %v2314_v10 = vld [vmem:[#allocation2 + $0xa4] sm:$0x1] }
 0x251   : > { %v5695_v12 = vadd.f32 %v8533_v31, %v5659_v29  ;;  %v6996_v29 = vld [vmem:[#allocation3 + $0x350] sm:$0xf0]  ;;  %v2956_v18 = vor.u32 %v2955_v47, %v2952_v33  ;;  %v6000_v28 = vrot.slane %v2312_v57, 9  ;;  %v2461_v17 = vrot.slane %v2314_v10, 5  ;;  %v6414_v57 = vld [vmem:[#allocation3 + $0x2f0] sm:$0xf] }
 0x252   : > { %v2965_v32 = vrot.slane %v2963_v45, 4  ;;  %v6443_v47 = vor.u32 %v6996_v29, %v6442_v14  ;;  %v5318_v45 = vadd.f32 %v8547_v5, %v8155_v40  ;;  %2605 = vst [vmem:[#allocation3 + $0x378] sm:$0xf] %v2573_v34 }
 0x253   : > { %v5727_v62 = vmax.f32 %v5695_v12, 0.0  ;;  %v2961_v12 = vrot.slane %v2959_v51, 5  ;;  %v2957_v37 = vrot.slane %v2956_v18, 4  ;;  %2606 = vst [vmem:[#allocation3 + $0x39c] sm:$0xf] %v2574_v43 }
 0x254   : > { %v5579_v54 = vpop.f32.mrf.mxu0  ;;  %v8563_v58 = vpop.f32.mrf.mxu1 }
 0x255   : > { %v7110_v49 = vpack.c.bf16 %v5727_v62, %v5726_v52  ;;  %v5580_v24 = vadd.f32 %v5579_v54, %v5491_v23  ;;  %v2460_v23 = vrot.slane %v2458_v35, 4  ;;  %v6436_v62 = vld [vmem:[#allocation3 + $0x34c] sm:$0xf0]  ;;  %v2969_v54 = vshll.u32 %v2651_v21, 16 }
 0x256   : > { %v5492_v2 = vpop.f32.mrf.mxu3  ;;  %v2962_v14 = vsel %vm7815_vm14, %v2957_v37, %v2961_v12  ;;  %v6439_v10 = vor.u32 %v6991_v9, %v6436_v62 }
 0x257   : > { %7111 = vst [vmem:[%s8567_s7] sm:$0xff] %v7110_v49   ;;  %5618 = vmatmul.bf16.gmra.mxu0 %v6379_v59  ;;  %v5493_v63 = vadd.f32 %v5492_v2, %v5404_v44  ;;  %v5660_v33 = vmul.f32 %v8526_v11, %v5580_v24  ;;  %v2459_v59 = vsel %vm7809_vm13, %v6000_v28, %v2458_v35  ;;  %v3145_v49 = vld [vmem:[#allocation2 + $0xa8] sm:$0xe]  ;;  %v2971_v38 = vrot.slane %v2969_v54, 5  ;;  %v3146_v2 = vld [vmem:[#allocation2 + $0xac] sm:$0xf] }
 0x258   : > { %v8570_v52 = vpop.f32.mrf.mxu2  ;;  %v2462_v51 = vsel %vm7809_vm13, %v2460_v23, %v2461_v17  ;;  %2540 = vst [vmem:[#allocation3 + $0x374] sm:$0xf] %v2459_v59  ;;  %v2966_v44 = vor.u32 %v2965_v32, %v2961_v12  ;;  %v3147_v24 = vld [vmem:[#allocation2 + $0xb0] sm:$0x1]  ;;  %v6016_v29 = vrot.slane %v3145_v49, 9  ;;  %v3291_v35 = vrot.slane %v3146_v2, 5 }
 0x259   : > { %2541 = vst [vmem:[#allocation3 + $0x398] sm:$0xf] %v2462_v51  ;;  %v3294_v28 = vrot.slane %v3147_v24, 5  ;;  %v5696_v23 = vadd.f32 %v8533_v31, %v5660_v33  ;;  %v6988_v17 = vld [vmem:[#allocation3 + $0x310] sm:$0xf0] }
 0x25a   : > { %v3292_v40 = vsel %vm7809_vm13, %v6016_v29, %v3291_v35  ;;  %v3293_v5 = vrot.slane %v3291_v35, 4  ;;  %3101 = vst [vmem:[#allocation3 + $0x37c] sm:$0xf] %v2962_v14  ;;  %v6415_v33 = vor.u32 %v6988_v17, %v6414_v57  ;;  %v2652_v59 = vld [vmem:[#allocation2 + $0xb4] sm:$0xf] }
 0x25b   : > { %5534 = vmatmul.bf16.gmra.mxu3 %v6411_v41  ;;  %v2967_v41 = vrot.slane %v2966_v44, 4  ;;  %3373 = vst [vmem:[#allocation3 + $0x380] sm:$0xf] %v3292_v40  ;;  %v2653_v51 = vld [vmem:[#allocation2 + $0xb8] sm:$0xf]  ;;  %v5728_v34 = vmax.f32 %v5696_v23, 0.0 }
 0x25c   : > { %v5581_v18 = vpop.f32.mrf.mxu0  ;;  %v8582_v54 = vpop.f32.mrf.mxu1  ;;  %v3295_v62 = vsel %vm7809_vm13, %v3293_v5, %v3294_v28  ;;  %v2974_v43 = vshrl.u32 %v2652_v59, 16  ;;  %v2977_v49 = vshll.u32 %v2652_v59, 16  ;;  %v2983_v2 = vshll.u32 %v2653_v51, 16  ;;  %v6992_v14 = vld [vmem:[#allocation3 + $0x334] sm:$0xf] }
 0x25d   : > { %v5582_v21 = vadd.f32 %v5581_v18, %v5493_v63  ;;  %5450 = vmatmul.bf16.gmra.mxu2 %v6443_v47  ;;  %v5407_v63 = vadd.f32 %v8558_v22, %v5318_v45  ;;  %v2972_v9 = vsel %vm7815_vm14, %v2967_v41, %v2971_v38  ;;  %v5320_v22 = vadd.f32 %v8563_v58, %v8170_v13  ;;  %v6444_v24 = vld [vmem:[#allocation3 + $0x354] sm:$0xf0]  ;;  %v7005_v58 = vld [vmem:[#allocation3 + $0x398] sm:$0xf0] }
 0x25e   : > { %v5495_v32 = vpop.f32.mrf.mxu3  ;;  %3102 = vst [vmem:[#allocation3 + $0x3a0] sm:$0xf] %v2972_v9  ;;  %v2987_v18 = vshrl.u32 %v2653_v51, 16  ;;  %v2976_v29 = vrot.slane %v2974_v43, 4  ;;  %v2979_v35 = vrot.slane %v2977_v49, 5  ;;  %v6447_v5 = vor.u32 %v6992_v14, %v6444_v24 }
 0x25f   : > { %v5661_v12 = vmul.f32 %v8526_v11, %v5582_v21  ;;  %5361 = vmatmul.bf16.gmra.mxu1 %v6439_v10  ;;  %3374 = vst [vmem:[#allocation3 + $0x3a4] sm:$0xf] %v3295_v62  ;;  %v5496_v38 = vadd.f32 %v5495_v32, %v5407_v63  ;;  %v5409_v57 = vadd.f32 %v8570_v52, %v5320_v22  ;;  %v2316_v10 = vld [vmem:[#allocation2 + $0xac] sm:$0xf]  ;;  %v6478_v13 = vld [vmem:[#allocation3 + $0x378] sm:$0xf] }
 0x260   : > { %v8593_v47 = vpop.f32.mrf.mxu2  ;;  %v2465_v23 = vrot.slane %v2316_v10, 5  ;;  %v2980_v17 = vor.u32 %v2979_v35, %v2976_v29  ;;  %v2985_v32 = vrot.slane %v2983_v2, 5  ;;  %v2654_v63 = vld [vmem:[#allocation2 + $0xbc] sm:$0x1]  ;;  %v2989_v9 = vrot.slane %v2987_v18, 4 }
 0x261   : > { %v5697_v37 = vadd.f32 %v8533_v31, %v5661_v12  ;;  %v2315_v12 = vld [vmem:[#allocation2 + $0xa8] sm:$0xe]  ;;  %v7000_v62 = vld [vmem:[#allocation3 + $0x374] sm:$0xf]  ;;  %v6472_v22 = vld [vmem:[#allocation3 + $0x394] sm:$0xf0]  ;;  %v6479_v2 = vor.u32 %v7005_v58, %v6478_v13 }
 0x262   : > { %v6001_v59 = vrot.slane %v2315_v12, 9  ;;  %v2467_v52 = vrot.slane %v2465_v23, 4  ;;  %v2981_v49 = vrot.slane %v2980_v17, 4  ;;  %v3148_v29 = vld [vmem:[#allocation2 + $0xb4] sm:$0xe]  ;;  %v2993_v14 = vshll.u32 %v2654_v63, 16 }
 0x263   : > { %v5729_v44 = vmax.f32 %v5697_v37, 0.0  ;;  %v2317_v37 = vld [vmem:[#allocation2 + $0xb0] sm:$0x1]  ;;  %v3150_v13 = vld [vmem:[#allocation2 + $0xbc] sm:$0x1]  ;;  %v6017_v58 = vrot.slane %v3148_v29, 9  ;;  %v5323_v17 = vadd.f32 %v8582_v54, %v8182_v61 }
 0x264   : > { %v5584_v45 = vpop.f32.mrf.mxu0  ;;  %v8598_v28 = vpop.f32.mrf.mxu1  ;;  %v2468_v43 = vrot.slane %v2317_v37, 5  ;;  %v2986_v10 = vsel %vm7815_vm14, %v2981_v49, %v2985_v32  ;;  %v6997_v63 = vld [vmem:[#allocation3 + $0x358] sm:$0xf0]  ;;  %v2656_v29 = vld [vmem:[#allocation2 + $0xc4] sm:$0xf] }
 0x265   : > { %v7115_v21 = vpack.c.bf16 %v5729_v44, %v5728_v34  ;;  %v5585_v40 = vadd.f32 %v5584_v45, %v5496_v38  ;;  %v2990_v44 = vor.u32 %v2989_v9, %v2985_v32  ;;  %v2575_v38 = vld [vmem:[#allocation2 + $0xb4] sm:$0xf]  ;;  %v2576_v45 = vld [vmem:[#allocation2 + $0xb8] sm:$0xf]  ;;  %v5412_v61 = vadd.f32 %v8593_v47, %v5323_v17  ;;  %3103 = vst [vmem:[#allocation3 + $0x3c4] sm:$0xf] %v2986_v10 }
 0x266   : > { %v5497_v41 = vpop.f32.mrf.mxu3  ;;  %v2469_v24 = vsel %vm7809_vm13, %v2467_v52, %v2468_v43  ;;  %2607 = vst [vmem:[#allocation3 + $0x3c0] sm:$0xf] %v2575_v38 }
 0x267   : > { %7187 = vst [vmem:[%s8567_s7 + $0x8] sm:$0xff] %v7115_v21   ;;  %5623 = vmatmul.bf16.gmra.mxu0 %v6415_v33  ;;  %v5498_v51 = vadd.f32 %v5497_v41, %v5409_v57  ;;  %v2466_v33 = vsel %vm7809_vm13, %v6001_v59, %v2465_v23  ;;  %v5662_v18 = vmul.f32 %v8526_v11, %v5585_v40  ;;  %v2991_v35 = vrot.slane %v2990_v44, 4  ;;  %v3149_v21 = vld [vmem:[#allocation2 + $0xb8] sm:$0xf]  ;;  %v6450_v40 = vld [vmem:[#allocation3 + $0x338] sm:$0xf] }
 0x268   : > { %v8601_v34 = vpop.f32.mrf.mxu2  ;;  %2542 = vst [vmem:[#allocation3 + $0x3bc] sm:$0xf] %v2466_v33  ;;  %v2995_v41 = vrot.slane %v2993_v14, 5  ;;  %v3298_v12 = vrot.slane %v3149_v21, 5  ;;  %v3301_v59 = vrot.slane %v3150_v13, 5  ;;  %v6451_v43 = vor.u32 %v6997_v63, %v6450_v40 }
 0x269   : > { %2543 = vst [vmem:[#allocation3 + $0x3e0] sm:$0xf] %v2469_v24  ;;  %v5698_v52 = vadd.f32 %v8533_v31, %v5662_v18  ;;  %v2655_v44 = vld [vmem:[#allocation2 + $0xc0] sm:$0xf]  ;;  %v7001_v33 = vld [vmem:[#allocation3 + $0x37c] sm:$0xf] }
 0x26a   : > { %2608 = vst [vmem:[#allocation3 + $0x3e4] sm:$0xf] %v2576_v45  ;;  %v2996_v32 = vsel %vm7815_vm14, %v2991_v35, %v2995_v41  ;;  %v3299_v54 = vsel %vm7809_vm13, %v6017_v58, %v3298_v12  ;;  %v2998_v38 = vshrl.u32 %v2655_v44, 16  ;;  %v3001_v45 = vshll.u32 %v2655_v44, 16 }
 0x26b   : > { %5539 = vmatmul.bf16.gmra.mxu3 %v6447_v5  ;;  %v6475_v5 = vor.u32 %v7000_v62, %v6472_v22  ;;  %3104 = vst [vmem:[#allocation3 + $0x3e8] sm:$0xf] %v2996_v32  ;;  %v3300_v62 = vrot.slane %v3298_v12, 4  ;;  %v5730_v14 = vmax.f32 %v5698_v52, 0.0  ;;  %v3007_v35 = vshll.u32 %v2656_v29, 16 }
 0x26c   : > { %v5586_v57 = vpop.f32.mrf.mxu0  ;;  %v8612_v37 = vpop.f32.mrf.mxu1  ;;  %3375 = vst [vmem:[#allocation3 + $0x3c8] sm:$0xf] %v3299_v54  ;;  %v3000_v10 = vrot.slane %v2998_v38, 4  ;;  %v3003_v41 = vrot.slane %v3001_v45, 5  ;;  %v3011_v13 = vshrl.u32 %v2656_v29, 16 }
 0x26d   : > { %v5587_v23 = vadd.f32 %v5586_v57, %v5498_v51  ;;  %5455 = vmatmul.bf16.gmra.mxu2 %v6479_v2  ;;  %v5325_v2 = vadd.f32 %v8598_v28, %v8210_v0  ;;  %v3302_v47 = vsel %vm7809_vm13, %v3300_v62, %v3301_v59  ;;  %v6480_v57 = vld [vmem:[#allocation3 + $0x39c] sm:$0xf0]  ;;  %v3009_v63 = vrot.slane %v3007_v35, 5  ;;  %v2318_v52 = vld [vmem:[#allocation2 + $0xb4] sm:$0xe] }
 0x26e   : > { %v5500_v9 = vpop.f32.mrf.mxu3  ;;  %3376 = vst [vmem:[#allocation3 + $0x3ec] sm:$0xf] %v3302_v47  ;;  %v2319_v28 = vld [vmem:[#allocation2 + $0xb8] sm:$0xf]  ;;  %v3004_v12 = vor.u32 %v3003_v41, %v3000_v10  ;;  %v6483_v32 = vor.u32 %v7001_v33, %v6480_v57  ;;  %v6002_v54 = vrot.slane %v2318_v52, 9 }
 0x26f   : > { %v5663_v51 = vmul.f32 %v8526_v11, %v5587_v23  ;;  %5366 = vmatmul.bf16.gmra.mxu1 %v6475_v5  ;;  %v5501_v24 = vadd.f32 %v5500_v9, %v5412_v61  ;;  %v5414_v0 = vadd.f32 %v8601_v34, %v5325_v2  ;;  %v6514_v40 = vld [vmem:[#allocation3 + $0x3c0] sm:$0xf]  ;;  %v2472_v5 = vrot.slane %v2319_v28, 5  ;;  %v2320_v61 = vld [vmem:[#allocation2 + $0xbc] sm:$0x1] }
 0x270   : > { %v8622_v49 = vpop.f32.mrf.mxu2  ;;  %v2475_v29 = vrot.slane %v2320_v61, 5  ;;  %v3005_v2 = vrot.slane %v3004_v12, 4  ;;  %v3151_v38 = vld [vmem:[#allocation2 + $0xc0] sm:$0xe]  ;;  %v3152_v45 = vld [vmem:[#allocation2 + $0xc4] sm:$0xf] }
 0x271   : > { %v5699_v22 = vadd.f32 %v8533_v31, %v5663_v51  ;;  %v7014_v59 = vld [vmem:[#allocation3 + $0x3e0] sm:$0xf0]  ;;  %v3013_v51 = vrot.slane %v3011_v13, 4  ;;  %v2474_v62 = vrot.slane %v2472_v5, 4  ;;  %v6508_v33 = vld [vmem:[#allocation3 + $0x3dc] sm:$0xf0] }
 0x272   : > { %v2577_v35 = vld [vmem:[#allocation2 + $0xc0] sm:$0xf]  ;;  %v2578_v10 = vld [vmem:[#allocation2 + $0xc4] sm:$0xf]  ;;  %v3010_v41 = vsel %vm7815_vm14, %v3005_v2, %v3009_v63  ;;  %v3153_v13 = vld [vmem:[#allocation2 + $0xc8] sm:$0x1] }
 0x273   : > { %v5731_v18 = vmax.f32 %v5699_v22, 0.0  ;;  %v2657_v22 = vld [vmem:[#allocation2 + $0xc8] sm:$0x1]  ;;  %v3014_v47 = vor.u32 %v3013_v51, %v3009_v63  ;;  %v2476_v57 = vsel %vm7809_vm13, %v2474_v62, %v2475_v29  ;;  %v3305_v28 = vrot.slane %v3152_v45, 5  ;;  %2609 = vst [vmem:[#allocation3 + $0x408] sm:$0xf] %v2577_v35 }
 0x274   : > { %v5589_v21 = vpop.f32.mrf.mxu0  ;;  %v8629_v17 = vpop.f32.mrf.mxu1  ;;  %2545 = vst [vmem:[#allocation3 + $0x428] sm:$0xf] %v2476_v57  ;;  %v3308_v12 = vrot.slane %v3153_v13, 5 }
 0x275   : > { %v7120_v58 = vpack.c.bf16 %v5731_v18, %v5730_v14  ;;  %v5590_v9 = vadd.f32 %v5589_v21, %v5501_v24  ;;  %v7009_v14 = vld [vmem:[#allocation3 + $0x3bc] sm:$0xf]  ;;  %v6515_v18 = vor.u32 %v7014_v59, %v6514_v40  ;;  %v2473_v24 = vsel %vm7809_vm13, %v6002_v54, %v2472_v5  ;;  %2610 = vst [vmem:[#allocation3 + $0x42c] sm:$0xf] %v2578_v10  ;;  %v7010_v10 = vld [vmem:[#allocation3 + $0x3c4] sm:$0xf] }
 0x276   : > { %v5502_v23 = vpop.f32.mrf.mxu3  ;;  %2544 = vst [vmem:[#allocation3 + $0x404] sm:$0xf] %v2473_v24  ;;  %v5328_v40 = vadd.f32 %v8612_v37, %v8221_v46  ;;  %v6511_v5 = vor.u32 %v7009_v14, %v6508_v33  ;;  %v3307_v61 = vrot.slane %v3305_v28, 4  ;;  %v7006_v46 = vld [vmem:[#allocation3 + $0x3a0] sm:$0xf0] }
 0x277   : > { %7188 = vst [vmem:[%s8567_s7 + $0x10] sm:$0xff] %v7120_v58   ;;  %5628 = vmatmul.bf16.gmra.mxu0 %v6451_v43  ;;  %v5503_v34 = vadd.f32 %v5502_v23, %v5414_v0  ;;  %v5152_v43 = vadd.f32 %v8204_v36, %v8206_v19  ;;  %v5664_v21 = vmul.f32 %v8526_v11, %v5590_v9  ;;  %v3015_v19 = vrot.slane %v3014_v47, 4  ;;  %v350_v9 = vld [vmem:[#allocation2 + $0xcc] sm:$0x1]  ;;  %v2659_v14 = vld [vmem:[#allocation2 + $0xd0] sm:$0xf] }
 0x278   : > { %v8632_v44 = vpop.f32.mrf.mxu2  ;;  %v3017_v58 = vshll.u32 %v2657_v22, 16  ;;  %v6018_v0 = vrot.slane %v3151_v38, 9  ;;  %v5417_v37 = vadd.f32 %v8622_v49, %v5328_v40  ;;  %3105 = vst [vmem:[#allocation3 + $0x40c] sm:$0xf] %v3010_v41  ;;  %v406_v22 = vld [vmem:[#allocation2 + $0xd4] sm:$0x1]  ;;  %v3309_v29 = vsel %vm7809_vm13, %v3307_v61, %v3308_v12 }
 0x279   : > { %v5700_v54 = vadd.f32 %v8533_v31, %v5664_v21  ;;  %v351_v2 = vsel %vm7614_vm4, 0, %v350_v9  ;;  %v5241_v38 = vadd.f32 %v8232_v50, %v5152_v43  ;;  %v407_v49 = vsel %vm7609_vm3, 0, %v406_v22  ;;  %3378 = vst [vmem:[#allocation3 + $0x434] sm:$0xf] %v3309_v29  ;;  %v6516_v43 = vld [vmem:[#allocation3 + $0x3e4] sm:$0xf0] }
 0x27a   : > { %v3019_v63 = vrot.slane %v3017_v58, 5  ;;  %v3306_v51 = vsel %vm7809_vm13, %v6018_v0, %v3305_v28  ;;  %v3035_v24 = vshrl.u32 %v2659_v14, 16  ;;  %352 = vst [vmem:[#allocation2 + $0xcc] sm:$0x1] %v351_v2  ;;  %v6550_v28 = vld [vmem:[#allocation3 + $0x408] sm:$0xf]  ;;  %v6519_v40 = vor.u32 %v7010_v10, %v6516_v43 }
 0x27b   : > { %5544 = vmatmul.bf16.gmra.mxu3 %v6483_v32  ;;  %v6486_v32 = vld [vmem:[#allocation3 + $0x380] sm:$0xf]  ;;  %3377 = vst [vmem:[#allocation3 + $0x410] sm:$0xf] %v3306_v51  ;;  %v5732_v35 = vmax.f32 %v5700_v54, 0.0  ;;  %v5330_v57 = vadd.f32 %v8629_v17, %v5241_v38 }
 0x27c   : > { %v5591_v36 = vpop.f32.mrf.mxu0  ;;  %v8645_v52 = vpop.f32.mrf.mxu1  ;;  %v6487_v33 = vor.u32 %v7006_v46, %v6486_v32  ;;  %408 = vst [vmem:[#allocation2 + $0xd4] sm:$0x1] %v407_v49  ;;  %v3037_v1 = vrot.slane %v3035_v24, 4  ;;  %v2321_v12 = vld [vmem:[#allocation2 + $0xc0] sm:$0xe] }
 0x27d   : > { %v5592_v23 = vadd.f32 %v5591_v36, %v5503_v34  ;;  %5460 = vmatmul.bf16.gmra.mxu2 %v6515_v18  ;;  %v3020_v34 = vsel %vm7815_vm14, %v3015_v19, %v3019_v63  ;;  %v3031_v18 = vshll.u32 %v2659_v14, 16  ;;  %v5419_v36 = vadd.f32 %v8632_v44, %v5330_v57  ;;  %v2322_v19 = vld [vmem:[#allocation2 + $0xc4] sm:$0xf]  ;;  %v7018_v32 = vld [vmem:[#allocation3 + $0x404] sm:$0xf] }
 0x27e   : > { %v5505_v59 = vpop.f32.mrf.mxu3  ;;  %3106 = vst [vmem:[#allocation3 + $0x430] sm:$0xf] %v3020_v34  ;;  %v6003_v63 = vrot.slane %v2321_v12, 9  ;;  %v6544_v54 = vld [vmem:[#allocation3 + $0x424] sm:$0xf0] }
 0x27f   : > { %v5665_v62 = vmul.f32 %v8526_v11, %v5592_v23  ;;  %5371 = vmatmul.bf16.gmra.mxu1 %v6511_v5  ;;  %v5506_v3 = vadd.f32 %v5505_v59, %v5417_v37  ;;  %v8665_v41 = vrot.slane %v3031_v18, 5  ;;  %v2479_v23 = vrot.slane %v2322_v19, 5  ;;  %v7023_v5 = vld [vmem:[#allocation3 + $0x428] sm:$0xf0]  ;;  %v2323_v59 = vld [vmem:[#allocation2 + $0xc8] sm:$0x1] }
 0x280   : > { %v8660_v45 = vpop.f32.mrf.mxu2  ;;  %v3154_v46 = vld [vmem:[#allocation2 + $0xcc] sm:$0xe]  ;;  %v6551_v37 = vor.u32 %v7023_v5, %v6550_v28  ;;  %v2580_v29 = vld [vmem:[#allocation2 + $0xd0] sm:$0xf]  ;;  %v5157_v18 = vadd.f32 %v8243_v6, %v8248_v56 }
 0x281   : > { %v5701_v47 = vadd.f32 %v8533_v31, %v5665_v62  ;;  %v3038_v9 = vor.u32 %v3037_v1, %v8665_v41  ;;  %v2481_v51 = vrot.slane %v2479_v23, 4  ;;  %v2482_v62 = vrot.slane %v2323_v59, 5  ;;  %v2579_v34 = vld [vmem:[#allocation2 + $0xcc] sm:$0xf]  ;;  %v3155_v57 = vld [vmem:[#allocation2 + $0xd0] sm:$0xf] }
 0x282   : > { %v2480_v22 = vsel %vm7809_vm13, %v6003_v63, %v2479_v23  ;;  %v2658_v2 = vld [vmem:[#allocation2 + $0xcc] sm:$0xf]  ;;  %2611 = vst [vmem:[#allocation3 + $0x450] sm:$0xf] %v2579_v34  ;;  %v3312_v56 = vrot.slane %v3155_v57, 5  ;;  %v5246_v63 = vadd.f32 %v8267_v48, %v5157_v18 }
 0x283   : > { %v5733_v21 = vmax.f32 %v5701_v47, 0.0  ;;  %v2483_v38 = vsel %vm7809_vm13, %v2481_v51, %v2482_v62  ;;  %2546 = vst [vmem:[#allocation3 + $0x44c] sm:$0xf] %v2480_v22  ;;  %v2660_v49 = vld [vmem:[#allocation2 + $0xd4] sm:$0x1]  ;;  %v3022_v14 = vshrl.u32 %v2658_v2, 16 }
 0x284   : > { %v5594_v50 = vpop.f32.mrf.mxu0  ;;  %v8668_v0 = vpop.f32.mrf.mxu1  ;;  %2547 = vst [vmem:[#allocation3 + $0x470] sm:$0xf] %v2483_v38  ;;  %v3156_v1 = vld [vmem:[#allocation2 + $0xd4] sm:$0x1]  ;;  %v6522_v23 = vld [vmem:[#allocation3 + $0x3c8] sm:$0xf] }
 0x285   : > { %v7125_v13 = vpack.c.bf16 %v5733_v21, %v5732_v35  ;;  %v5595_v17 = vadd.f32 %v5594_v50, %v5506_v3  ;;  %v5333_v35 = vadd.f32 %v8645_v52, %v8261_v16  ;;  %v3025_v21 = vshll.u32 %v2658_v2, 16  ;;  %2612 = vst [vmem:[#allocation3 + $0x474] sm:$0xf] %v2580_v29  ;;  %v7019_v29 = vld [vmem:[#allocation3 + $0x40c] sm:$0xf] }
 0x286   : > { %v5507_v58 = vpop.f32.mrf.mxu3  ;;  %v3041_v3 = vshll.u32 %v2660_v49, 16  ;;  %v6547_v50 = vor.u32 %v7018_v32, %v6544_v54  ;;  %v3024_v43 = vrot.slane %v3022_v14, 4  ;;  %v3315_v28 = vrot.slane %v3156_v1, 5  ;;  %v6552_v2 = vld [vmem:[#allocation3 + $0x42c] sm:$0xf0] }
 0x287   : > { %7189 = vst [vmem:[%s8567_s7 + $0x18] sm:$0xff] %v7125_v13   ;;  %5633 = vmatmul.bf16.gmra.mxu0 %v6487_v33  ;;  %v5508_v61 = vadd.f32 %v5507_v58, %v5419_v36  ;;  %v5666_v47 = vmul.f32 %v8526_v11, %v5595_v17  ;;  %v3039_v33 = vrot.slane %v3038_v9, 4  ;;  %v6019_v13 = vrot.slane %v3154_v46, 9  ;;  %v7015_v17 = vld [vmem:[#allocation3 + $0x3e8] sm:$0xf0] }
 0x288   : > { %v8672_v44 = vpop.f32.mrf.mxu2  ;;  %v3027_v58 = vrot.slane %v3025_v21, 5  ;;  %v3043_v6 = vrot.slane %v3041_v3, 5  ;;  %v3314_v32 = vrot.slane %v3312_v56, 4  ;;  %v5335_v22 = vadd.f32 %v8668_v0, %v5246_v63 }
 0x289   : > { %v5702_v16 = vadd.f32 %v8533_v31, %v5666_v47  ;;  %v3313_v9 = vsel %vm7809_vm13, %v6019_v13, %v3312_v56  ;;  %v6586_v18 = vld [vmem:[#allocation3 + $0x450] sm:$0xf]  ;;  %v7024_v56 = vld [vmem:[#allocation3 + $0x430] sm:$0xf0] }
 0x28a   : > { %v3028_v5 = vor.u32 %v3027_v58, %v3024_v43  ;;  %v3044_v12 = vsel %vm7815_vm14, %v3039_v33, %v3043_v6  ;;  %3379 = vst [vmem:[#allocation3 + $0x458] sm:$0xf] %v3313_v9  ;;  %v5424_v38 = vadd.f32 %v8672_v44, %v5335_v22  ;;  %v6555_v33 = vor.u32 %v7019_v29, %v6552_v2  ;;  %v7027_v21 = vld [vmem:[#allocation3 + $0x44c] sm:$0xf]  ;;  %v6558_v6 = vld [vmem:[#allocation3 + $0x410] sm:$0xf] }
 0x28b   : > { %5549 = vmatmul.bf16.gmra.mxu3 %v6519_v40  ;;  %v5422_v40 = vadd.f32 %v8660_v45, %v5333_v35  ;;  %3108 = vst [vmem:[#allocation3 + $0x478] sm:$0xf] %v3044_v12  ;;  %v3316_v45 = vsel %vm7809_vm13, %v3314_v32, %v3315_v28  ;;  %v5734_v62 = vmax.f32 %v5702_v16, 0.0  ;;  %v6580_v3 = vld [vmem:[#allocation3 + $0x46c] sm:$0xf0]  ;;  %v5162_v44 = vadd.f32 %v8280_v27, %v8282_v39 }
 0x28c   : > { %v5596_v24 = vpop.f32.mrf.mxu0  ;;  %v5337_v19 = vpop.f32.mrf.mxu1  ;;  %v3029_v54 = vrot.slane %v3028_v5, 4  ;;  %3380 = vst [vmem:[#allocation3 + $0x47c] sm:$0xf] %v3316_v45  ;;  %v7032_v0 = vld [vmem:[#allocation3 + $0x470] sm:$0xf0]  ;;  %v6583_v43 = vor.u32 %v7027_v21, %v6580_v3  ;;  %v6559_v39 = vor.u32 %v7024_v56, %v6558_v6 }
 0x28d   : > { %v5597_v10 = vadd.f32 %v5596_v24, %v5508_v61  ;;  %5465 = vmatmul.bf16.gmra.mxu2 %v6551_v37  ;;  %v6523_v61 = vor.u32 %v7015_v17, %v6522_v23  ;;  %v6587_v57 = vor.u32 %v7032_v0, %v6586_v18 }
 0x28e   : > { %v5510_v36 = vpop.f32.mrf.mxu3  ;;  %v3034_v48 = vsel %vm7815_vm14, %v3029_v54, %v8665_v41 }
 0x28f   : > { %v5667_v52 = vmul.f32 %v8526_v11, %v5597_v10  ;;  %5376 = vmatmul.bf16.gmra.mxu1 %v6547_v50  ;;  %v5511_v37 = vadd.f32 %v5510_v36, %v5422_v40  ;;  %3107 = vst [vmem:[#allocation3 + $0x454] sm:$0xf] %v3034_v48  ;;  %v5338_v50 = vadd.f32 %v5337_v19, %v8293_v55 }
 0x290   : > { %v5426_v51 = vpop.f32.mrf.mxu2 }
 0x291   : > { %v5703_v59 = vadd.f32 %v8533_v31, %v5667_v52  ;;  %v5427_v28 = vadd.f32 %v5426_v51, %v5338_v50  ;;  %v5251_v52 = vadd.f32 %v8302_v25, %v5162_v44  ;;  %v5172_v50 = vadd.f32 %v8337_v42, %v8339_v15 }
 0x292   : > { %v6588_v12 = vld [vmem:[#allocation3 + $0x474] sm:$0xf0] }
 0x293   : > { %v5735_v46 = vmax.f32 %v5703_v59, 0.0 }
 0x294   : > { %v5599_v34 = vpop.f32.mrf.mxu0  ;;  %v5339_v49 = vpop.f32.mrf.mxu1 }
 0x295   : > { %v7130_v47 = vpack.c.bf16 %v5735_v46, %v5734_v62  ;;  %v5600_v14 = vadd.f32 %v5599_v34, %v5511_v37  ;;  %v5340_v17 = vadd.f32 %v5339_v49, %v5251_v52  ;;  %v5167_v46 = vadd.f32 %v8307_v30, %v8311_v26 }
 0x296   : > { %v5512_v4 = vpop.f32.mrf.mxu3  ;;  %v7028_v5 = vld [vmem:[#allocation3 + $0x454] sm:$0xf] }
 0x297   : > { %7190 = vst [vmem:[%s8567_s7 + $0x20] sm:$0xff] %v7130_v47   ;;  %5638 = vmatmul.bf16.gmra.mxu0 %v6523_v61  ;;  %v5513_v24 = vadd.f32 %v5512_v4, %v5424_v38  ;;  %v5668_v8 = vmul.f32 %v8526_v11, %v5600_v14  ;;  %v6591_v61 = vor.u32 %v7028_v5, %v6588_v12  ;;  %v6594_v47 = vld [vmem:[#allocation3 + $0x458] sm:$0xf]  ;;  %v7033_v38 = vld [vmem:[#allocation3 + $0x478] sm:$0xf0] }
 0x298   : > { %v5428_v35 = vpop.f32.mrf.mxu2  ;;  %v5256_v14 = vadd.f32 %v8326_v7, %v5167_v46  ;;  %v6595_v18 = vor.u32 %v7033_v38, %v6594_v47  ;;  %v8721_v7 = vld [vmem:[%s8838_s2] ss:$0 sm:$0xff] }
 0x299   : > { %v5704_v36 = vadd.f32 %v8533_v31, %v5668_v8  ;;  %v5429_v32 = vadd.f32 %v5428_v35, %v5340_v17  ;;  %v8739_v46 = vld [vmem:[%s8839_s3] ss:$0 sm:$0xff] }
 0x29b   : > { %5554 = vmatmul.bf16.gmra.mxu3 %v6555_v33  ;;  %v5736_v55 = vmax.f32 %v5704_v36, 0.0 }
 0x29c   : > { %v5601_v41 = vpop.f32.mrf.mxu0  ;;  %v5342_v13 = vpop.f32.mrf.mxu1 }
 0x29d   : > { %v5602_v10 = vadd.f32 %v5601_v41, %v5513_v24  ;;  %5470 = vmatmul.bf16.gmra.mxu2 %v6587_v57  ;;  %v5343_v22 = vadd.f32 %v5342_v13, %v8319_v20 }
 0x29e   : > { %v5515_v1 = vpop.f32.mrf.mxu3 }
 0x29f   : > { %v5669_v58 = vmul.f32 %v8526_v11, %v5602_v10  ;;  %5381 = vmatmul.bf16.gmra.mxu1 %v6583_v43  ;;  %v5516_v23 = vadd.f32 %v5515_v1, %v5427_v28 }
 0x2a0   : > { %v5431_v27 = vpop.f32.mrf.mxu2 }
 0x2a1   : > { %v5705_v16 = vadd.f32 %v8533_v31, %v5669_v58  ;;  %v5432_v4 = vadd.f32 %v5431_v27, %v5343_v22 }
 0x2a3   : > { %v5737_v19 = vmax.f32 %v5705_v16, 0.0  ;;  %v8909_v16 = vld [vmem:[#allocation24_spill] sm:$0xff] }
 0x2a4   : > { %v5604_v40 = vpop.f32.mrf.mxu0  ;;  %v5344_v63 = vpop.f32.mrf.mxu1  ;;  %v5261_v52 = vadd.f32 %v8909_v16, %v5172_v50 }
 0x2a5   : > { %v7135_v9 = vpack.c.bf16 %v5737_v19, %v5736_v55  ;;  %v5605_v51 = vadd.f32 %v5604_v40, %v5516_v23  ;;  %v5345_v20 = vadd.f32 %v5344_v63, %v5256_v14  ;;  %v8911_v63 = vld [vmem:[#allocation25_spill] sm:$0xff] }
 0x2a6   : > { %v5517_v59 = vpop.f32.mrf.mxu3 }
 0x2a7   : > { %7191 = vst [vmem:[%s8567_s7 + $0x28] sm:$0xff] %v7135_v9   ;;  %5643 = vmatmul.bf16.gmra.mxu0 %v6559_v39  ;;  %v5518_v54 = vadd.f32 %v5517_v59, %v5429_v32  ;;  %v5670_v45 = vmul.f32 %v8526_v11, %v5605_v51 }
 0x2a8   : > { %v5433_v25 = vpop.f32.mrf.mxu2 }
 0x2a9   : > { %v5706_v2 = vadd.f32 %v8533_v31, %v5670_v45  ;;  %v5434_v21 = vadd.f32 %v5433_v25, %v5345_v20 }
 0x2ab   : > { %5559 = vmatmul.bf16.gmra.mxu3 %v6591_v61  ;;  %v5738_v30 = vmax.f32 %v5706_v2, 0.0  ;;  %v8913_v2 = vld [vmem:[#allocation28_spill] sm:$0xff] }
 0x2ac   : > { %v5606_v62 = vpop.f32.mrf.mxu0  ;;  %v5347_v29 = vpop.f32.mrf.mxu1 }
 0x2ad   : > { %v5607_v37 = vadd.f32 %v5606_v62, %v5518_v54  ;;  %v5348_v1 = vadd.f32 %v5347_v29, %v8346_v60  ;;  %v8912_v54 = vld [vmem:[#allocation27_spill] sm:$0xff] }
 0x2ae   : > { %v5520_v34 = vpop.f32.mrf.mxu3 }
 0x2af   : > { %v5671_v48 = vmul.f32 %v8526_v11, %v5607_v37  ;;  %v5521_v0 = vadd.f32 %v5520_v34, %v5432_v4 }
 0x2b0   : > { %v5436_v33 = vpop.f32.mrf.mxu2 }
 0x2b1   : > { %v5707_v49 = vadd.f32 %v8533_v31, %v5671_v48  ;;  %v5437_v56 = vadd.f32 %v5436_v33, %v5348_v1 }
 0x2b3   : > { %v5739_v26 = vmax.f32 %v5707_v49, 0.0 }
 0x2b4   : > { %v5609_v24 = vpop.f32.mrf.mxu0  ;;  %v5349_v57 = vpop.f32.mrf.mxu1 }
 0x2b5   : > { %v7140_v35 = vpack.c.bf16 %v5739_v26, %v5738_v30  ;;  %v5610_v11 = vadd.f32 %v5609_v24, %v5521_v0  ;;  %v5350_v42 = vadd.f32 %v5349_v57, %v5261_v52  ;;  %v8914_v57 = vld [vmem:[#allocation30_spill] sm:$0xff] }
 0x2b6   : > { %v5522_v3 = vpop.f32.mrf.mxu3 }
 0x2b7   : > { %7192 = vst [vmem:[%s8567_s7 + $0x30] sm:$0xff] %v7140_v35   ;;  %5648 = vmatmul.bf16.gmra.mxu0 %v6595_v18  ;;  %v5523_v8 = vadd.f32 %v5522_v3, %v5434_v21  ;;  %v5672_v44 = vmul.f32 %v8721_v7, %v5610_v11  ;;  %v8915_v11 = vld [vmem:[#allocation29_spill] sm:$0xff] }
 0x2b8   : > { %v5438_v41 = vpop.f32.mrf.mxu2 }
 0x2b9   : > { %v5708_v58 = vadd.f32 %v8533_v31, %v5672_v44  ;;  %v5439_v60 = vadd.f32 %v5438_v41, %v5350_v42  ;;  %v8916_v44 = vld [vmem:[#allocation31_spill] sm:$0xff] }
 0x2bb   : > { %v5740_v39 = vmax.f32 %v5708_v58, 0.0 }
 0x2bc   : > { %v5611_v10 = vpop.f32.mrf.mxu0  ;;  %v5352_v36 = vpop.f32.mrf.mxu1 }
 0x2bd   : > { %v5612_v43 = vadd.f32 %v5611_v10, %v5523_v8  ;;  %v5353_v25 = vadd.f32 %v5352_v36, %v8912_v54  ;;  %v5182_v8 = vadd.f32 %v8915_v11, %v8914_v57 }
 0x2be   : > { %v5525_v13 = vpop.f32.mrf.mxu3 }
 0x2bf   : > { %v5673_v6 = vmul.f32 %v8721_v7, %v5612_v43  ;;  %v5526_v19 = vadd.f32 %v5525_v13, %v5437_v56 }
 0x2c0   : > { %v5441_v27 = vpop.f32.mrf.mxu2 }
 0x2c1   : > { %v5709_v28 = vadd.f32 %v8533_v31, %v5673_v6  ;;  %v8910_v31 = vld [vmem:[#allocation26_spill] sm:$0xff]  ;;  %v5442_v34 = vadd.f32 %v5441_v27, %v5353_v25  ;;  %v8917_v6 = vld [vmem:[#allocation32_spill] sm:$0xff] }
 0x2c2   : > { %v5177_v51 = vadd.f32 %v8911_v63, %v8910_v31  ;;  %v5271_v56 = vadd.f32 %v8917_v6, %v5182_v8  ;;  %v8920_v63 = vld [vmem:[#allocation34_spill] sm:$0xff] }
 0x2c3   : > { %v5741_v55 = vmax.f32 %v5709_v28, 0.0 }
 0x2c4   : > { %v5614_v15 = vpop.f32.mrf.mxu0  ;;  %v5354_v40 = vpop.f32.mrf.mxu1  ;;  %v5266_v48 = vadd.f32 %v8913_v2, %v5177_v51 }
 0x2c5   : > { %v7145_v23 = vpack.c.bf16 %v5741_v55, %v5740_v39  ;;  %v5615_v5 = vadd.f32 %v5614_v15, %v5526_v19 }
 0x2c6   : > { %v5527_v17 = vpop.f32.mrf.mxu3  ;;  %v5355_v14 = vadd.f32 %v5354_v40, %v5266_v48 }
 0x2c7   : > { %7193 = vst [vmem:[%s8567_s7 + $0x38] sm:$0xff] %v7145_v23   ;;  %v5528_v12 = vadd.f32 %v5527_v17, %v5439_v60  ;;  %v5674_v32 = vmul.f32 %v8721_v7, %v5615_v5 }
 0x2c8   : > { %v5443_v9 = vpop.f32.mrf.mxu2 }
 0x2c9   : > { %v5710_v37 = vadd.f32 %v8739_v46, %v5674_v32  ;;  %v5444_v30 = vadd.f32 %v5443_v9, %v5355_v14  ;;  %v8918_v9 = vld [vmem:[#allocation33_spill] sm:$0xff] }
 0x2ca   : > { %v8919_v32 = vld [vmem:[#allocation21_spill] sm:$0xff] }
 0x2cb   : > { %v5742_v38 = vmax.f32 %v5710_v37, 0.0 }
 0x2cc   : > { %v5616_v59 = vpop.f32.mrf.mxu0  ;;  %v5357_v62 = vpop.f32.mrf.mxu1 }
 0x2cd   : > { %v5617_v61 = vadd.f32 %v5616_v59, %v5528_v12  ;;  %v5358_v10 = vadd.f32 %v5357_v62, %v8916_v44  ;;  %v5187_v59 = vadd.f32 %v8919_v32, %v8918_v9 }
 0x2ce   : > { %v5530_v45 = vpop.f32.mrf.mxu3 }
 0x2cf   : > { %v5675_v22 = vmul.f32 %v8721_v7, %v5617_v61  ;;  %v5531_v49 = vadd.f32 %v5530_v45, %v5442_v34 }
 0x2d0   : > { %v5446_v47 = vpop.f32.mrf.mxu2 }
 0x2d1   : > { %v5711_v29 = vadd.f32 %v8739_v46, %v5675_v22  ;;  %v5447_v36 = vadd.f32 %v5446_v47, %v5358_v10  ;;  %v8921_v22 = vld [vmem:[#allocation14_spill] sm:$0xff] }
 0x2d2   : > { %v5276_v34 = vadd.f32 %v8921_v22, %v5187_v59 }
 0x2d3   : > { %v5743_v4 = vmax.f32 %v5711_v29, 0.0 }
 0x2d4   : > { %v5619_v33 = vpop.f32.mrf.mxu0  ;;  %v5359_v0 = vpop.f32.mrf.mxu1 }
 0x2d5   : > { %v7150_v18 = vpack.c.bf16 %v5743_v4, %v5742_v38  ;;  %v5620_v20 = vadd.f32 %v5619_v33, %v5531_v49  ;;  %v5360_v39 = vadd.f32 %v5359_v0, %v5271_v56 }
 0x2d6   : > { %v5532_v26 = vpop.f32.mrf.mxu3 }
 0x2d7   : > { %7194 = vst [vmem:[%s8567_s7 + $0x40] sm:$0xff] %v7150_v18   ;;  %v5533_v24 = vadd.f32 %v5532_v26, %v5444_v30  ;;  %v5676_v21 = vmul.f32 %v8721_v7, %v5620_v20 }
 0x2d8   : > { %v5448_v35 = vpop.f32.mrf.mxu2 }
 0x2d9   : > { %v5712_v1 = vadd.f32 %v8739_v46, %v5676_v21  ;;  %v5449_v42 = vadd.f32 %v5448_v35, %v5360_v39  ;;  %v8922_v21 = vld [vmem:[#allocation15_spill] sm:$0xff] }
 0x2db   : > { %v5744_v16 = vmax.f32 %v5712_v1, 0.0 }
 0x2dc   : > { %v5621_v3 = vpop.f32.mrf.mxu0  ;;  %v5362_v43 = vpop.f32.mrf.mxu1 }
 0x2dd   : > { %v5622_v41 = vadd.f32 %v5621_v3, %v5533_v24  ;;  %v5363_v51 = vadd.f32 %v5362_v43, %v8920_v63 }
 0x2de   : > { %v5535_v50 = vpop.f32.mrf.mxu3 }
 0x2df   : > { %v5677_v13 = vmul.f32 %v8721_v7, %v5622_v41  ;;  %v5536_v27 = vadd.f32 %v5535_v50, %v5447_v36  ;;  %v8923_v36 = vld [vmem:[#allocation16_spill] sm:$0xff] }
 0x2e0   : > { %v5451_v28 = vpop.f32.mrf.mxu2 }
 0x2e1   : > { %v5713_v58 = vadd.f32 %v8739_v46, %v5677_v13  ;;  %v5452_v62 = vadd.f32 %v5451_v28, %v5363_v51  ;;  %v8925_v51 = vld [vmem:[#allocation18_spill] sm:$0xff] }
 0x2e3   : > { %v5745_v52 = vmax.f32 %v5713_v58, 0.0 }
 0x2e4   : > { %v5624_v55 = vpop.f32.mrf.mxu0  ;;  %v5364_v23 = vpop.f32.mrf.mxu1 }
 0x2e5   : > { %v7155_v19 = vpack.c.bf16 %v5745_v52, %v5744_v16  ;;  %v5625_v60 = vadd.f32 %v5624_v55, %v5536_v27  ;;  %v5365_v38 = vadd.f32 %v5364_v23, %v5276_v34  ;;  %v8924_v23 = vld [vmem:[#allocation17_spill] sm:$0xff] }
 0x2e6   : > { %v5537_v15 = vpop.f32.mrf.mxu3 }
 0x2e7   : > { %7195 = vst [vmem:[%s8567_s7 + $0x48] sm:$0xff] %v7155_v19   ;;  %v5538_v17 = vadd.f32 %v5537_v15, %v5449_v42  ;;  %v5678_v5 = vmul.f32 %v8721_v7, %v5625_v60 }
 0x2e8   : > { %v5453_v40 = vpop.f32.mrf.mxu2 }
 0x2e9   : > { %v5714_v25 = vadd.f32 %v8739_v46, %v5678_v5  ;;  %v5454_v14 = vadd.f32 %v5453_v40, %v5365_v38  ;;  %v8926_v38 = vld [vmem:[#allocation19_spill] sm:$0xff] }
 0x2eb   : > { %v5746_v2 = vmax.f32 %v5714_v25, 0.0 }
 0x2ec   : > { %v5626_v12 = vpop.f32.mrf.mxu0  ;;  %v5367_v54 = vpop.f32.mrf.mxu1 }
 0x2ed   : > { %v5627_v31 = vadd.f32 %v5626_v12, %v5538_v17  ;;  %v5368_v3 = vadd.f32 %v5367_v54, %v8922_v21 }
 0x2ee   : > { %v5540_v61 = vpop.f32.mrf.mxu3 }
 0x2ef   : > { %v5679_v45 = vmul.f32 %v8721_v7, %v5627_v31  ;;  %v5541_v47 = vadd.f32 %v5540_v61, %v5452_v62 }
 0x2f0   : > { %v5456_v29 = vpop.f32.mrf.mxu2 }
 0x2f1   : > { %v5715_v37 = vadd.f32 %v8739_v46, %v5679_v45  ;;  %v5457_v44 = vadd.f32 %v5456_v29, %v5368_v3 }
 0x2f3   : > { %v5747_v48 = vmax.f32 %v5715_v37, 0.0 }
 0x2f4   : > { %v5629_v4 = vpop.f32.mrf.mxu0  ;;  %v5369_v18 = vpop.f32.mrf.mxu1 }
 0x2f5   : > { %v7160_v49 = vpack.c.bf16 %v5747_v48, %v5746_v2  ;;  %v5630_v30 = vadd.f32 %v5629_v4, %v5541_v47  ;;  %v5370_v58 = vadd.f32 %v5369_v18, %v8923_v36  ;;  %v8928_v36 = vld [vmem:[#allocation22_spill] sm:$0xff] }
 0x2f6   : > { %v5542_v33 = vpop.f32.mrf.mxu3 }
 0x2f7   : > { %7196 = vst [vmem:[%s8567_s7 + $0x50] sm:$0xff] %v7160_v49   ;;  %v5543_v26 = vadd.f32 %v5542_v33, %v5454_v14  ;;  %v5680_v20 = vmul.f32 %v8721_v7, %v5630_v30 }
 0x2f8   : > { %v5458_v0 = vpop.f32.mrf.mxu2 }
 0x2f9   : > { %v5716_v8 = vadd.f32 %v8739_v46, %v5680_v20  ;;  %v5459_v28 = vadd.f32 %v5458_v0, %v5370_v58 }
 0x2fb   : > { %v5748_v43 = vmax.f32 %v5716_v8, 0.0 }
 0x2fc   : > { %v5631_v24 = vpop.f32.mrf.mxu0  ;;  %v5372_v11 = vpop.f32.mrf.mxu1 }
 0x2fd   : > { %v5632_v35 = vadd.f32 %v5631_v24, %v5543_v26  ;;  %v5373_v60 = vadd.f32 %v5372_v11, %v8924_v23 }
 0x2fe   : > { %v5545_v57 = vpop.f32.mrf.mxu3 }
 0x2ff   : > { %v5681_v41 = vmul.f32 %v8721_v7, %v5632_v35  ;;  %v5546_v13 = vadd.f32 %v5545_v57, %v5457_v44  ;;  %v8927_v35 = vld [vmem:[#allocation20_spill] sm:$0xff] }
 0x300   : > { %v5461_v50 = vpop.f32.mrf.mxu2 }
 0x301   : > { %v5717_v10 = vadd.f32 %v8739_v46, %v5681_v41  ;;  %v5462_v12 = vadd.f32 %v5461_v50, %v5373_v60 }
 0x303   : > { %v5749_v1 = vmax.f32 %v5717_v10, 0.0 }
 0x304   : > { %v5634_v6 = vpop.f32.mrf.mxu0  ;;  %v5374_v27 = vpop.f32.mrf.mxu1 }
 0x305   : > { %v7165_v56 = vpack.c.bf16 %v5749_v1, %v5748_v43  ;;  %v5635_v52 = vadd.f32 %v5634_v6, %v5546_v13  ;;  %v5375_v61 = vadd.f32 %v5374_v27, %v8925_v51 }
 0x306   : > { %v5547_v16 = vpop.f32.mrf.mxu3 }
 0x307   : > { %7197 = vst [vmem:[%s8567_s7 + $0x58] sm:$0xff] %v7165_v56   ;;  %v5548_v39 = vadd.f32 %v5547_v16, %v5459_v28  ;;  %v5682_v19 = vmul.f32 %v8721_v7, %v5635_v52 }
 0x308   : > { %v5463_v55 = vpop.f32.mrf.mxu2 }
 0x309   : > { %v5718_v40 = vadd.f32 %v8739_v46, %v5682_v19  ;;  %v5464_v62 = vadd.f32 %v5463_v55, %v5375_v61 }
 0x30b   : > { %v5750_v59 = vmax.f32 %v5718_v40, 0.0 }
 0x30c   : > { %v5636_v42 = vpop.f32.mrf.mxu0  ;;  %v5377_v32 = vpop.f32.mrf.mxu1 }
 0x30d   : > { %v5637_v15 = vadd.f32 %v5636_v42, %v5548_v39  ;;  %v5378_v4 = vadd.f32 %v5377_v32, %v8926_v38 }
 0x30e   : > { %v5550_v17 = vpop.f32.mrf.mxu3 }
 0x30f   : > { %v5683_v5 = vmul.f32 %v8721_v7, %v5637_v15  ;;  %v5551_v63 = vadd.f32 %v5550_v17, %v5462_v12 }
 0x310   : > { %v5466_v25 = vpop.f32.mrf.mxu2 }
 0x311   : > { %v5719_v9 = vadd.f32 %v8739_v46, %v5683_v5  ;;  %v5467_v30 = vadd.f32 %v5466_v25, %v5378_v4 }
 0x313   : > { %v5751_v31 = vmax.f32 %v5719_v9, 0.0 }
 0x314   : > { %v5639_v54 = vpop.f32.mrf.mxu0  ;;  %v5379_v48 = vpop.f32.mrf.mxu1 }
 0x315   : > { %v7170_v45 = vpack.c.bf16 %v5751_v31, %v5750_v59  ;;  %v5640_v22 = vadd.f32 %v5639_v54, %v5551_v63  ;;  %v5380_v21 = vadd.f32 %v5379_v48, %v8927_v35 }
 0x316   : > { %v5552_v37 = vpop.f32.mrf.mxu3 }
 0x317   : > { %7198 = vst [vmem:[%s8567_s7 + $0x60] sm:$0xff] %v7170_v45   ;;  %v5553_v34 = vadd.f32 %v5552_v37, %v5464_v62  ;;  %v5684_v29 = vmul.f32 %v8721_v7, %v5640_v22 }
 0x318   : > { %v5468_v14 = vpop.f32.mrf.mxu2 }
 0x319   : > { %v5720_v33 = vadd.f32 %v8739_v46, %v5684_v29  ;;  %v5469_v11 = vadd.f32 %v5468_v14, %v5380_v21 }
 0x31b   : > { %v5752_v0 = vmax.f32 %v5720_v33, 0.0 }
 0x31c   : > { %v5641_v2 = vpop.f32.mrf.mxu0  ;;  %v5382_v41 = vpop.f32.mrf.mxu1 }
 0x31d   : > { %v5642_v47 = vadd.f32 %v5641_v2, %v5553_v34  ;;  %v5383_v58 = vadd.f32 %v5382_v41, %v8928_v36 }
 0x31e   : > { %v5555_v49 = vpop.f32.mrf.mxu3 }
 0x31f   : > { %v5685_v18 = vmul.f32 %v8721_v7, %v5642_v47  ;;  %v5556_v24 = vadd.f32 %v5555_v49, %v5467_v30 }
 0x320   : > { %v5471_v10 = vpop.f32.mrf.mxu2 }
 0x321   : > { %v5721_v26 = vadd.f32 %v8739_v46, %v5685_v18  ;;  %v5472_v16 = vadd.f32 %v5471_v10, %v5383_v58 }
 0x323   : > { %v5753_v20 = vmax.f32 %v5721_v26, 0.0 }
 0x324   : > { %v5644_v3 = vpop.f32.mrf.mxu0  ;;  %v5384_v52 = vpop.f32.mrf.mxu1 }
 0x325   : > { %v7175_v57 = vpack.c.bf16 %v5753_v20, %v5752_v0  ;;  %v5645_v44 = vadd.f32 %v5644_v3, %v5556_v24  ;;  %v5385_v15 = vadd.f32 %v5384_v52, %v8508_v53 }
 0x326   : > { %v5557_v8 = vpop.f32.mrf.mxu3 }
 0x327   : > { %7199 = vst [vmem:[%s8567_s7 + $0x68] sm:$0xff] %v7175_v57   ;;  %v5558_v50 = vadd.f32 %v5557_v8, %v5469_v11  ;;  %v5686_v43 = vmul.f32 %v8721_v7, %v5645_v44 }
 0x328   : > { %v5473_v39 = vpop.f32.mrf.mxu2 }
 0x329   : > { %v5722_v56 = vadd.f32 %v8739_v46, %v5686_v43  ;;  %v5474_v17 = vadd.f32 %v5473_v39, %v5385_v15 }
 0x32b   : > { %v5754_v55 = vmax.f32 %v5722_v56, 0.0 }
 0x32c   : > { %v5646_v1 = vpop.f32.mrf.mxu0 }
 0x32d   : > { %v5647_v13 = vadd.f32 %v5646_v1, %v5558_v50 }
 0x32e   : > { %v5560_v6 = vpop.f32.mrf.mxu3 }
 0x32f   : > { %v5687_v28 = vmul.f32 %v8721_v7, %v5647_v13  ;;  %v5561_v42 = vadd.f32 %v5560_v6, %v5472_v16 }
 0x331   : > { %v5723_v27 = vadd.f32 %v8739_v46, %v5687_v28 }
 0x333   : > { %v5755_v19 = vmax.f32 %v5723_v27, 0.0 }
 0x334   : > { %v5649_v23 = vpop.f32.mrf.mxu0 }
 0x335   : > { %v7180_v60 = vpack.c.bf16 %v5755_v19, %v5754_v55  ;;  %v5650_v40 = vadd.f32 %v5649_v23, %v5561_v42 }
 0x336   : > { %v5562_v5 = vpop.f32.mrf.mxu3 }
 0x337   : > { %7200 = vst [vmem:[%s8567_s7 + $0x70] sm:$0xff] %v7180_v60   ;;  %v5563_v12 = vadd.f32 %v5562_v5, %v5474_v17  ;;  %v5688_v9 = vmul.f32 %v8721_v7, %v5650_v40 }
 0x339   : > { %v5724_v53 = vadd.f32 %v8739_v46, %v5688_v9 }
 0x33b   : > { %v5756_v51 = vmax.f32 %v5724_v53, 0.0 }
 0x33c   : > { %v5651_v32 = vpop.f32.mrf.mxu0 }
 0x33d   : > { %v5652_v59 = vadd.f32 %v5651_v32, %v5563_v12 }
 0x33f   : > { %v5689_v31 = vmul.f32 %v8721_v7, %v5652_v59 }
 0x341   : > { %v5725_v63 = vadd.f32 %v8739_v46, %v5689_v31 }
 0x343   : > { %v5757_v61 = vmax.f32 %v5725_v63, 0.0 }
 0x345   : > { %v7185_v54 = vpack.c.bf16 %v5757_v61, %v5756_v51 }
 0x347   : > { %7201 = vst [vmem:[%s8567_s7 + $0x78] sm:$0xff] %v7185_v54  }
 0x348   : > { %7395 = shalt.err (!%p7392_p0)
}
 0x349   : > { %s7460_s10 = smov 64   ;;  %s7461_s7 = smov 4  }
 0x34a   : > { %7232 = dma.vmem_to_hbm [thread:$0]  (%p7569_p5), %s5837_s24, 2048, %s5839_s13, %s5823_s18, %s7460_s10, %s7460_s10, %s7461_s7  }
 0x34b PF: > { %s5853_s9 = sand.u32 1, %s7434_s15   ;;  %p7243_p3 = pnand %p5964_p11, %p7536_p6 }
 0x34c   : > { %s5854_s14 = scalar_lea.sflag [#allocation6], %s5853_s9 }
 0x34d   : > { %p7244_p7 = pneg %p7243_p3 }
 0x34f   : > { %7429 = dma.done.wait (%p7244_p7), %s5854_s14, 2048  }
 0x350   : > { %7431 = vsyncadd (%p7244_p7), %s5854_s14, 4294965248  ;;  %s21_s20 = sadd.s32 1, %s7454_s20   ;;  %s8929_s12 = sld [smem:[#allocation13_spill]] }
 0x351   : > { %p18_p9 = scmp.ge.s32.totalorder %s21_s20, 4   ;;  %s8930_s15 = smov %s7438_s16 }
 0x352   : > { %s8931_s16 = smov %s7442_s17  ;;  %s8932_s17 = smov %s7578_s22 }
 0x353   : > { %s8933_s18 = smov %s7450_s19  ;;  %20 = sbr.rel (!%p18_p9) target bundleno = 9 (0x9), region = 99 }
 0x356   : > { %s8934_s19 = smov %s8929_s12 }
 0x358   :  { %5860 = vsyncpa [#allocation5], 1 }
 0x359   :  { %5862 = vsyncpa [#allocation5 + $0x1], 1 }
 0x35a   :  { %5863 = vsyncpa [#allocation8], 1 }
 0x35b   :  { %5864 = vsyncpa [#allocation6], 1 }
 0x35c   :  { %5866 = vsyncpa [#allocation6 + $0x1], 1 }

</bundles_post_ra>
